<compile_context>
chip_gen: v6e
topology: v6e:2x2x1
jax: 0.10.0
libtpu: 0.0.40
codegen_flags: <defaults>
</compile_context>

<pallas_src>
import functools

import jax
import jax.numpy as jnp
from jax.experimental import pallas as pl
from jax.experimental.pallas import tpu as pltpu  # noqa: F401  (TPU backend)


def _round_up(x, m):
    return ((x + m - 1) // m) * m


# ------------------------------ fused kernel --------------------------------

def fused_rnn_kernel(idx_ref, table_ref,
                     wih0_ref, whh0_ref, b0_ref, bn0_ref,
                     wih1_ref, whh1_ref, b1_ref, bn1_ref,
                     lw_ref, lb_ref, out_ref, *, T, BP, HP):
    """Embedding -> GRU layer 0 -> GRU layer 1 -> Linear(last timestep).

    idx_ref:   (T*BP, 1) int32 token ids (time-major, row = t*BP + b; padded
               batch rows hold token 0 and are discarded by the wrapper)
    table_ref: (VP, HP)  embedding table, row/lane padded with zeros
    wih*_ref:  (HP, 3*HP) gate-major padded input->hidden weights
    whh*_ref:  (HP, 3*HP) gate-major padded hidden->hidden weights
    b*_ref:    (1, 3*HP)  biases: r/z gates hold (b_ih + b_hh), n gate holds b_ih
    bn*_ref:   (1, HP)    n-gate hidden bias (applied inside r * (...))
    lw_ref:    (HP, OUTP) padded linear weight;  lb_ref: (1, OUTP)
    out_ref:   (BP, OUTP) lane-dense padded output slab
    """
    N = T * BP
    VP = table_ref.shape[0]

    # --- Embedding as a one-hot matmul gather (tiny vocab; one batched MXU op,
    # off the recurrent critical path).
    # TODO(synk): switch to a real row gather / per-row DMA if vocab grows.
    iota = jax.lax.broadcasted_iota(jnp.int32, (N, VP), 1)
    onehot = (iota == idx_ref[...]).astype(jnp.float32)              # (N, VP)
    x = jnp.dot(onehot, table_ref[...],
                preferred_element_type=jnp.float32)                  # (N, HP)

    h = jnp.zeros((BP, HP), jnp.float32)
    for wih_ref, whh_ref, b_ref, bn_ref in (
            (wih0_ref, whh0_ref, b0_ref, bn0_ref),
            (wih1_ref, whh1_ref, b1_ref, bn1_ref)):
        # Batched input projection for all T timesteps at once.
        gi = jnp.dot(x, wih_ref[...],
                     preferred_element_type=jnp.float32) + b_ref[...]  # (N, 3*HP)
        gi_r = gi[:, 0:HP]          # vreg-aligned gate slabs (128-lane slices)
        gi_z = gi[:, HP:2 * HP]
        gi_n = gi[:, 2 * HP:3 * HP]
        whh = whh_ref[...]
        bhh_n = bn_ref[...]

        h = jnp.zeros((BP, HP), jnp.float32)
        outs = []
        # Statically unrolled (T=8); only h @ Whh is serial.
        # TODO(synk): for long sequences use lax.fori_loop + VMEM scratch.
        for t in range(T):
            gh = jnp.dot(h, whh, preferred_element_type=jnp.float32)  # (BP, 3*HP)
            gh_r = gh[:, 0:HP]
            gh_z = gh[:, HP:2 * HP]
            gh_n = gh[:, 2 * HP:3 * HP]
            lo, hi = t * BP, (t + 1) * BP      # sublane-tile aligned (BP = 8k)
            r = jax.nn.sigmoid(gi_r[lo:hi] + gh_r)
            z = jax.nn.sigmoid(gi_z[lo:hi] + gh_z)
            n = jnp.tanh(gi_n[lo:hi] + r * (gh_n + bhh_n))
            h = (1.0 - z) * n + z * h
            outs.append(h)
        x = jnp.concatenate(outs, axis=0)        # (N, HP) next-layer input

    # `h` is the last-timestep hidden state of the top layer.
    out_ref[...] = (jnp.dot(h, lw_ref[...], preferred_element_type=jnp.float32)
                    + lb_ref[...])


# --------------------------- parameter packing ------------------------------

def pack_operands(params, hp, outp):
    """PyTorch-layout params -> gate-major, (8,128)-padded kernel operands."""
    emb = params["embedding"]
    v, e = emb.shape
    vp = _round_up(v, 128)
    table_pad = jnp.zeros((vp, hp), jnp.float32).at[:v, :e].set(emb)
    operands = [table_pad]

    for layer in params["gru"]:
        wih, whh = layer["wih"], layer["whh"]          # (3H, in), (3H, H)
        bih, bhh = layer["bih"], layer["bhh"]          # (3H,), (3H,)
        in_dim = wih.shape[1]
        h = whh.shape[1]
        wih_pad = jnp.zeros((hp, 3 * hp), jnp.float32)
        whh_pad = jnp.zeros((hp, 3 * hp), jnp.float32)
        for g in range(3):                              # gate order: r, z, n
            wih_pad = wih_pad.at[:in_dim, g * hp:g * hp + h].set(
                wih[g * h:(g + 1) * h, :].T)
            whh_pad = whh_pad.at[:h, g * hp:g * hp + h].set(
                whh[g * h:(g + 1) * h, :].T)
        b_pad = jnp.zeros((1, 3 * hp), jnp.float32)
        b_pad = b_pad.at[0, 0 * hp:0 * hp + h].set(bih[0:h] + bhh[0:h])          # r
        b_pad = b_pad.at[0, 1 * hp:1 * hp + h].set(bih[h:2 * h] + bhh[h:2 * h])  # z
        b_pad = b_pad.at[0, 2 * hp:2 * hp + h].set(bih[2 * h:3 * h])             # n (ih)
        bn_pad = jnp.zeros((1, hp), jnp.float32).at[0, :h].set(bhh[2 * h:3 * h])  # n (hh)
        operands += [wih_pad, whh_pad, b_pad, bn_pad]

    lw = params["l1_w"]                                 # (OUT, E)
    out_dim, e2 = lw.shape
    lw_pad = jnp.zeros((hp, outp), jnp.float32).at[:e2, :out_dim].set(lw.T)
    lb_pad = jnp.zeros((1, outp), jnp.float32).at[0, :out_dim].set(params["l1_b"])
    operands += [lw_pad, lb_pad]
    return operands


# -------------------------------- forward -----------------------------------

def rnn_forward(tokens, params):
    T, B = tokens.shape
    hidden = params["gru"][0]["whh"].shape[1]
    HP = _round_up(hidden, 128)                         # lane-pad each gate
    BP = _round_up(max(B, 8), 8)                        # sublane-pad batch
    out_dim = params["l1_w"].shape[0]
    OUTP = _round_up(out_dim, 128)                      # lane-dense output slab

    operands = pack_operands(params, HP, OUTP)
    idx = (jnp.zeros((T, BP), jnp.int32)
           .at[:, :B].set(tokens.astype(jnp.int32))
           .reshape(T * BP, 1))
    kernel = functools.partial(fused_rnn_kernel, T=T, BP=BP, HP=HP)

    # Whole network in one grid-less pallas_call; every operand is a full-array
    # VMEM block (total footprint < 1 MiB, fine on v5e/v6e/v7x).
    # TODO(synk): if batch grows, add a "parallel" batch grid axis so v7x's
    # second TensorCore can shard the recurrence.
    out_pad = pl.pallas_call(
        kernel,
        out_shape=jax.ShapeDtypeStruct((BP, OUTP), jnp.float32),
    )(idx, *operands)
    return out_pad[:B, :out_dim]


# ------------------------ deterministic parameters ---------------------------

def init_params(key, vocab, embed_dim, out_dim, num_layers=2):
    keys = iter(jax.random.split(key, 3 + 4 * num_layers))
    bound = 1.0 / (embed_dim ** 0.5)
    params = {
        "embedding": jax.random.normal(next(keys), (vocab, embed_dim),
                                       jnp.float32)
    }
    gru = []
    for _ in range(num_layers):
        in_dim = embed_dim      # layer0: embed size; layer1: hidden == embed
        gru.append(dict(
            wih=jax.random.uniform(next(keys), (3 * embed_dim, in_dim),
                                   jnp.float32, -bound, bound),
            whh=jax.random.uniform(next(keys), (3 * embed_dim, embed_dim),
                                   jnp.float32, -bound, bound),
            bih=jax.random.uniform(next(keys), (3 * embed_dim,),
                                   jnp.float32, -bound, bound),
            bhh=jax.random.uniform(next(keys), (3 * embed_dim,),
                                   jnp.float32, -bound, bound),
        ))
    params["gru"] = gru
    params["l1_w"] = jax.random.uniform(next(keys), (out_dim, embed_dim),
                                        jnp.float32, -bound, bound)
    params["l1_b"] = jax.random.uniform(next(keys), (out_dim,),
                                        jnp.float32, -bound, bound)
    return params


# ---------------------------- pure-JAX reference -----------------------------

def rnn_reference(tokens, params):
    T, B = tokens.shape
    x = params["embedding"][tokens]                     # (T, B, E)
    for layer in params["gru"]:
        hidden = layer["whh"].shape[1]
        h = jnp.zeros((B, hidden), jnp.float32)
        outs = []
        for t in range(T):
            gi = x[t] @ layer["wih"].T + layer["bih"]
            gh = h @ layer["whh"].T + layer["bhh"]
            i_r, i_z, i_n = jnp.split(gi, 3, axis=-1)
            h_r, h_z, h_n = jnp.split(gh, 3, axis=-1)
            r = jax.nn.sigmoid(i_r + h_r)
            z = jax.nn.sigmoid(i_z + h_z)
            n = jnp.tanh(i_n + r * h_n)
            h = (1.0 - z) * n + z * h
            outs.append(h)
        x = jnp.stack(outs)
    return x[-1] @ params["l1_w"].T + params["l1_b"]


# ----------------------------------- main ------------------------------------

if __name__ == "__main__":
    T, B = 8, 2                  # seq len, batch
    VOCAB, E, OUT = 50, 32, 10   # vocab, embed (== hidden), output size

    key = jax.random.PRNGKey(0)
    kparam, ktok = jax.random.split(key)
    params = init_params(kparam, VOCAB, E, OUT)
    tokens = jax.random.randint(ktok, (T, B), 0, VOCAB, dtype=jnp.int32)

    fwd = jax.jit(rnn_forward)   # fuses packing + kernel + un-pad slice
    out = jax.block_until_ready(fwd(tokens, params))
    assert out.shape == (B, OUT)

    ref = rnn_reference(tokens, params)
    assert jnp.allclose(out, ref, atol=1e-3, rtol=1e-3), \
        float(jnp.max(jnp.abs(out - ref)))

    print("KERNEL_OK")
</pallas_src>

<mosaic_0001>
module attributes {stable_mosaic.version = 11 : i64} {
  func.func @fused_rnn_kernel(%arg0: memref<64x1xi32, #tpu.memory_space<vmem>>, %arg1: memref<128x128xf32, #tpu.memory_space<vmem>>, %arg2: memref<128x384xf32, #tpu.memory_space<vmem>>, %arg3: memref<128x384xf32, #tpu.memory_space<vmem>>, %arg4: memref<1x384xf32, #tpu.memory_space<vmem>>, %arg5: memref<1x128xf32, #tpu.memory_space<vmem>>, %arg6: memref<128x384xf32, #tpu.memory_space<vmem>>, %arg7: memref<128x384xf32, #tpu.memory_space<vmem>>, %arg8: memref<1x384xf32, #tpu.memory_space<vmem>>, %arg9: memref<1x128xf32, #tpu.memory_space<vmem>>, %arg10: memref<128x128xf32, #tpu.memory_space<vmem>>, %arg11: memref<1x128xf32, #tpu.memory_space<vmem>>, %arg12: memref<8x128xf32, #tpu.memory_space<vmem>>) attributes {dimension_semantics = [], scalar_prefetch = 0 : i64, scratch_operands = 0 : i64, tpu.core_type = #tpu.core_type<tc>} {
    %0 = tpu.iota {dimensions = array<i32: 1>} : vector<64x128xi32>
    %c0 = arith.constant 0 : index
    %c0_0 = arith.constant 0 : index
    %1 = vector.load %arg0[%c0, %c0_0] : memref<64x1xi32, #tpu.memory_space<vmem>>, vector<64x1xi32>
    %2 = vector.broadcast %1 : vector<64x1xi32> to vector<64x128xi32>
    %3 = arith.cmpi eq, %0, %2 : vector<64x128xi32>
    %4 = arith.extui %3 : vector<64x128xi1> to vector<64x128xi32>
    %5 = arith.sitofp %4 : vector<64x128xi32> to vector<64x128xf32>
    %c0_1 = arith.constant 0 : index
    %c0_2 = arith.constant 0 : index
    %6 = vector.load %arg1[%c0_1, %c0_2] : memref<128x128xf32, #tpu.memory_space<vmem>>, vector<128x128xf32>
    %cst = arith.constant dense<0.000000e+00> : vector<64x128xf32>
    %7 = tpu.matmul %5, %6, %cst {dimension_numbers = #tpu.dot_dimension_numbers<[1], [0], [0], [1], [0, 0, 1, 1], [], []>} : vector<64x128xf32>, vector<128x128xf32>, vector<64x128xf32> -> vector<64x128xf32>
    %c0_3 = arith.constant 0 : index
    %c0_4 = arith.constant 0 : index
    %8 = vector.load %arg2[%c0_3, %c0_4] : memref<128x384xf32, #tpu.memory_space<vmem>>, vector<128x384xf32>
    %cst_5 = arith.constant dense<0.000000e+00> : vector<64x384xf32>
    %9 = tpu.matmul %7, %8, %cst_5 {dimension_numbers = #tpu.dot_dimension_numbers<[1], [0], [0], [1], [0, 0, 1, 1], [], []>} : vector<64x128xf32>, vector<128x384xf32>, vector<64x384xf32> -> vector<64x384xf32>
    %c0_6 = arith.constant 0 : index
    %c0_7 = arith.constant 0 : index
    %10 = vector.load %arg4[%c0_6, %c0_7] : memref<1x384xf32, #tpu.memory_space<vmem>>, vector<1x384xf32>
    %11 = vector.broadcast %10 : vector<1x384xf32> to vector<64x384xf32>
    %12 = arith.addf %9, %11 : vector<64x384xf32>
    %13 = vector.extract_strided_slice %12 {offsets = [0, 0], sizes = [64, 128], strides = [1, 1]} : vector<64x384xf32> to vector<64x128xf32>
    %14 = vector.extract_strided_slice %12 {offsets = [0, 128], sizes = [64, 128], strides = [1, 1]} : vector<64x384xf32> to vector<64x128xf32>
    %15 = vector.extract_strided_slice %12 {offsets = [0, 256], sizes = [64, 128], strides = [1, 1]} : vector<64x384xf32> to vector<64x128xf32>
    %c0_8 = arith.constant 0 : index
    %c0_9 = arith.constant 0 : index
    %16 = vector.load %arg3[%c0_8, %c0_9] : memref<128x384xf32, #tpu.memory_space<vmem>>, vector<128x384xf32>
    %c0_10 = arith.constant 0 : index
    %c0_11 = arith.constant 0 : index
    %17 = vector.load %arg5[%c0_10, %c0_11] : memref<1x128xf32, #tpu.memory_space<vmem>>, vector<1x128xf32>
    %cst_12 = arith.constant 0.000000e+00 : f32
    %18 = vector.broadcast %cst_12 : f32 to vector<8x128xf32>
    %cst_13 = arith.constant dense<0.000000e+00> : vector<8x384xf32>
    %19 = tpu.matmul %18, %16, %cst_13 {dimension_numbers = #tpu.dot_dimension_numbers<[1], [0], [0], [1], [0, 0, 1, 1], [], []>} : vector<8x128xf32>, vector<128x384xf32>, vector<8x384xf32> -> vector<8x384xf32>
    %20 = vector.extract_strided_slice %19 {offsets = [0, 0], sizes = [8, 128], strides = [1, 1]} : vector<8x384xf32> to vector<8x128xf32>
    %21 = vector.extract_strided_slice %19 {offsets = [0, 128], sizes = [8, 128], strides = [1, 1]} : vector<8x384xf32> to vector<8x128xf32>
    %22 = vector.extract_strided_slice %19 {offsets = [0, 256], sizes = [8, 128], strides = [1, 1]} : vector<8x384xf32> to vector<8x128xf32>
    %23 = vector.extract_strided_slice %13 {offsets = [0, 0], sizes = [8, 128], strides = [1, 1]} : vector<64x128xf32> to vector<8x128xf32>
    %24 = arith.addf %23, %20 : vector<8x128xf32>
    %25 = arith.negf %24 : vector<8x128xf32>
    %26 = math.exp %25 : vector<8x128xf32>
    %cst_14 = arith.constant 1.000000e+00 : f32
    %27 = vector.broadcast %cst_14 : f32 to vector<8x128xf32>
    %28 = arith.addf %27, %26 : vector<8x128xf32>
    %29 = arith.divf %27, %28 : vector<8x128xf32>
    %30 = vector.extract_strided_slice %14 {offsets = [0, 0], sizes = [8, 128], strides = [1, 1]} : vector<64x128xf32> to vector<8x128xf32>
    %31 = arith.addf %30, %21 : vector<8x128xf32>
    %32 = arith.negf %31 : vector<8x128xf32>
    %33 = math.exp %32 : vector<8x128xf32>
    %cst_15 = arith.constant 1.000000e+00 : f32
    %34 = vector.broadcast %cst_15 : f32 to vector<8x128xf32>
    %35 = arith.addf %34, %33 : vector<8x128xf32>
    %36 = arith.divf %34, %35 : vector<8x128xf32>
    %37 = vector.extract_strided_slice %15 {offsets = [0, 0], sizes = [8, 128], strides = [1, 1]} : vector<64x128xf32> to vector<8x128xf32>
    %38 = vector.broadcast %17 : vector<1x128xf32> to vector<8x128xf32>
    %39 = arith.addf %22, %38 : vector<8x128xf32>
    %40 = arith.mulf %29, %39 : vector<8x128xf32>
    %41 = arith.addf %37, %40 : vector<8x128xf32>
    %42 = math.tanh %41 : vector<8x128xf32>
    %cst_16 = arith.constant 1.000000e+00 : f32
    %43 = vector.broadcast %cst_16 : f32 to vector<8x128xf32>
    %44 = arith.subf %43, %36 : vector<8x128xf32>
    %45 = arith.mulf %44, %42 : vector<8x128xf32>
    %46 = arith.mulf %36, %18 : vector<8x128xf32>
    %47 = arith.addf %45, %46 : vector<8x128xf32>
    %cst_17 = arith.constant dense<0.000000e+00> : vector<8x384xf32>
    %48 = tpu.matmul %47, %16, %cst_17 {dimension_numbers = #tpu.dot_dimension_numbers<[1], [0], [0], [1], [0, 0, 1, 1], [], []>} : vector<8x128xf32>, vector<128x384xf32>, vector<8x384xf32> -> vector<8x384xf32>
    %49 = vector.extract_strided_slice %48 {offsets = [0, 0], sizes = [8, 128], strides = [1, 1]} : vector<8x384xf32> to vector<8x128xf32>
    %50 = vector.extract_strided_slice %48 {offsets = [0, 128], sizes = [8, 128], strides = [1, 1]} : vector<8x384xf32> to vector<8x128xf32>
    %51 = vector.extract_strided_slice %48 {offsets = [0, 256], sizes = [8, 128], strides = [1, 1]} : vector<8x384xf32> to vector<8x128xf32>
    %52 = vector.extract_strided_slice %13 {offsets = [8, 0], sizes = [8, 128], strides = [1, 1]} : vector<64x128xf32> to vector<8x128xf32>
    %53 = arith.addf %52, %49 : vector<8x128xf32>
    %54 = arith.negf %53 : vector<8x128xf32>
    %55 = math.exp %54 : vector<8x128xf32>
    %cst_18 = arith.constant 1.000000e+00 : f32
    %56 = vector.broadcast %cst_18 : f32 to vector<8x128xf32>
    %57 = arith.addf %56, %55 : vector<8x128xf32>
    %58 = arith.divf %56, %57 : vector<8x128xf32>
    %59 = vector.extract_strided_slice %14 {offsets = [8, 0], sizes = [8, 128], strides = [1, 1]} : vector<64x128xf32> to vector<8x128xf32>
    %60 = arith.addf %59, %50 : vector<8x128xf32>
    %61 = arith.negf %60 : vector<8x128xf32>
    %62 = math.exp %61 : vector<8x128xf32>
    %cst_19 = arith.constant 1.000000e+00 : f32
    %63 = vector.broadcast %cst_19 : f32 to vector<8x128xf32>
    %64 = arith.addf %63, %62 : vector<8x128xf32>
    %65 = arith.divf %63, %64 : vector<8x128xf32>
    %66 = vector.extract_strided_slice %15 {offsets = [8, 0], sizes = [8, 128], strides = [1, 1]} : vector<64x128xf32> to vector<8x128xf32>
    %67 = vector.broadcast %17 : vector<1x128xf32> to vector<8x128xf32>
    %68 = arith.addf %51, %67 : vector<8x128xf32>
    %69 = arith.mulf %58, %68 : vector<8x128xf32>
    %70 = arith.addf %66, %69 : vector<8x128xf32>
    %71 = math.tanh %70 : vector<8x128xf32>
    %cst_20 = arith.constant 1.000000e+00 : f32
    %72 = vector.broadcast %cst_20 : f32 to vector<8x128xf32>
    %73 = arith.subf %72, %65 : vector<8x128xf32>
    %74 = arith.mulf %73, %71 : vector<8x128xf32>
    %75 = arith.mulf %65, %47 : vector<8x128xf32>
    %76 = arith.addf %74, %75 : vector<8x128xf32>
    %cst_21 = arith.constant dense<0.000000e+00> : vector<8x384xf32>
    %77 = tpu.matmul %76, %16, %cst_21 {dimension_numbers = #tpu.dot_dimension_numbers<[1], [0], [0], [1], [0, 0, 1, 1], [], []>} : vector<8x128xf32>, vector<128x384xf32>, vector<8x384xf32> -> vector<8x384xf32>
    %78 = vector.extract_strided_slice %77 {offsets = [0, 0], sizes = [8, 128], strides = [1, 1]} : vector<8x384xf32> to vector<8x128xf32>
    %79 = vector.extract_strided_slice %77 {offsets = [0, 128], sizes = [8, 128], strides = [1, 1]} : vector<8x384xf32> to vector<8x128xf32>
    %80 = vector.extract_strided_slice %77 {offsets = [0, 256], sizes = [8, 128], strides = [1, 1]} : vector<8x384xf32> to vector<8x128xf32>
    %81 = vector.extract_strided_slice %13 {offsets = [16, 0], sizes = [8, 128], strides = [1, 1]} : vector<64x128xf32> to vector<8x128xf32>
    %82 = arith.addf %81, %78 : vector<8x128xf32>
    %83 = arith.negf %82 : vector<8x128xf32>
    %84 = math.exp %83 : vector<8x128xf32>
    %cst_22 = arith.constant 1.000000e+00 : f32
    %85 = vector.broadcast %cst_22 : f32 to vector<8x128xf32>
    %86 = arith.addf %85, %84 : vector<8x128xf32>
    %87 = arith.divf %85, %86 : vector<8x128xf32>
    %88 = vector.extract_strided_slice %14 {offsets = [16, 0], sizes = [8, 128], strides = [1, 1]} : vector<64x128xf32> to vector<8x128xf32>
    %89 = arith.addf %88, %79 : vector<8x128xf32>
    %90 = arith.negf %89 : vector<8x128xf32>
    %91 = math.exp %90 : vector<8x128xf32>
    %cst_23 = arith.constant 1.000000e+00 : f32
    %92 = vector.broadcast %cst_23 : f32 to vector<8x128xf32>
    %93 = arith.addf %92, %91 : vector<8x128xf32>
    %94 = arith.divf %92, %93 : vector<8x128xf32>
    %95 = vector.extract_strided_slice %15 {offsets = [16, 0], sizes = [8, 128], strides = [1, 1]} : vector<64x128xf32> to vector<8x128xf32>
    %96 = vector.broadcast %17 : vector<1x128xf32> to vector<8x128xf32>
    %97 = arith.addf %80, %96 : vector<8x128xf32>
    %98 = arith.mulf %87, %97 : vector<8x128xf32>
    %99 = arith.addf %95, %98 : vector<8x128xf32>
    %100 = math.tanh %99 : vector<8x128xf32>
    %cst_24 = arith.constant 1.000000e+00 : f32
    %101 = vector.broadcast %cst_24 : f32 to vector<8x128xf32>
    %102 = arith.subf %101, %94 : vector<8x128xf32>
    %103 = arith.mulf %102, %100 : vector<8x128xf32>
    %104 = arith.mulf %94, %76 : vector<8x128xf32>
    %105 = arith.addf %103, %104 : vector<8x128xf32>
    %cst_25 = arith.constant dense<0.000000e+00> : vector<8x384xf32>
    %106 = tpu.matmul %105, %16, %cst_25 {dimension_numbers = #tpu.dot_dimension_numbers<[1], [0], [0], [1], [0, 0, 1, 1], [], []>} : vector<8x128xf32>, vector<128x384xf32>, vector<8x384xf32> -> vector<8x384xf32>
    %107 = vector.extract_strided_slice %106 {offsets = [0, 0], sizes = [8, 128], strides = [1, 1]} : vector<8x384xf32> to vector<8x128xf32>
    %108 = vector.extract_strided_slice %106 {offsets = [0, 128], sizes = [8, 128], strides = [1, 1]} : vector<8x384xf32> to vector<8x128xf32>
    %109 = vector.extract_strided_slice %106 {offsets = [0, 256], sizes = [8, 128], strides = [1, 1]} : vector<8x384xf32> to vector<8x128xf32>
    %110 = vector.extract_strided_slice %13 {offsets = [24, 0], sizes = [8, 128], strides = [1, 1]} : vector<64x128xf32> to vector<8x128xf32>
    %111 = arith.addf %110, %107 : vector<8x128xf32>
    %112 = arith.negf %111 : vector<8x128xf32>
    %113 = math.exp %112 : vector<8x128xf32>
    %cst_26 = arith.constant 1.000000e+00 : f32
    %114 = vector.broadcast %cst_26 : f32 to vector<8x128xf32>
    %115 = arith.addf %114, %113 : vector<8x128xf32>
    %116 = arith.divf %114, %115 : vector<8x128xf32>
    %117 = vector.extract_strided_slice %14 {offsets = [24, 0], sizes = [8, 128], strides = [1, 1]} : vector<64x128xf32> to vector<8x128xf32>
    %118 = arith.addf %117, %108 : vector<8x128xf32>
    %119 = arith.negf %118 : vector<8x128xf32>
    %120 = math.exp %119 : vector<8x128xf32>
    %cst_27 = arith.constant 1.000000e+00 : f32
    %121 = vector.broadcast %cst_27 : f32 to vector<8x128xf32>
    %122 = arith.addf %121, %120 : vector<8x128xf32>
    %123 = arith.divf %121, %122 : vector<8x128xf32>
    %124 = vector.extract_strided_slice %15 {offsets = [24, 0], sizes = [8, 128], strides = [1, 1]} : vector<64x128xf32> to vector<8x128xf32>
    %125 = vector.broadcast %17 : vector<1x128xf32> to vector<8x128xf32>
    %126 = arith.addf %109, %125 : vector<8x128xf32>
    %127 = arith.mulf %116, %126 : vector<8x128xf32>
    %128 = arith.addf %124, %127 : vector<8x128xf32>
    %129 = math.tanh %128 : vector<8x128xf32>
    %cst_28 = arith.constant 1.000000e+00 : f32
    %130 = vector.broadcast %cst_28 : f32 to vector<8x128xf32>
    %131 = arith.subf %130, %123 : vector<8x128xf32>
    %132 = arith.mulf %131, %129 : vector<8x128xf32>
    %133 = arith.mulf %123, %105 : vector<8x128xf32>
    %134 = arith.addf %132, %133 : vector<8x128xf32>
    %cst_29 = arith.constant dense<0.000000e+00> : vector<8x384xf32>
    %135 = tpu.matmul %134, %16, %cst_29 {dimension_numbers = #tpu.dot_dimension_numbers<[1], [0], [0], [1], [0, 0, 1, 1], [], []>} : vector<8x128xf32>, vector<128x384xf32>, vector<8x384xf32> -> vector<8x384xf32>
    %136 = vector.extract_strided_slice %135 {offsets = [0, 0], sizes = [8, 128], strides = [1, 1]} : vector<8x384xf32> to vector<8x128xf32>
    %137 = vector.extract_strided_slice %135 {offsets = [0, 128], sizes = [8, 128], strides = [1, 1]} : vector<8x384xf32> to vector<8x128xf32>
    %138 = vector.extract_strided_slice %135 {offsets = [0, 256], sizes = [8, 128], strides = [1, 1]} : vector<8x384xf32> to vector<8x128xf32>
    %139 = vector.extract_strided_slice %13 {offsets = [32, 0], sizes = [8, 128], strides = [1, 1]} : vector<64x128xf32> to vector<8x128xf32>
    %140 = arith.addf %139, %136 : vector<8x128xf32>
    %141 = arith.negf %140 : vector<8x128xf32>
    %142 = math.exp %141 : vector<8x128xf32>
    %cst_30 = arith.constant 1.000000e+00 : f32
    %143 = vector.broadcast %cst_30 : f32 to vector<8x128xf32>
    %144 = arith.addf %143, %142 : vector<8x128xf32>
    %145 = arith.divf %143, %144 : vector<8x128xf32>
    %146 = vector.extract_strided_slice %14 {offsets = [32, 0], sizes = [8, 128], strides = [1, 1]} : vector<64x128xf32> to vector<8x128xf32>
    %147 = arith.addf %146, %137 : vector<8x128xf32>
    %148 = arith.negf %147 : vector<8x128xf32>
    %149 = math.exp %148 : vector<8x128xf32>
    %cst_31 = arith.constant 1.000000e+00 : f32
    %150 = vector.broadcast %cst_31 : f32 to vector<8x128xf32>
    %151 = arith.addf %150, %149 : vector<8x128xf32>
    %152 = arith.divf %150, %151 : vector<8x128xf32>
    %153 = vector.extract_strided_slice %15 {offsets = [32, 0], sizes = [8, 128], strides = [1, 1]} : vector<64x128xf32> to vector<8x128xf32>
    %154 = vector.broadcast %17 : vector<1x128xf32> to vector<8x128xf32>
    %155 = arith.addf %138, %154 : vector<8x128xf32>
    %156 = arith.mulf %145, %155 : vector<8x128xf32>
    %157 = arith.addf %153, %156 : vector<8x128xf32>
    %158 = math.tanh %157 : vector<8x128xf32>
    %cst_32 = arith.constant 1.000000e+00 : f32
    %159 = vector.broadcast %cst_32 : f32 to vector<8x128xf32>
    %160 = arith.subf %159, %152 : vector<8x128xf32>
    %161 = arith.mulf %160, %158 : vector<8x128xf32>
    %162 = arith.mulf %152, %134 : vector<8x128xf32>
    %163 = arith.addf %161, %162 : vector<8x128xf32>
    %cst_33 = arith.constant dense<0.000000e+00> : vector<8x384xf32>
    %164 = tpu.matmul %163, %16, %cst_33 {dimension_numbers = #tpu.dot_dimension_numbers<[1], [0], [0], [1], [0, 0, 1, 1], [], []>} : vector<8x128xf32>, vector<128x384xf32>, vector<8x384xf32> -> vector<8x384xf32>
    %165 = vector.extract_strided_slice %164 {offsets = [0, 0], sizes = [8, 128], strides = [1, 1]} : vector<8x384xf32> to vector<8x128xf32>
    %166 = vector.extract_strided_slice %164 {offsets = [0, 128], sizes = [8, 128], strides = [1, 1]} : vector<8x384xf32> to vector<8x128xf32>
    %167 = vector.extract_strided_slice %164 {offsets = [0, 256], sizes = [8, 128], strides = [1, 1]} : vector<8x384xf32> to vector<8x128xf32>
    %168 = vector.extract_strided_slice %13 {offsets = [40, 0], sizes = [8, 128], strides = [1, 1]} : vector<64x128xf32> to vector<8x128xf32>
    %169 = arith.addf %168, %165 : vector<8x128xf32>
    %170 = arith.negf %169 : vector<8x128xf32>
    %171 = math.exp %170 : vector<8x128xf32>
    %cst_34 = arith.constant 1.000000e+00 : f32
    %172 = vector.broadcast %cst_34 : f32 to vector<8x128xf32>
    %173 = arith.addf %172, %171 : vector<8x128xf32>
    %174 = arith.divf %172, %173 : vector<8x128xf32>
    %175 = vector.extract_strided_slice %14 {offsets = [40, 0], sizes = [8, 128], strides = [1, 1]} : vector<64x128xf32> to vector<8x128xf32>
    %176 = arith.addf %175, %166 : vector<8x128xf32>
    %177 = arith.negf %176 : vector<8x128xf32>
    %178 = math.exp %177 : vector<8x128xf32>
    %cst_35 = arith.constant 1.000000e+00 : f32
    %179 = vector.broadcast %cst_35 : f32 to vector<8x128xf32>
    %180 = arith.addf %179, %178 : vector<8x128xf32>
    %181 = arith.divf %179, %180 : vector<8x128xf32>
    %182 = vector.extract_strided_slice %15 {offsets = [40, 0], sizes = [8, 128], strides = [1, 1]} : vector<64x128xf32> to vector<8x128xf32>
    %183 = vector.broadcast %17 : vector<1x128xf32> to vector<8x128xf32>
    %184 = arith.addf %167, %183 : vector<8x128xf32>
    %185 = arith.mulf %174, %184 : vector<8x128xf32>
    %186 = arith.addf %182, %185 : vector<8x128xf32>
    %187 = math.tanh %186 : vector<8x128xf32>
    %cst_36 = arith.constant 1.000000e+00 : f32
    %188 = vector.broadcast %cst_36 : f32 to vector<8x128xf32>
    %189 = arith.subf %188, %181 : vector<8x128xf32>
    %190 = arith.mulf %189, %187 : vector<8x128xf32>
    %191 = arith.mulf %181, %163 : vector<8x128xf32>
    %192 = arith.addf %190, %191 : vector<8x128xf32>
    %cst_37 = arith.constant dense<0.000000e+00> : vector<8x384xf32>
    %193 = tpu.matmul %192, %16, %cst_37 {dimension_numbers = #tpu.dot_dimension_numbers<[1], [0], [0], [1], [0, 0, 1, 1], [], []>} : vector<8x128xf32>, vector<128x384xf32>, vector<8x384xf32> -> vector<8x384xf32>
    %194 = vector.extract_strided_slice %193 {offsets = [0, 0], sizes = [8, 128], strides = [1, 1]} : vector<8x384xf32> to vector<8x128xf32>
    %195 = vector.extract_strided_slice %193 {offsets = [0, 128], sizes = [8, 128], strides = [1, 1]} : vector<8x384xf32> to vector<8x128xf32>
    %196 = vector.extract_strided_slice %193 {offsets = [0, 256], sizes = [8, 128], strides = [1, 1]} : vector<8x384xf32> to vector<8x128xf32>
    %197 = vector.extract_strided_slice %13 {offsets = [48, 0], sizes = [8, 128], strides = [1, 1]} : vector<64x128xf32> to vector<8x128xf32>
    %198 = arith.addf %197, %194 : vector<8x128xf32>
    %199 = arith.negf %198 : vector<8x128xf32>
    %200 = math.exp %199 : vector<8x128xf32>
    %cst_38 = arith.constant 1.000000e+00 : f32
    %201 = vector.broadcast %cst_38 : f32 to vector<8x128xf32>
    %202 = arith.addf %201, %200 : vector<8x128xf32>
    %203 = arith.divf %201, %202 : vector<8x128xf32>
    %204 = vector.extract_strided_slice %14 {offsets = [48, 0], sizes = [8, 128], strides = [1, 1]} : vector<64x128xf32> to vector<8x128xf32>
    %205 = arith.addf %204, %195 : vector<8x128xf32>
    %206 = arith.negf %205 : vector<8x128xf32>
    %207 = math.exp %206 : vector<8x128xf32>
    %cst_39 = arith.constant 1.000000e+00 : f32
    %208 = vector.broadcast %cst_39 : f32 to vector<8x128xf32>
    %209 = arith.addf %208, %207 : vector<8x128xf32>
    %210 = arith.divf %208, %209 : vector<8x128xf32>
    %211 = vector.extract_strided_slice %15 {offsets = [48, 0], sizes = [8, 128], strides = [1, 1]} : vector<64x128xf32> to vector<8x128xf32>
    %212 = vector.broadcast %17 : vector<1x128xf32> to vector<8x128xf32>
    %213 = arith.addf %196, %212 : vector<8x128xf32>
    %214 = arith.mulf %203, %213 : vector<8x128xf32>
    %215 = arith.addf %211, %214 : vector<8x128xf32>
    %216 = math.tanh %215 : vector<8x128xf32>
    %cst_40 = arith.constant 1.000000e+00 : f32
    %217 = vector.broadcast %cst_40 : f32 to vector<8x128xf32>
    %218 = arith.subf %217, %210 : vector<8x128xf32>
    %219 = arith.mulf %218, %216 : vector<8x128xf32>
    %220 = arith.mulf %210, %192 : vector<8x128xf32>
    %221 = arith.addf %219, %220 : vector<8x128xf32>
    %cst_41 = arith.constant dense<0.000000e+00> : vector<8x384xf32>
    %222 = tpu.matmul %221, %16, %cst_41 {dimension_numbers = #tpu.dot_dimension_numbers<[1], [0], [0], [1], [0, 0, 1, 1], [], []>} : vector<8x128xf32>, vector<128x384xf32>, vector<8x384xf32> -> vector<8x384xf32>
    %223 = vector.extract_strided_slice %222 {offsets = [0, 0], sizes = [8, 128], strides = [1, 1]} : vector<8x384xf32> to vector<8x128xf32>
    %224 = vector.extract_strided_slice %222 {offsets = [0, 128], sizes = [8, 128], strides = [1, 1]} : vector<8x384xf32> to vector<8x128xf32>
    %225 = vector.extract_strided_slice %222 {offsets = [0, 256], sizes = [8, 128], strides = [1, 1]} : vector<8x384xf32> to vector<8x128xf32>
    %226 = vector.extract_strided_slice %13 {offsets = [56, 0], sizes = [8, 128], strides = [1, 1]} : vector<64x128xf32> to vector<8x128xf32>
    %227 = arith.addf %226, %223 : vector<8x128xf32>
    %228 = arith.negf %227 : vector<8x128xf32>
    %229 = math.exp %228 : vector<8x128xf32>
    %cst_42 = arith.constant 1.000000e+00 : f32
    %230 = vector.broadcast %cst_42 : f32 to vector<8x128xf32>
    %231 = arith.addf %230, %229 : vector<8x128xf32>
    %232 = arith.divf %230, %231 : vector<8x128xf32>
    %233 = vector.extract_strided_slice %14 {offsets = [56, 0], sizes = [8, 128], strides = [1, 1]} : vector<64x128xf32> to vector<8x128xf32>
    %234 = arith.addf %233, %224 : vector<8x128xf32>
    %235 = arith.negf %234 : vector<8x128xf32>
    %236 = math.exp %235 : vector<8x128xf32>
    %cst_43 = arith.constant 1.000000e+00 : f32
    %237 = vector.broadcast %cst_43 : f32 to vector<8x128xf32>
    %238 = arith.addf %237, %236 : vector<8x128xf32>
    %239 = arith.divf %237, %238 : vector<8x128xf32>
    %240 = vector.extract_strided_slice %15 {offsets = [56, 0], sizes = [8, 128], strides = [1, 1]} : vector<64x128xf32> to vector<8x128xf32>
    %241 = vector.broadcast %17 : vector<1x128xf32> to vector<8x128xf32>
    %242 = arith.addf %225, %241 : vector<8x128xf32>
    %243 = arith.mulf %232, %242 : vector<8x128xf32>
    %244 = arith.addf %240, %243 : vector<8x128xf32>
    %245 = math.tanh %244 : vector<8x128xf32>
    %cst_44 = arith.constant 1.000000e+00 : f32
    %246 = vector.broadcast %cst_44 : f32 to vector<8x128xf32>
    %247 = arith.subf %246, %239 : vector<8x128xf32>
    %248 = arith.mulf %247, %245 : vector<8x128xf32>
    %249 = arith.mulf %239, %221 : vector<8x128xf32>
    %250 = arith.addf %248, %249 : vector<8x128xf32>
    %251 = tpu.concatenate %47, %76, %105, %134, %163, %192, %221, %250 in 0 : vector<8x128xf32>, vector<8x128xf32>, vector<8x128xf32>, vector<8x128xf32>, vector<8x128xf32>, vector<8x128xf32>, vector<8x128xf32>, vector<8x128xf32> -> vector<64x128xf32>
    %c0_45 = arith.constant 0 : index
    %c0_46 = arith.constant 0 : index
    %252 = vector.load %arg6[%c0_45, %c0_46] : memref<128x384xf32, #tpu.memory_space<vmem>>, vector<128x384xf32>
    %cst_47 = arith.constant dense<0.000000e+00> : vector<64x384xf32>
    %253 = tpu.matmul %251, %252, %cst_47 {dimension_numbers = #tpu.dot_dimension_numbers<[1], [0], [0], [1], [0, 0, 1, 1], [], []>} : vector<64x128xf32>, vector<128x384xf32>, vector<64x384xf32> -> vector<64x384xf32>
    %c0_48 = arith.constant 0 : index
    %c0_49 = arith.constant 0 : index
    %254 = vector.load %arg8[%c0_48, %c0_49] : memref<1x384xf32, #tpu.memory_space<vmem>>, vector<1x384xf32>
    %255 = vector.broadcast %254 : vector<1x384xf32> to vector<64x384xf32>
    %256 = arith.addf %253, %255 : vector<64x384xf32>
    %257 = vector.extract_strided_slice %256 {offsets = [0, 0], sizes = [64, 128], strides = [1, 1]} : vector<64x384xf32> to vector<64x128xf32>
    %258 = vector.extract_strided_slice %256 {offsets = [0, 128], sizes = [64, 128], strides = [1, 1]} : vector<64x384xf32> to vector<64x128xf32>
    %259 = vector.extract_strided_slice %256 {offsets = [0, 256], sizes = [64, 128], strides = [1, 1]} : vector<64x384xf32> to vector<64x128xf32>
    %c0_50 = arith.constant 0 : index
    %c0_51 = arith.constant 0 : index
    %260 = vector.load %arg7[%c0_50, %c0_51] : memref<128x384xf32, #tpu.memory_space<vmem>>, vector<128x384xf32>
    %c0_52 = arith.constant 0 : index
    %c0_53 = arith.constant 0 : index
    %261 = vector.load %arg9[%c0_52, %c0_53] : memref<1x128xf32, #tpu.memory_space<vmem>>, vector<1x128xf32>
    %cst_54 = arith.constant 0.000000e+00 : f32
    %262 = vector.broadcast %cst_54 : f32 to vector<8x128xf32>
    %cst_55 = arith.constant dense<0.000000e+00> : vector<8x384xf32>
    %263 = tpu.matmul %262, %260, %cst_55 {dimension_numbers = #tpu.dot_dimension_numbers<[1], [0], [0], [1], [0, 0, 1, 1], [], []>} : vector<8x128xf32>, vector<128x384xf32>, vector<8x384xf32> -> vector<8x384xf32>
    %264 = vector.extract_strided_slice %263 {offsets = [0, 0], sizes = [8, 128], strides = [1, 1]} : vector<8x384xf32> to vector<8x128xf32>
    %265 = vector.extract_strided_slice %263 {offsets = [0, 128], sizes = [8, 128], strides = [1, 1]} : vector<8x384xf32> to vector<8x128xf32>
    %266 = vector.extract_strided_slice %263 {offsets = [0, 256], sizes = [8, 128], strides = [1, 1]} : vector<8x384xf32> to vector<8x128xf32>
    %267 = vector.extract_strided_slice %257 {offsets = [0, 0], sizes = [8, 128], strides = [1, 1]} : vector<64x128xf32> to vector<8x128xf32>
    %268 = arith.addf %267, %264 : vector<8x128xf32>
    %269 = arith.negf %268 : vector<8x128xf32>
    %270 = math.exp %269 : vector<8x128xf32>
    %cst_56 = arith.constant 1.000000e+00 : f32
    %271 = vector.broadcast %cst_56 : f32 to vector<8x128xf32>
    %272 = arith.addf %271, %270 : vector<8x128xf32>
    %273 = arith.divf %271, %272 : vector<8x128xf32>
    %274 = vector.extract_strided_slice %258 {offsets = [0, 0], sizes = [8, 128], strides = [1, 1]} : vector<64x128xf32> to vector<8x128xf32>
    %275 = arith.addf %274, %265 : vector<8x128xf32>
    %276 = arith.negf %275 : vector<8x128xf32>
    %277 = math.exp %276 : vector<8x128xf32>
    %cst_57 = arith.constant 1.000000e+00 : f32
    %278 = vector.broadcast %cst_57 : f32 to vector<8x128xf32>
    %279 = arith.addf %278, %277 : vector<8x128xf32>
    %280 = arith.divf %278, %279 : vector<8x128xf32>
    %281 = vector.extract_strided_slice %259 {offsets = [0, 0], sizes = [8, 128], strides = [1, 1]} : vector<64x128xf32> to vector<8x128xf32>
    %282 = vector.broadcast %261 : vector<1x128xf32> to vector<8x128xf32>
    %283 = arith.addf %266, %282 : vector<8x128xf32>
    %284 = arith.mulf %273, %283 : vector<8x128xf32>
    %285 = arith.addf %281, %284 : vector<8x128xf32>
    %286 = math.tanh %285 : vector<8x128xf32>
    %cst_58 = arith.constant 1.000000e+00 : f32
    %287 = vector.broadcast %cst_58 : f32 to vector<8x128xf32>
    %288 = arith.subf %287, %280 : vector<8x128xf32>
    %289 = arith.mulf %288, %286 : vector<8x128xf32>
    %290 = arith.mulf %280, %262 : vector<8x128xf32>
    %291 = arith.addf %289, %290 : vector<8x128xf32>
    %cst_59 = arith.constant dense<0.000000e+00> : vector<8x384xf32>
    %292 = tpu.matmul %291, %260, %cst_59 {dimension_numbers = #tpu.dot_dimension_numbers<[1], [0], [0], [1], [0, 0, 1, 1], [], []>} : vector<8x128xf32>, vector<128x384xf32>, vector<8x384xf32> -> vector<8x384xf32>
    %293 = vector.extract_strided_slice %292 {offsets = [0, 0], sizes = [8, 128], strides = [1, 1]} : vector<8x384xf32> to vector<8x128xf32>
    %294 = vector.extract_strided_slice %292 {offsets = [0, 128], sizes = [8, 128], strides = [1, 1]} : vector<8x384xf32> to vector<8x128xf32>
    %295 = vector.extract_strided_slice %292 {offsets = [0, 256], sizes = [8, 128], strides = [1, 1]} : vector<8x384xf32> to vector<8x128xf32>
    %296 = vector.extract_strided_slice %257 {offsets = [8, 0], sizes = [8, 128], strides = [1, 1]} : vector<64x128xf32> to vector<8x128xf32>
    %297 = arith.addf %296, %293 : vector<8x128xf32>
    %298 = arith.negf %297 : vector<8x128xf32>
    %299 = math.exp %298 : vector<8x128xf32>
    %cst_60 = arith.constant 1.000000e+00 : f32
    %300 = vector.broadcast %cst_60 : f32 to vector<8x128xf32>
    %301 = arith.addf %300, %299 : vector<8x128xf32>
    %302 = arith.divf %300, %301 : vector<8x128xf32>
    %303 = vector.extract_strided_slice %258 {offsets = [8, 0], sizes = [8, 128], strides = [1, 1]} : vector<64x128xf32> to vector<8x128xf32>
    %304 = arith.addf %303, %294 : vector<8x128xf32>
    %305 = arith.negf %304 : vector<8x128xf32>
    %306 = math.exp %305 : vector<8x128xf32>
    %cst_61 = arith.constant 1.000000e+00 : f32
    %307 = vector.broadcast %cst_61 : f32 to vector<8x128xf32>
    %308 = arith.addf %307, %306 : vector<8x128xf32>
    %309 = arith.divf %307, %308 : vector<8x128xf32>
    %310 = vector.extract_strided_slice %259 {offsets = [8, 0], sizes = [8, 128], strides = [1, 1]} : vector<64x128xf32> to vector<8x128xf32>
    %311 = vector.broadcast %261 : vector<1x128xf32> to vector<8x128xf32>
    %312 = arith.addf %295, %311 : vector<8x128xf32>
    %313 = arith.mulf %302, %312 : vector<8x128xf32>
    %314 = arith.addf %310, %313 : vector<8x128xf32>
    %315 = math.tanh %314 : vector<8x128xf32>
    %cst_62 = arith.constant 1.000000e+00 : f32
    %316 = vector.broadcast %cst_62 : f32 to vector<8x128xf32>
    %317 = arith.subf %316, %309 : vector<8x128xf32>
    %318 = arith.mulf %317, %315 : vector<8x128xf32>
    %319 = arith.mulf %309, %291 : vector<8x128xf32>
    %320 = arith.addf %318, %319 : vector<8x128xf32>
    %cst_63 = arith.constant dense<0.000000e+00> : vector<8x384xf32>
    %321 = tpu.matmul %320, %260, %cst_63 {dimension_numbers = #tpu.dot_dimension_numbers<[1], [0], [0], [1], [0, 0, 1, 1], [], []>} : vector<8x128xf32>, vector<128x384xf32>, vector<8x384xf32> -> vector<8x384xf32>
    %322 = vector.extract_strided_slice %321 {offsets = [0, 0], sizes = [8, 128], strides = [1, 1]} : vector<8x384xf32> to vector<8x128xf32>
    %323 = vector.extract_strided_slice %321 {offsets = [0, 128], sizes = [8, 128], strides = [1, 1]} : vector<8x384xf32> to vector<8x128xf32>
    %324 = vector.extract_strided_slice %321 {offsets = [0, 256], sizes = [8, 128], strides = [1, 1]} : vector<8x384xf32> to vector<8x128xf32>
    %325 = vector.extract_strided_slice %257 {offsets = [16, 0], sizes = [8, 128], strides = [1, 1]} : vector<64x128xf32> to vector<8x128xf32>
    %326 = arith.addf %325, %322 : vector<8x128xf32>
    %327 = arith.negf %326 : vector<8x128xf32>
    %328 = math.exp %327 : vector<8x128xf32>
    %cst_64 = arith.constant 1.000000e+00 : f32
    %329 = vector.broadcast %cst_64 : f32 to vector<8x128xf32>
    %330 = arith.addf %329, %328 : vector<8x128xf32>
    %331 = arith.divf %329, %330 : vector<8x128xf32>
    %332 = vector.extract_strided_slice %258 {offsets = [16, 0], sizes = [8, 128], strides = [1, 1]} : vector<64x128xf32> to vector<8x128xf32>
    %333 = arith.addf %332, %323 : vector<8x128xf32>
    %334 = arith.negf %333 : vector<8x128xf32>
    %335 = math.exp %334 : vector<8x128xf32>
    %cst_65 = arith.constant 1.000000e+00 : f32
    %336 = vector.broadcast %cst_65 : f32 to vector<8x128xf32>
    %337 = arith.addf %336, %335 : vector<8x128xf32>
    %338 = arith.divf %336, %337 : vector<8x128xf32>
    %339 = vector.extract_strided_slice %259 {offsets = [16, 0], sizes = [8, 128], strides = [1, 1]} : vector<64x128xf32> to vector<8x128xf32>
    %340 = vector.broadcast %261 : vector<1x128xf32> to vector<8x128xf32>
    %341 = arith.addf %324, %340 : vector<8x128xf32>
    %342 = arith.mulf %331, %341 : vector<8x128xf32>
    %343 = arith.addf %339, %342 : vector<8x128xf32>
    %344 = math.tanh %343 : vector<8x128xf32>
    %cst_66 = arith.constant 1.000000e+00 : f32
    %345 = vector.broadcast %cst_66 : f32 to vector<8x128xf32>
    %346 = arith.subf %345, %338 : vector<8x128xf32>
    %347 = arith.mulf %346, %344 : vector<8x128xf32>
    %348 = arith.mulf %338, %320 : vector<8x128xf32>
    %349 = arith.addf %347, %348 : vector<8x128xf32>
    %cst_67 = arith.constant dense<0.000000e+00> : vector<8x384xf32>
    %350 = tpu.matmul %349, %260, %cst_67 {dimension_numbers = #tpu.dot_dimension_numbers<[1], [0], [0], [1], [0, 0, 1, 1], [], []>} : vector<8x128xf32>, vector<128x384xf32>, vector<8x384xf32> -> vector<8x384xf32>
    %351 = vector.extract_strided_slice %350 {offsets = [0, 0], sizes = [8, 128], strides = [1, 1]} : vector<8x384xf32> to vector<8x128xf32>
    %352 = vector.extract_strided_slice %350 {offsets = [0, 128], sizes = [8, 128], strides = [1, 1]} : vector<8x384xf32> to vector<8x128xf32>
    %353 = vector.extract_strided_slice %350 {offsets = [0, 256], sizes = [8, 128], strides = [1, 1]} : vector<8x384xf32> to vector<8x128xf32>
    %354 = vector.extract_strided_slice %257 {offsets = [24, 0], sizes = [8, 128], strides = [1, 1]} : vector<64x128xf32> to vector<8x128xf32>
    %355 = arith.addf %354, %351 : vector<8x128xf32>
    %356 = arith.negf %355 : vector<8x128xf32>
    %357 = math.exp %356 : vector<8x128xf32>
    %cst_68 = arith.constant 1.000000e+00 : f32
    %358 = vector.broadcast %cst_68 : f32 to vector<8x128xf32>
    %359 = arith.addf %358, %357 : vector<8x128xf32>
    %360 = arith.divf %358, %359 : vector<8x128xf32>
    %361 = vector.extract_strided_slice %258 {offsets = [24, 0], sizes = [8, 128], strides = [1, 1]} : vector<64x128xf32> to vector<8x128xf32>
    %362 = arith.addf %361, %352 : vector<8x128xf32>
    %363 = arith.negf %362 : vector<8x128xf32>
    %364 = math.exp %363 : vector<8x128xf32>
    %cst_69 = arith.constant 1.000000e+00 : f32
    %365 = vector.broadcast %cst_69 : f32 to vector<8x128xf32>
    %366 = arith.addf %365, %364 : vector<8x128xf32>
    %367 = arith.divf %365, %366 : vector<8x128xf32>
    %368 = vector.extract_strided_slice %259 {offsets = [24, 0], sizes = [8, 128], strides = [1, 1]} : vector<64x128xf32> to vector<8x128xf32>
    %369 = vector.broadcast %261 : vector<1x128xf32> to vector<8x128xf32>
    %370 = arith.addf %353, %369 : vector<8x128xf32>
    %371 = arith.mulf %360, %370 : vector<8x128xf32>
    %372 = arith.addf %368, %371 : vector<8x128xf32>
    %373 = math.tanh %372 : vector<8x128xf32>
    %cst_70 = arith.constant 1.000000e+00 : f32
    %374 = vector.broadcast %cst_70 : f32 to vector<8x128xf32>
    %375 = arith.subf %374, %367 : vector<8x128xf32>
    %376 = arith.mulf %375, %373 : vector<8x128xf32>
    %377 = arith.mulf %367, %349 : vector<8x128xf32>
    %378 = arith.addf %376, %377 : vector<8x128xf32>
    %cst_71 = arith.constant dense<0.000000e+00> : vector<8x384xf32>
    %379 = tpu.matmul %378, %260, %cst_71 {dimension_numbers = #tpu.dot_dimension_numbers<[1], [0], [0], [1], [0, 0, 1, 1], [], []>} : vector<8x128xf32>, vector<128x384xf32>, vector<8x384xf32> -> vector<8x384xf32>
    %380 = vector.extract_strided_slice %379 {offsets = [0, 0], sizes = [8, 128], strides = [1, 1]} : vector<8x384xf32> to vector<8x128xf32>
    %381 = vector.extract_strided_slice %379 {offsets = [0, 128], sizes = [8, 128], strides = [1, 1]} : vector<8x384xf32> to vector<8x128xf32>
    %382 = vector.extract_strided_slice %379 {offsets = [0, 256], sizes = [8, 128], strides = [1, 1]} : vector<8x384xf32> to vector<8x128xf32>
    %383 = vector.extract_strided_slice %257 {offsets = [32, 0], sizes = [8, 128], strides = [1, 1]} : vector<64x128xf32> to vector<8x128xf32>
    %384 = arith.addf %383, %380 : vector<8x128xf32>
    %385 = arith.negf %384 : vector<8x128xf32>
    %386 = math.exp %385 : vector<8x128xf32>
    %cst_72 = arith.constant 1.000000e+00 : f32
    %387 = vector.broadcast %cst_72 : f32 to vector<8x128xf32>
    %388 = arith.addf %387, %386 : vector<8x128xf32>
    %389 = arith.divf %387, %388 : vector<8x128xf32>
    %390 = vector.extract_strided_slice %258 {offsets = [32, 0], sizes = [8, 128], strides = [1, 1]} : vector<64x128xf32> to vector<8x128xf32>
    %391 = arith.addf %390, %381 : vector<8x128xf32>
    %392 = arith.negf %391 : vector<8x128xf32>
    %393 = math.exp %392 : vector<8x128xf32>
    %cst_73 = arith.constant 1.000000e+00 : f32
    %394 = vector.broadcast %cst_73 : f32 to vector<8x128xf32>
    %395 = arith.addf %394, %393 : vector<8x128xf32>
    %396 = arith.divf %394, %395 : vector<8x128xf32>
    %397 = vector.extract_strided_slice %259 {offsets = [32, 0], sizes = [8, 128], strides = [1, 1]} : vector<64x128xf32> to vector<8x128xf32>
    %398 = vector.broadcast %261 : vector<1x128xf32> to vector<8x128xf32>
    %399 = arith.addf %382, %398 : vector<8x128xf32>
    %400 = arith.mulf %389, %399 : vector<8x128xf32>
    %401 = arith.addf %397, %400 : vector<8x128xf32>
    %402 = math.tanh %401 : vector<8x128xf32>
    %cst_74 = arith.constant 1.000000e+00 : f32
    %403 = vector.broadcast %cst_74 : f32 to vector<8x128xf32>
    %404 = arith.subf %403, %396 : vector<8x128xf32>
    %405 = arith.mulf %404, %402 : vector<8x128xf32>
    %406 = arith.mulf %396, %378 : vector<8x128xf32>
    %407 = arith.addf %405, %406 : vector<8x128xf32>
    %cst_75 = arith.constant dense<0.000000e+00> : vector<8x384xf32>
    %408 = tpu.matmul %407, %260, %cst_75 {dimension_numbers = #tpu.dot_dimension_numbers<[1], [0], [0], [1], [0, 0, 1, 1], [], []>} : vector<8x128xf32>, vector<128x384xf32>, vector<8x384xf32> -> vector<8x384xf32>
    %409 = vector.extract_strided_slice %408 {offsets = [0, 0], sizes = [8, 128], strides = [1, 1]} : vector<8x384xf32> to vector<8x128xf32>
    %410 = vector.extract_strided_slice %408 {offsets = [0, 128], sizes = [8, 128], strides = [1, 1]} : vector<8x384xf32> to vector<8x128xf32>
    %411 = vector.extract_strided_slice %408 {offsets = [0, 256], sizes = [8, 128], strides = [1, 1]} : vector<8x384xf32> to vector<8x128xf32>
    %412 = vector.extract_strided_slice %257 {offsets = [40, 0], sizes = [8, 128], strides = [1, 1]} : vector<64x128xf32> to vector<8x128xf32>
    %413 = arith.addf %412, %409 : vector<8x128xf32>
    %414 = arith.negf %413 : vector<8x128xf32>
    %415 = math.exp %414 : vector<8x128xf32>
    %cst_76 = arith.constant 1.000000e+00 : f32
    %416 = vector.broadcast %cst_76 : f32 to vector<8x128xf32>
    %417 = arith.addf %416, %415 : vector<8x128xf32>
    %418 = arith.divf %416, %417 : vector<8x128xf32>
    %419 = vector.extract_strided_slice %258 {offsets = [40, 0], sizes = [8, 128], strides = [1, 1]} : vector<64x128xf32> to vector<8x128xf32>
    %420 = arith.addf %419, %410 : vector<8x128xf32>
    %421 = arith.negf %420 : vector<8x128xf32>
    %422 = math.exp %421 : vector<8x128xf32>
    %cst_77 = arith.constant 1.000000e+00 : f32
    %423 = vector.broadcast %cst_77 : f32 to vector<8x128xf32>
    %424 = arith.addf %423, %422 : vector<8x128xf32>
    %425 = arith.divf %423, %424 : vector<8x128xf32>
    %426 = vector.extract_strided_slice %259 {offsets = [40, 0], sizes = [8, 128], strides = [1, 1]} : vector<64x128xf32> to vector<8x128xf32>
    %427 = vector.broadcast %261 : vector<1x128xf32> to vector<8x128xf32>
    %428 = arith.addf %411, %427 : vector<8x128xf32>
    %429 = arith.mulf %418, %428 : vector<8x128xf32>
    %430 = arith.addf %426, %429 : vector<8x128xf32>
    %431 = math.tanh %430 : vector<8x128xf32>
    %cst_78 = arith.constant 1.000000e+00 : f32
    %432 = vector.broadcast %cst_78 : f32 to vector<8x128xf32>
    %433 = arith.subf %432, %425 : vector<8x128xf32>
    %434 = arith.mulf %433, %431 : vector<8x128xf32>
    %435 = arith.mulf %425, %407 : vector<8x128xf32>
    %436 = arith.addf %434, %435 : vector<8x128xf32>
    %cst_79 = arith.constant dense<0.000000e+00> : vector<8x384xf32>
    %437 = tpu.matmul %436, %260, %cst_79 {dimension_numbers = #tpu.dot_dimension_numbers<[1], [0], [0], [1], [0, 0, 1, 1], [], []>} : vector<8x128xf32>, vector<128x384xf32>, vector<8x384xf32> -> vector<8x384xf32>
    %438 = vector.extract_strided_slice %437 {offsets = [0, 0], sizes = [8, 128], strides = [1, 1]} : vector<8x384xf32> to vector<8x128xf32>
    %439 = vector.extract_strided_slice %437 {offsets = [0, 128], sizes = [8, 128], strides = [1, 1]} : vector<8x384xf32> to vector<8x128xf32>
    %440 = vector.extract_strided_slice %437 {offsets = [0, 256], sizes = [8, 128], strides = [1, 1]} : vector<8x384xf32> to vector<8x128xf32>
    %441 = vector.extract_strided_slice %257 {offsets = [48, 0], sizes = [8, 128], strides = [1, 1]} : vector<64x128xf32> to vector<8x128xf32>
    %442 = arith.addf %441, %438 : vector<8x128xf32>
    %443 = arith.negf %442 : vector<8x128xf32>
    %444 = math.exp %443 : vector<8x128xf32>
    %cst_80 = arith.constant 1.000000e+00 : f32
    %445 = vector.broadcast %cst_80 : f32 to vector<8x128xf32>
    %446 = arith.addf %445, %444 : vector<8x128xf32>
    %447 = arith.divf %445, %446 : vector<8x128xf32>
    %448 = vector.extract_strided_slice %258 {offsets = [48, 0], sizes = [8, 128], strides = [1, 1]} : vector<64x128xf32> to vector<8x128xf32>
    %449 = arith.addf %448, %439 : vector<8x128xf32>
    %450 = arith.negf %449 : vector<8x128xf32>
    %451 = math.exp %450 : vector<8x128xf32>
    %cst_81 = arith.constant 1.000000e+00 : f32
    %452 = vector.broadcast %cst_81 : f32 to vector<8x128xf32>
    %453 = arith.addf %452, %451 : vector<8x128xf32>
    %454 = arith.divf %452, %453 : vector<8x128xf32>
    %455 = vector.extract_strided_slice %259 {offsets = [48, 0], sizes = [8, 128], strides = [1, 1]} : vector<64x128xf32> to vector<8x128xf32>
    %456 = vector.broadcast %261 : vector<1x128xf32> to vector<8x128xf32>
    %457 = arith.addf %440, %456 : vector<8x128xf32>
    %458 = arith.mulf %447, %457 : vector<8x128xf32>
    %459 = arith.addf %455, %458 : vector<8x128xf32>
    %460 = math.tanh %459 : vector<8x128xf32>
    %cst_82 = arith.constant 1.000000e+00 : f32
    %461 = vector.broadcast %cst_82 : f32 to vector<8x128xf32>
    %462 = arith.subf %461, %454 : vector<8x128xf32>
    %463 = arith.mulf %462, %460 : vector<8x128xf32>
    %464 = arith.mulf %454, %436 : vector<8x128xf32>
    %465 = arith.addf %463, %464 : vector<8x128xf32>
    %cst_83 = arith.constant dense<0.000000e+00> : vector<8x384xf32>
    %466 = tpu.matmul %465, %260, %cst_83 {dimension_numbers = #tpu.dot_dimension_numbers<[1], [0], [0], [1], [0, 0, 1, 1], [], []>} : vector<8x128xf32>, vector<128x384xf32>, vector<8x384xf32> -> vector<8x384xf32>
    %467 = vector.extract_strided_slice %466 {offsets = [0, 0], sizes = [8, 128], strides = [1, 1]} : vector<8x384xf32> to vector<8x128xf32>
    %468 = vector.extract_strided_slice %466 {offsets = [0, 128], sizes = [8, 128], strides = [1, 1]} : vector<8x384xf32> to vector<8x128xf32>
    %469 = vector.extract_strided_slice %466 {offsets = [0, 256], sizes = [8, 128], strides = [1, 1]} : vector<8x384xf32> to vector<8x128xf32>
    %470 = vector.extract_strided_slice %257 {offsets = [56, 0], sizes = [8, 128], strides = [1, 1]} : vector<64x128xf32> to vector<8x128xf32>
    %471 = arith.addf %470, %467 : vector<8x128xf32>
    %472 = arith.negf %471 : vector<8x128xf32>
    %473 = math.exp %472 : vector<8x128xf32>
    %cst_84 = arith.constant 1.000000e+00 : f32
    %474 = vector.broadcast %cst_84 : f32 to vector<8x128xf32>
    %475 = arith.addf %474, %473 : vector<8x128xf32>
    %476 = arith.divf %474, %475 : vector<8x128xf32>
    %477 = vector.extract_strided_slice %258 {offsets = [56, 0], sizes = [8, 128], strides = [1, 1]} : vector<64x128xf32> to vector<8x128xf32>
    %478 = arith.addf %477, %468 : vector<8x128xf32>
    %479 = arith.negf %478 : vector<8x128xf32>
    %480 = math.exp %479 : vector<8x128xf32>
    %cst_85 = arith.constant 1.000000e+00 : f32
    %481 = vector.broadcast %cst_85 : f32 to vector<8x128xf32>
    %482 = arith.addf %481, %480 : vector<8x128xf32>
    %483 = arith.divf %481, %482 : vector<8x128xf32>
    %484 = vector.extract_strided_slice %259 {offsets = [56, 0], sizes = [8, 128], strides = [1, 1]} : vector<64x128xf32> to vector<8x128xf32>
    %485 = vector.broadcast %261 : vector<1x128xf32> to vector<8x128xf32>
    %486 = arith.addf %469, %485 : vector<8x128xf32>
    %487 = arith.mulf %476, %486 : vector<8x128xf32>
    %488 = arith.addf %484, %487 : vector<8x128xf32>
    %489 = math.tanh %488 : vector<8x128xf32>
    %cst_86 = arith.constant 1.000000e+00 : f32
    %490 = vector.broadcast %cst_86 : f32 to vector<8x128xf32>
    %491 = arith.subf %490, %483 : vector<8x128xf32>
    %492 = arith.mulf %491, %489 : vector<8x128xf32>
    %493 = arith.mulf %483, %465 : vector<8x128xf32>
    %494 = arith.addf %492, %493 : vector<8x128xf32>
    %c0_87 = arith.constant 0 : index
    %c0_88 = arith.constant 0 : index
    %495 = vector.load %arg10[%c0_87, %c0_88] : memref<128x128xf32, #tpu.memory_space<vmem>>, vector<128x128xf32>
    %cst_89 = arith.constant dense<0.000000e+00> : vector<8x128xf32>
    %496 = tpu.matmul %494, %495, %cst_89 {dimension_numbers = #tpu.dot_dimension_numbers<[1], [0], [0], [1], [0, 0, 1, 1], [], []>} : vector<8x128xf32>, vector<128x128xf32>, vector<8x128xf32> -> vector<8x128xf32>
    %c0_90 = arith.constant 0 : index
    %c0_91 = arith.constant 0 : index
    %497 = vector.load %arg11[%c0_90, %c0_91] : memref<1x128xf32, #tpu.memory_space<vmem>>, vector<1x128xf32>
    %498 = vector.broadcast %497 : vector<1x128xf32> to vector<8x128xf32>
    %499 = arith.addf %496, %498 : vector<8x128xf32>
    %c0_92 = arith.constant 0 : index
    %c0_93 = arith.constant 0 : index
    %500 = vector.load %arg12[%c0_92, %c0_93] : memref<8x128xf32, #tpu.memory_space<vmem>>, vector<8x128xf32>
    tpu.vector_store %arg12[%c0_92, %c0_93], %499 {strides = array<i32>} : memref<8x128xf32, #tpu.memory_space<vmem>>, vector<8x128xf32>,
    return
  }
}

</mosaic_0001>

<bundles_post_ra>
// kernel: rnn_forward.1
= control target key start
LH: loop header
LB: loop body
LE: loop exit
PB: predicated region body
PF: predicated region fallthrough
CT: control target
= control target key end

     0   :  { %v5005_v0 = vmov 0   ;;  %v41_v56 = vlaneseq  ;;  %v5006_v60 = vmov 1.0   ;;  %vm5008_vm8 = vmmov 0   ;;  %s7872_s0 = inlined_call_operand.vmem [shape: s32[64,1], index: 0, kind: input, shape index: {}]   ;;  %s7873_s1 = inlined_call_operand.vmem [shape: f32[128,128], index: 1, kind: input, shape index: {}]   ;;  %s7874_s2 = inlined_call_operand.vmem [shape: f32[128,384], index: 2, kind: input, shape index: {}]   ;;  %s7875_s3 = inlined_call_operand.vmem [shape: f32[128,384], index: 3, kind: input, shape index: {}]   ;;  %s7876_s4 = inlined_call_operand.vmem [shape: f32[1,384], index: 4, kind: input, shape index: {}]   ;;  %s7877_s5 = inlined_call_operand.vmem [shape: f32[1,128], index: 5, kind: input, shape index: {}]   ;;  %s7878_s6 = inlined_call_operand.vmem [shape: f32[128,384], index: 6, kind: input, shape index: {}]   ;;  %s7879_s7 = inlined_call_operand.vmem [shape: f32[128,384], index: 7, kind: input, shape index: {}]   ;;  %s7880_s8 = inlined_call_operand.vmem [shape: f32[1,384], index: 8, kind: input, shape index: {}]   ;;  %s7881_s9 = inlined_call_operand.vmem [shape: f32[1,128], index: 9, kind: input, shape index: {}]   ;;  %s7882_s10 = inlined_call_operand.vmem [shape: f32[128,128], index: 10, kind: input, shape index: {}]   ;;  %s7883_s11 = inlined_call_operand.vmem [shape: f32[1,128], index: 11, kind: input, shape index: {}]   ;;  %s7884_s12 = inlined_call_operand.vmem [shape: f32[8,128], index: 12, kind: output, shape index: {}]  }
   0x1   :  { %4746 = vset.pattern.permute.xlu1 %v5005_v0  ;;  %4745 = vset.pattern.permute.xlu0 %v5005_v0  ;;  %v45_v1 = vld [vmem:[%s7872_s0 + $0x10] sm:$0xff]  ;;  %v43_v2 = vld [vmem:[%s7872_s0] sm:$0xff]  ;;  %v46_v3 = vld [vmem:[%s7872_s0 + $0x18] sm:$0xff] }
   0x2   :  { %58 = vperm.xlu1 %4746, %v45_v1   ;;  %52 = vperm.xlu0 %4745, %v43_v2   ;;  %v44_v4 = vld [vmem:[%s7872_s0 + $0x8] sm:$0xff]  ;;  %v114_v5 = vld [vmem:[%s7873_s1 + $0x78] sm:$0xff]  ;;  %v113_v6 = vld [vmem:[%s7873_s1 + $0x70] sm:$0xff]  ;;  %v42_v57 = vand.u32 127, %v41_v56 }
   0x3   :  { %4014 = vmatprep.subr.mxu0 %v114_v5  ;;  %v112_v7 = vld [vmem:[%s7873_s1 + $0x68] sm:$0xff]  ;;  %v47_v9 = vld [vmem:[%s7872_s0 + $0x20] sm:$0xff]  ;;  %v50_v11 = vld [vmem:[%s7872_s0 + $0x38] sm:$0xff] }
   0x4   :  { %4015 = vmatpush3.msra.mxu0 %v114_v5  ;;  %v48_v8 = vld [vmem:[%s7872_s0 + $0x28] sm:$0xff]  ;;  %v111_v10 = vld [vmem:[%s7873_s1 + $0x60] sm:$0xff]  ;;  %v49_v12 = vld [vmem:[%s7872_s0 + $0x30] sm:$0xff] }
   0x5   :  { %4016 = vmatprep.subr.mxu0 %v113_v6  ;;  %v110_v13 = vld [vmem:[%s7873_s1 + $0x58] sm:$0xff]  ;;  %v109_v14 = vld [vmem:[%s7873_s1 + $0x50] sm:$0xff]  ;;  %v108_v15 = vld [vmem:[%s7873_s1 + $0x48] sm:$0xff] }
   0x6   :  { %61 = vperm.xlu1 %4746, %v46_v3   ;;  %55 = vperm.xlu0 %4745, %v44_v4   ;;  %v266_v16 = vld [vmem:[%s7874_s2 + $0x170] sm:$0xff]  ;;  %v265_v17 = vld [vmem:[%s7874_s2 + $0x168] sm:$0xff]  ;;  %v263_v18 = vld [vmem:[%s7874_s2 + $0x158] sm:$0xff] }
   0x7   :  { %4017 = vmatpush3.msra.mxu0 %v113_v6  ;;  %285 = vmatprep.subr.mxu1 %v266_v16  ;;  %v262_v19 = vld [vmem:[%s7874_s2 + $0x150] sm:$0xff]  ;;  %v107_v20 = vld [vmem:[%s7873_s1 + $0x40] sm:$0xff]  ;;  %v259_v22 = vld [vmem:[%s7874_s2 + $0x138] sm:$0xff] }
   0x8   :  { %4018 = vmatprep.subr.mxu0 %v112_v7  ;;  %286 = vmatpush1.msra.mxu1 %v265_v17  ;;  %v260_v21 = vld [vmem:[%s7874_s2 + $0x140] sm:$0xff]  ;;  %v106_v23 = vld [vmem:[%s7873_s1 + $0x38] sm:$0xff]  ;;  %v257_v24 = vld [vmem:[%s7874_s2 + $0x128] sm:$0xff] }
   0x9   :  { %4019 = vmatpush3.msra.mxu0 %v112_v7  ;;  %287 = vmatprep.subr.mxu1 %v263_v18  ;;  %v256_v25 = vld [vmem:[%s7874_s2 + $0x120] sm:$0xff]  ;;  %v105_v26 = vld [vmem:[%s7873_s1 + $0x30] sm:$0xff]  ;;  %v253_v28 = vld [vmem:[%s7874_s2 + $0x108] sm:$0xff] }
   0xa   :  { %67 = vperm.xlu1 %4746, %v48_v8   ;;  %64 = vperm.xlu0 %4745, %v47_v9   ;;  %v254_v27 = vld [vmem:[%s7874_s2 + $0x110] sm:$0xff]  ;;  %v104_v29 = vld [vmem:[%s7873_s1 + $0x28] sm:$0xff]  ;;  %v251_v30 = vld [vmem:[%s7874_s2 + $0xf8] sm:$0xff] }
   0xb   :  { %4020 = vmatprep.subr.mxu0 %v111_v10  ;;  %288 = vmatpush1.msra.mxu1 %v262_v19  ;;  %v250_v31 = vld [vmem:[%s7874_s2 + $0xf0] sm:$0xff]  ;;  %v103_v32 = vld [vmem:[%s7873_s1 + $0x20] sm:$0xff]  ;;  %v247_v34 = vld [vmem:[%s7874_s2 + $0xd8] sm:$0xff] }
   0xc   :  { %4021 = vmatpush3.msra.mxu0 %v111_v10  ;;  %289 = vmatprep.subr.mxu1 %v260_v21  ;;  %v248_v33 = vld [vmem:[%s7874_s2 + $0xe0] sm:$0xff]  ;;  %v102_v35 = vld [vmem:[%s7873_s1 + $0x18] sm:$0xff]  ;;  %v245_v36 = vld [vmem:[%s7874_s2 + $0xc8] sm:$0xff] }
   0xd   :  { %4022 = vmatprep.subr.mxu0 %v110_v13  ;;  %290 = vmatpush1.msra.mxu1 %v259_v22  ;;  %v244_v37 = vld [vmem:[%s7874_s2 + $0xc0] sm:$0xff]  ;;  %v101_v38 = vld [vmem:[%s7873_s1 + $0x10] sm:$0xff]  ;;  %v241_v40 = vld [vmem:[%s7874_s2 + $0xa8] sm:$0xff] }
   0xe   :  { %73 = vperm.xlu1 %4746, %v50_v11   ;;  %70 = vperm.xlu0 %4745, %v49_v12   ;;  %v242_v39 = vld [vmem:[%s7874_s2 + $0xb0] sm:$0xff]  ;;  %v100_v41 = vld [vmem:[%s7873_s1 + $0x8] sm:$0xff]  ;;  %v239_v42 = vld [vmem:[%s7874_s2 + $0x98] sm:$0xff] }
   0xf   :  { %4023 = vmatpush3.msra.mxu0 %v110_v13  ;;  %291 = vmatprep.subr.mxu1 %v257_v24  ;;  %v238_v43 = vld [vmem:[%s7874_s2 + $0x90] sm:$0xff]  ;;  %v99_v44 = vld [vmem:[%s7873_s1] sm:$0xff]  ;;  %v235_v46 = vld [vmem:[%s7874_s2 + $0x78] sm:$0xff] }
  0x10   :  { %4024 = vmatprep.subr.mxu0 %v109_v14  ;;  %292 = vmatpush1.msra.mxu1 %v256_v25  ;;  %v236_v45 = vld [vmem:[%s7874_s2 + $0x80] sm:$0xff]  ;;  %v267_v47 = vld [vmem:[%s7874_s2 + $0x178] sm:$0xff]  ;;  %v233_v48 = vld [vmem:[%s7874_s2 + $0x68] sm:$0xff] }
  0x11   :  { %4025 = vmatpush3.msra.mxu0 %v109_v14  ;;  %293 = vmatprep.subr.mxu1 %v254_v27  ;;  %v232_v49 = vld [vmem:[%s7874_s2 + $0x60] sm:$0xff]  ;;  %v230_v50 = vld [vmem:[%s7874_s2 + $0x50] sm:$0xff]  ;;  %v229_v51 = vld [vmem:[%s7874_s2 + $0x48] sm:$0xff] }
  0x12   :  { %4026 = vmatprep.subr.mxu0 %v108_v15  ;;  %294 = vmatpush1.msra.mxu1 %v253_v28  ;;  %v227_v52 = vld [vmem:[%s7874_s2 + $0x38] sm:$0xff]  ;;  %v226_v53 = vld [vmem:[%s7874_s2 + $0x30] sm:$0xff]  ;;  %v224_v54 = vld [vmem:[%s7874_s2 + $0x20] sm:$0xff] }
  0x13   :  { %4027 = vmatpush3.msra.mxu0 %v108_v15  ;;  %295 = vmatprep.subr.mxu1 %v251_v30  ;;  %v223_v55 = vld [vmem:[%s7874_s2 + $0x18] sm:$0xff]  ;;  %v264_v63 = vld [vmem:[%s7874_s2 + $0x160] sm:$0xff]  ;;  %v261_v0 = vld [vmem:[%s7874_s2 + $0x148] sm:$0xff] }
  0x14   :  { %4028 = vmatprep.subr.mxu0 %v107_v20  ;;  %296 = vmatpush1.msra.mxu1 %v250_v31  ;;  %v258_v3 = vld [vmem:[%s7874_s2 + $0x130] sm:$0xff]  ;;  %v255_v4 = vld [vmem:[%s7874_s2 + $0x118] sm:$0xff]  ;;  %v252_v6 = vld [vmem:[%s7874_s2 + $0x100] sm:$0xff] }
  0x15   :  { %4029 = vmatpush3.msra.mxu0 %v107_v20  ;;  %297 = vmatprep.subr.mxu1 %v248_v33  ;;  %v249_v8 = vld [vmem:[%s7874_s2 + $0xe8] sm:$0xff]  ;;  %v246_v9 = vld [vmem:[%s7874_s2 + $0xd0] sm:$0xff]  ;;  %v243_v10 = vld [vmem:[%s7874_s2 + $0xb8] sm:$0xff]  ;;  %v7886_v20 = vmov 0.0  }
  0x16   :  { %4030 = vmatprep.subr.mxu0 %v106_v23  ;;  %298 = vmatpush1.msra.mxu1 %v247_v34  ;;  %v240_v11 = vld [vmem:[%s7874_s2 + $0xa0] sm:$0xff]  ;;  %v237_v12 = vld [vmem:[%s7874_s2 + $0x88] sm:$0xff]  ;;  %v234_v13 = vld [vmem:[%s7874_s2 + $0x70] sm:$0xff] }
  0x17   :  { %4031 = vmatpush3.msra.mxu0 %v106_v23  ;;  %299 = vmatprep.subr.mxu1 %v245_v36  ;;  %v231_v14 = vld [vmem:[%s7874_s2 + $0x58] sm:$0xff]  ;;  %v228_v15 = vld [vmem:[%s7874_s2 + $0x40] sm:$0xff]  ;;  %v225_v16 = vld [vmem:[%s7874_s2 + $0x28] sm:$0xff] }
  0x18   :  { %4032 = vmatprep.subr.mxu0 %v105_v26  ;;  %300 = vmatpush1.msra.mxu1 %v244_v37  ;;  %v221_v17 = vld [vmem:[%s7874_s2 + $0x8] sm:$0xff]  ;;  %v220_v18 = vld [vmem:[%s7874_s2] sm:$0xff]  ;;  %v222_v19 = vld [vmem:[%s7874_s2 + $0x10] sm:$0xff] }
  0x19   :  { %4033 = vmatpush3.msra.mxu0 %v105_v26  ;;  %301 = vmatprep.subr.mxu1 %v242_v39  ;;  %v5295_v21 = vld [vmem:[%s7875_s3 + $0x170] sm:$0xff]  ;;  %v5302_v23 = vld [vmem:[%s7875_s3 + $0x168] sm:$0xff]  ;;  %v5307_v25 = vld [vmem:[%s7875_s3 + $0x158] sm:$0xff] }
  0x1a   :  { %4034 = vmatprep.subr.mxu0 %v104_v29  ;;  %302 = vmatpush1.msra.mxu1 %v241_v40  ;;  %7939 = vst [vmem:[#allocation2_spill] sm:$0xff] %v5295_v21  ;;  %v5312_v26 = vld [vmem:[%s7875_s3 + $0x150] sm:$0xff]  ;;  %v5317_v27 = vld [vmem:[%s7875_s3 + $0x178] sm:$0xff]  ;;  %v5343_v33 = vld [vmem:[%s7875_s3 + $0x120] sm:$0xff] }
  0x1b   :  { %4035 = vmatpush3.msra.mxu0 %v104_v29  ;;  %303 = vmatprep.subr.mxu1 %v239_v42  ;;  %v5323_v29 = vld [vmem:[%s7875_s3 + $0x140] sm:$0xff]  ;;  %v5330_v30 = vld [vmem:[%s7875_s3 + $0x138] sm:$0xff]  ;;  %v5355_v36 = vld [vmem:[%s7875_s3 + $0x108] sm:$0xff] }
  0x1c   :  { %4036 = vmatprep.subr.mxu0 %v103_v32  ;;  %304 = vmatpush1.msra.mxu1 %v238_v43  ;;  %v5368_v39 = vld [vmem:[%s7875_s3 + $0xf0] sm:$0xff]  ;;  %v5380_v42 = vld [vmem:[%s7875_s3 + $0xd8] sm:$0xff] }
  0x1d   :  { %4037 = vmatpush3.msra.mxu0 %v103_v32  ;;  %305 = vmatprep.subr.mxu1 %v236_v45  ;;  %v5336_v32 = vld [vmem:[%s7875_s3 + $0x128] sm:$0xff]  ;;  %v5393_v45 = vld [vmem:[%s7875_s3 + $0xc0] sm:$0xff] }
  0x1e   :  { %4038 = vmatprep.subr.mxu0 %v102_v35  ;;  %306 = vmatpush1.msra.mxu1 %v235_v46  ;;  %v5399_v46 = vld [vmem:[%s7875_s3 + $0xb0] sm:$0xff] }
  0x1f   :  { %4039 = vmatpush3.msra.mxu0 %v102_v35  ;;  %307 = vmatprep.subr.mxu1 %v233_v48  ;;  %v5349_v35 = vld [vmem:[%s7875_s3 + $0x110] sm:$0xff]  ;;  %v5412_v48 = vld [vmem:[%s7875_s3 + $0x98] sm:$0xff] }
  0x20   :  { %4040 = vmatprep.subr.mxu0 %v101_v38  ;;  %308 = vmatpush1.msra.mxu1 %v232_v49  ;;  %v5418_v49 = vld [vmem:[%s7875_s3 + $0x90] sm:$0xff] }
  0x21   :  { %4041 = vmatpush3.msra.mxu0 %v101_v38  ;;  %309 = vmatprep.subr.mxu1 %v230_v50  ;;  %v5362_v38 = vld [vmem:[%s7875_s3 + $0xf8] sm:$0xff]  ;;  %v5423_v50 = vld [vmem:[%s7875_s3 + $0x160] sm:$0xff] }
  0x22   :  { %4042 = vmatprep.subr.mxu0 %v100_v41  ;;  %310 = vmatpush1.msra.mxu1 %v229_v51  ;;  %v5430_v51 = vld [vmem:[%s7875_s3 + $0x80] sm:$0xff] }
  0x23   :  { %4043 = vmatpush3.msra.mxu0 %v100_v41  ;;  %311 = vmatprep.subr.mxu1 %v227_v52  ;;  %v5374_v41 = vld [vmem:[%s7875_s3 + $0xe0] sm:$0xff]  ;;  %v5436_v52 = vld [vmem:[%s7875_s3 + $0x78] sm:$0xff] }
  0x24   :  { %4044 = vmatprep.subr.mxu0 %v99_v44  ;;  %312 = vmatpush1.msra.mxu1 %v226_v53  ;;  %v5443_v53 = vld [vmem:[%s7875_s3 + $0x68] sm:$0xff] }
  0x25   :  { %4045 = vmatpush3.msra.mxu0 %v99_v44  ;;  %313 = vmatprep.subr.mxu1 %v224_v54  ;;  %v5387_v44 = vld [vmem:[%s7875_s3 + $0xc8] sm:$0xff]  ;;  %v5450_v54 = vld [vmem:[%s7875_s3 + $0x60] sm:$0xff] }
  0x26   :  { %4058 = vmatprep.subr.mxu0 %v267_v47  ;;  %314 = vmatpush1.msra.mxu1 %v223_v55  ;;  %v5455_v55 = vld [vmem:[%s7875_s3 + $0x148] sm:$0xff] }
  0x27   :  { %315 = vmatprep.subr.mxu1 %v221_v17  ;;  %349 = vmatprep.mubr.f32.mxu1 %v7886_v20 }
  0x28   :  { %316 = vmatpush1.msra.mxu1 %v220_v18 }
  0x29   :  { %552 = vmatprep.subr.mxu1 %v5295_v21 }
  0x7d   :  { %v59_v58 = vpop.permute.xlu1 %58  ;;  %v53_v59 = vpop.permute.xlu0 %52 }
  0x7e   :  { %vm75_vm0 = vcmp.eq.s32.totalorder %v42_v57, %v53_v59  ;;  %vm77_vm1 = vcmp.eq.s32.totalorder %v42_v57, %v59_v58  ;;  %v5468_v58 = vld [vmem:[%s7875_s3 + $0x48] sm:$0xff]  ;;  %v5475_v59 = vld [vmem:[%s7875_s3 + $0x38] sm:$0xff] }
  0x7f   :  { %4046 = vmatprep.mubr.msk.f32.mxu0 %vm75_vm0, %v5006_v60 }
  0x81   :  { %v62_v61 = vpop.permute.xlu1 %61  ;;  %v56_v62 = vpop.permute.xlu0 %55 }
  0x82   :  { %vm76_vm2 = vcmp.eq.s32.totalorder %v42_v57, %v56_v62  ;;  %vm78_vm3 = vcmp.eq.s32.totalorder %v42_v57, %v62_v61  ;;  %v5487_v61 = vld [vmem:[%s7875_s3 + $0x130] sm:$0xff]  ;;  %v5494_v62 = vld [vmem:[%s7875_s3 + $0x20] sm:$0xff] }
  0x83   :  { %4047 = vmatmul.mubr.msk.f32.vlgmr.msra.gmra.mxu0 %vm76_vm2, %v5006_v60 }
  0x84   :  { %4049 = vmatprep.mubr.msk.f32.mxu0 %vm77_vm1, %v5006_v60  ;;  %4059 = vmatpush3.msra.mxu0 %v267_v47  ;;  %v5405_v47 = vld [vmem:[%s7875_s3 + $0xa8] sm:$0xff] }
  0x85   :  { %v68_v1 = vpop.permute.xlu1 %67  ;;  %v65_v2 = vpop.permute.xlu0 %64  ;;  %4060 = vmatprep.subr.mxu0 %v264_v63 }
  0x86   :  { %vm79_vm4 = vcmp.eq.s32.totalorder %v42_v57, %v65_v2  ;;  %4061 = vmatpush3.msra.mxu0 %v264_v63  ;;  %vm80_vm5 = vcmp.eq.s32.totalorder %v42_v57, %v68_v1  ;;  %v5500_v63 = vld [vmem:[%s7875_s3 + $0x18] sm:$0xff]  ;;  %v5514_v1 = vld [vmem:[%s7875_s3] sm:$0xff] }
  0x87   :  { %4050 = vmatmul.mubr.msk.f32.gmra.mxu0 %vm78_vm3, %v5006_v60  ;;  %4062 = vmatprep.subr.mxu0 %v261_v0  ;;  %7940 = vst [vmem:[#allocation3_spill] sm:$0xff] %v5500_v63  ;;  %7942 = vst [vmem:[#allocation5_spill] sm:$0xff] %v5514_v1  ;;  %v5519_v2 = vld [vmem:[%s7875_s3 + $0x118] sm:$0xff] }
  0x88   :  { %4052 = vmatprep.mubr.msk.f32.mxu0 %vm79_vm4, %v5006_v60  ;;  %4063 = vmatpush3.msra.mxu0 %v261_v0  ;;  %v5507_v0 = vld [vmem:[%s7875_s3 + $0x8] sm:$0xff] }
  0x89   :  { %v71_v5 = vpop.permute.xlu0 %70  ;;  %4064 = vmatprep.subr.mxu0 %v258_v3  ;;  %v74_v7 = vpop.permute.xlu1 %73  ;;  %7941 = vst [vmem:[#allocation4_spill] sm:$0xff] %v5507_v0 }
  0x8a   :  { %vm81_vm6 = vcmp.eq.s32.totalorder %v42_v57, %v71_v5  ;;  %4065 = vmatpush3.msra.mxu0 %v258_v3  ;;  %vm82_vm7 = vcmp.eq.s32.totalorder %v42_v57, %v74_v7  ;;  %v5462_v57 = vld [vmem:[%s7875_s3 + $0x50] sm:$0xff]  ;;  %v5528_v3 = vld [vmem:[%s7875_s3 + $0x100] sm:$0xff] }
  0x8b   :  { %4053 = vmatmul.mubr.msk.f32.gmra.mxu0 %vm80_vm5, %v5006_v60  ;;  %4066 = vmatprep.subr.mxu0 %v255_v4  ;;  %v5546_v5 = vld [vmem:[%s7875_s3 + $0xd0] sm:$0xff]  ;;  %v5564_v7 = vld [vmem:[%s7875_s3 + $0xa0] sm:$0xff] }
  0x8c   :  { %4055 = vmatprep.mubr.msk.f32.mxu0 %vm81_vm6, %v5006_v60  ;;  %4067 = vmatpush3.msra.mxu0 %v255_v4  ;;  %v5537_v4 = vld [vmem:[%s7875_s3 + $0xe8] sm:$0xff] }
  0x8d   :  { %4068 = vmatprep.subr.mxu0 %v252_v6 }
  0x8e   :  { %4069 = vmatpush3.msra.mxu0 %v252_v6  ;;  %v5555_v6 = vld [vmem:[%s7875_s3 + $0xb8] sm:$0xff] }
  0x8f   :  { %4056 = vmatmul.mubr.msk.f32.gmra.mxu0 %vm82_vm7, %v5006_v60  ;;  %4070 = vmatprep.subr.mxu0 %v249_v8  ;;  %v5482_v60 = vld [vmem:[%s7875_s3 + $0x30] sm:$0xff] }
  0x90   :  { %4071 = vmatpush3.msra.mxu0 %v249_v8  ;;  %v5573_v8 = vld [vmem:[%s7875_s3 + $0x88] sm:$0xff] }
  0x91   :  { %4072 = vmatprep.subr.mxu0 %v246_v9 }
  0x92   :  { %4073 = vmatpush3.msra.mxu0 %v246_v9  ;;  %v5582_v9 = vld [vmem:[%s7875_s3 + $0x70] sm:$0xff] }
  0x93   :  { %4074 = vmatprep.subr.mxu0 %v243_v10 }
  0x94   :  { %4075 = vmatpush3.msra.mxu0 %v243_v10  ;;  %v5591_v10 = vld [vmem:[%s7875_s3 + $0x58] sm:$0xff] }
  0x95   :  { %4076 = vmatprep.subr.mxu0 %v240_v11 }
  0x96   :  { %4077 = vmatpush3.msra.mxu0 %v240_v11  ;;  %v5600_v11 = vld [vmem:[%s7875_s3 + $0x40] sm:$0xff] }
  0x97   :  { %4078 = vmatprep.subr.mxu0 %v237_v12 }
  0x98   :  { %4079 = vmatpush3.msra.mxu0 %v237_v12  ;;  %v5609_v12 = vld [vmem:[%s7875_s3 + $0x28] sm:$0xff] }
  0x99   :  { %4080 = vmatprep.subr.mxu0 %v234_v13  ;;  %7943 = vst [vmem:[#allocation6_spill] sm:$0xff] %v5609_v12 }
  0x9a   :  { %4081 = vmatpush3.msra.mxu0 %v234_v13  ;;  %v5618_v13 = vld [vmem:[%s7875_s3 + $0x10] sm:$0xff] }
  0x9b   :  { %4082 = vmatprep.subr.mxu0 %v231_v14  ;;  %7944 = vst [vmem:[#allocation7_spill] sm:$0xff] %v5618_v13 }
  0x9c   :  { %4083 = vmatpush3.msra.mxu0 %v231_v14  ;;  %v5678_v14 = vshrl.u32 %v41_v56, 7 }
  0x9d   :  { %4084 = vmatprep.subr.mxu0 %v228_v15 }
  0x9e   :  { %4085 = vmatpush3.msra.mxu0 %v228_v15  ;;  %7945 = vst [vmem:[#allocation8_spill] sm:$0xff] %v5678_v14  ;;  %v7885_v15 = vsub.s32 2, %v5678_v14  ;;  %v7894_v18 = vsub.s32 0, %v5678_v14 }
  0x9f   :  { %4086 = vmatprep.subr.mxu0 %v225_v16 }
  0xa0   :  { %4087 = vmatpush3.msra.mxu0 %v225_v16  ;;  %v268_v16 = vld [vmem:[%s7876_s4] sm:$0x7] }
  0xa1   :  { %4088 = vmatprep.subr.mxu0 %v222_v19  ;;  %v5686_v17 = vrot.slane %v268_v16, %v7885_v15 }
  0xa2   :  { %4089 = vmatpush3.msra.mxu0 %v222_v19 }
  0xa3   :  { %4102 = vmatprep.subr.mxu0 %v7886_v20 }
 0x143   :  { %v4048_v22 = vpop.f32.mrf.mxu0 }
 0x145   :  { %v181_v24 = vpop.f32.mrf.mxu0 }
 0x146   :  { %350 = vmatmul.mubr.f32.vlgmr.msra.gmra.mxu1 %v181_v24  ;;  %4090 = vmatprep.mubr.f32.mxu0 %v181_v24  ;;  %v7899_v24 = vsub.s32 1, %v5678_v14 }
 0x147   :  { %553 = vmatpush1.msra.mxu1 %v5302_v23  ;;  %v4051_v28 = vpop.f32.mrf.mxu0  ;;  %4091 = vmatmul.mubr.f32.vlgmr.msra.gmra.mxu0 %v4048_v22 }
 0x148   :  { %554 = vmatprep.subr.mxu1 %v5307_v25  ;;  %355 = vmatprep.mubr.f32.mxu1 %v7886_v20 }
 0x149   :  { %555 = vmatpush1.msra.mxu1 %v5312_v26  ;;  %v191_v31 = vpop.f32.mrf.mxu0  ;;  %4103 = vmatpush3.msra.mxu0 %v5317_v27 }
 0x14a   :  { %556 = vmatprep.subr.mxu1 %v5323_v29  ;;  %356 = vmatmul.mubr.f32.gmra.mxu1 %v4048_v22 }
 0x14b   :  { %4093 = vmatprep.mubr.f32.mxu0 %v191_v31  ;;  %557 = vmatpush1.msra.mxu1 %v5330_v30  ;;  %v4054_v34 = vpop.f32.mrf.mxu0 }
 0x14c   :  { %4094 = vmatmul.mubr.f32.gmra.mxu0 %v4051_v28  ;;  %558 = vmatprep.subr.mxu1 %v5336_v32 }
 0x14d   :  { %559 = vmatpush1.msra.mxu1 %v5343_v33  ;;  %v201_v37 = vpop.f32.mrf.mxu0  ;;  %361 = vmatprep.mubr.f32.mxu1 %v7886_v20 }
 0x14e   :  { %560 = vmatprep.subr.mxu1 %v5349_v35  ;;  %362 = vmatmul.mubr.f32.gmra.mxu1 %v191_v31  ;;  %v273_v31 = vrot.slane %v268_v16, %v7894_v18 }
 0x14f   :  { %4096 = vmatprep.mubr.f32.mxu0 %v201_v37  ;;  %561 = vmatpush1.msra.mxu1 %v5355_v36  ;;  %v4057_v40 = vpop.f32.mrf.mxu0 }
 0x150   :  { %4097 = vmatmul.mubr.f32.gmra.mxu0 %v4054_v34  ;;  %562 = vmatprep.subr.mxu1 %v5362_v38 }
 0x151   :  { %563 = vmatpush1.msra.mxu1 %v5368_v39  ;;  %v211_v43 = vpop.f32.mrf.mxu0  ;;  %367 = vmatprep.mubr.f32.mxu1 %v7886_v20 }
 0x152   :  { %564 = vmatprep.subr.mxu1 %v5374_v41  ;;  %368 = vmatmul.mubr.f32.gmra.mxu1 %v4051_v28 }
 0x153   :  { %4099 = vmatprep.mubr.f32.mxu0 %v211_v43  ;;  %565 = vmatpush1.msra.mxu1 %v5380_v42 }
 0x154   :  { %4100 = vmatmul.mubr.f32.gmra.mxu0 %v4057_v40  ;;  %566 = vmatprep.subr.mxu1 %v5387_v44 }
 0x155   :  { %567 = vmatpush1.msra.mxu1 %v5393_v45  ;;  %373 = vmatprep.mubr.f32.mxu1 %v7886_v20 }
 0x156   :  { %568 = vmatprep.subr.mxu1 %v5399_v46  ;;  %374 = vmatmul.mubr.f32.gmra.mxu1 %v201_v37 }
 0x157   :  { %569 = vmatpush1.msra.mxu1 %v5405_v47  ;;  %379 = vmatprep.mubr.f32.mxu1 %v7886_v20 }
 0x158   :  { %570 = vmatprep.subr.mxu1 %v5412_v48  ;;  %4104 = vmatprep.subr.mxu0 %v7886_v20 }
 0x159   :  { %571 = vmatpush1.msra.mxu1 %v5418_v49  ;;  %4105 = vmatpush3.msra.mxu0 %v5423_v50 }
 0x15a   :  { %572 = vmatprep.subr.mxu1 %v5430_v51  ;;  %380 = vmatmul.mubr.f32.gmra.mxu1 %v4054_v34 }
 0x15b   :  { %573 = vmatpush1.msra.mxu1 %v5436_v52  ;;  %385 = vmatprep.mubr.f32.mxu1 %v7886_v20 }
 0x15c   :  { %574 = vmatprep.subr.mxu1 %v5443_v53  ;;  %4106 = vmatprep.subr.mxu0 %v7886_v20 }
 0x15d   :  { %575 = vmatpush1.msra.mxu1 %v5450_v54  ;;  %4107 = vmatpush3.msra.mxu0 %v5455_v55 }
 0x15e   :  { %576 = vmatprep.subr.mxu1 %v5462_v57  ;;  %386 = vmatmul.mubr.f32.gmra.mxu1 %v211_v43 }
 0x15f   :  { %577 = vmatpush1.msra.mxu1 %v5468_v58  ;;  %391 = vmatprep.mubr.f32.mxu1 %v7886_v20 }
 0x160   :  { %578 = vmatprep.subr.mxu1 %v5475_v59  ;;  %4108 = vmatprep.subr.mxu0 %v7886_v20 }
 0x161   :  { %579 = vmatpush1.msra.mxu1 %v5482_v60  ;;  %4109 = vmatpush3.msra.mxu0 %v5487_v61 }
 0x162   :  { %580 = vmatprep.subr.mxu1 %v5494_v62  ;;  %392 = vmatmul.mubr.f32.gmra.mxu1 %v4057_v40  ;;  %v277_v40 = vrot.slane %v268_v16, %v7899_v24 }
 0x163   :  { %581 = vmatpush1.msra.mxu1 %v5500_v63  ;;  %616 = vmatprep.mubr.f32.mxu1 %v7886_v20 }
 0x164   :  { %582 = vmatprep.subr.mxu1 %v5507_v0  ;;  %4110 = vmatprep.subr.mxu0 %v7886_v20 }
 0x165   :  { %583 = vmatpush1.msra.mxu1 %v5514_v1  ;;  %4111 = vmatpush3.msra.mxu0 %v5519_v2 }
 0x166   :  { %617 = vmatmul.mubr.f32.vlgmr.msra.gmra.mxu1 %v7886_v20  ;;  %4112 = vmatprep.subr.mxu0 %v7886_v20 }
 0x167   :  { %4113 = vmatpush3.msra.mxu0 %v5528_v3  ;;  %4134 = vmatprep.mubr.msk.f32.mxu0 %vm5008_vm8, %v7886_v20 }
 0x168   :  { %4114 = vmatprep.subr.mxu0 %v7886_v20  ;;  %721 = vmatprep.subr.mxu1 %v5295_v21 }
 0x169   :  { %4115 = vmatpush3.msra.mxu0 %v5537_v4  ;;  %722 = vmatpush1.msra.mxu1 %v5302_v23 }
 0x16a   :  { %4116 = vmatprep.subr.mxu0 %v7886_v20  ;;  %723 = vmatprep.subr.mxu1 %v5307_v25 }
 0x16b   :  { %4117 = vmatpush3.msra.mxu0 %v5546_v5  ;;  %724 = vmatpush1.msra.mxu1 %v5312_v26 }
 0x16c   :  { %4118 = vmatprep.subr.mxu0 %v7886_v20  ;;  %725 = vmatprep.subr.mxu1 %v5323_v29 }
 0x16d   :  { %4119 = vmatpush3.msra.mxu0 %v5555_v6  ;;  %726 = vmatpush1.msra.mxu1 %v5330_v30 }
 0x16e   :  { %4120 = vmatprep.subr.mxu0 %v7886_v20  ;;  %727 = vmatprep.subr.mxu1 %v5336_v32 }
 0x16f   :  { %4121 = vmatpush3.msra.mxu0 %v5564_v7  ;;  %728 = vmatpush1.msra.mxu1 %v5343_v33 }
 0x170   :  { %4122 = vmatprep.subr.mxu0 %v7886_v20  ;;  %729 = vmatprep.subr.mxu1 %v5349_v35 }
 0x171   :  { %4123 = vmatpush3.msra.mxu0 %v5573_v8  ;;  %730 = vmatpush1.msra.mxu1 %v5355_v36 }
 0x172   :  { %4124 = vmatprep.subr.mxu0 %v7886_v20  ;;  %731 = vmatprep.subr.mxu1 %v5362_v38 }
 0x173   :  { %4125 = vmatpush3.msra.mxu0 %v5582_v9  ;;  %732 = vmatpush1.msra.mxu1 %v5368_v39 }
 0x174   :  { %4126 = vmatprep.subr.mxu0 %v7886_v20  ;;  %733 = vmatprep.subr.mxu1 %v5374_v41 }
 0x175   :  { %4127 = vmatpush3.msra.mxu0 %v5591_v10  ;;  %734 = vmatpush1.msra.mxu1 %v5380_v42 }
 0x176   :  { %4128 = vmatprep.subr.mxu0 %v7886_v20  ;;  %735 = vmatprep.subr.mxu1 %v5387_v44 }
 0x177   :  { %4129 = vmatpush3.msra.mxu0 %v5600_v11  ;;  %736 = vmatpush1.msra.mxu1 %v5393_v45 }
 0x178   :  { %4130 = vmatprep.subr.mxu0 %v7886_v20  ;;  %737 = vmatprep.subr.mxu1 %v5399_v46 }
 0x179   :  { %4131 = vmatpush3.msra.mxu0 %v5609_v12  ;;  %738 = vmatpush1.msra.mxu1 %v5405_v47 }
 0x17a   :  { %4132 = vmatprep.subr.mxu0 %v7886_v20  ;;  %739 = vmatprep.subr.mxu1 %v5412_v48 }
 0x17b   :  { %4133 = vmatpush3.msra.mxu0 %v5618_v13  ;;  %740 = vmatpush1.msra.mxu1 %v5418_v49 }
 0x17c   :  { %4135 = vmatmul.mubr.f32.vlgmr.msra.gmra.mxu0 %v7886_v20  ;;  %4137 = vmatprep.subr.mxu0 %v7886_v20 }
 0x17d   :  { %4138 = vmatpush3.msra.mxu0 %v5317_v27  ;;  %741 = vmatprep.subr.mxu1 %v5430_v51 }
 0x17e   :  { %4139 = vmatprep.subr.mxu0 %v7886_v20  ;;  %742 = vmatpush1.msra.mxu1 %v5436_v52 }
 0x17f   :  { %4140 = vmatpush3.msra.mxu0 %v5423_v50  ;;  %743 = vmatprep.subr.mxu1 %v5443_v53 }
 0x180   :  { %4141 = vmatprep.subr.mxu0 %v7886_v20  ;;  %744 = vmatpush1.msra.mxu1 %v5450_v54 }
 0x181   :  { %4142 = vmatpush3.msra.mxu0 %v5455_v55  ;;  %745 = vmatprep.subr.mxu1 %v5462_v57 }
 0x182   :  { %4143 = vmatprep.subr.mxu0 %v7886_v20  ;;  %746 = vmatpush1.msra.mxu1 %v5468_v58 }
 0x183   :  { %4144 = vmatpush3.msra.mxu0 %v5487_v61  ;;  %747 = vmatprep.subr.mxu1 %v5475_v59 }
 0x184   :  { %4145 = vmatprep.subr.mxu0 %v7886_v20  ;;  %748 = vmatpush1.msra.mxu1 %v5482_v60 }
 0x185   :  { %4146 = vmatpush3.msra.mxu0 %v5519_v2  ;;  %749 = vmatprep.subr.mxu1 %v5494_v62 }
 0x186   :  { %4147 = vmatprep.subr.mxu0 %v7886_v20  ;;  %750 = vmatpush1.msra.mxu1 %v5500_v63 }
 0x187   :  { %4148 = vmatpush3.msra.mxu0 %v5528_v3  ;;  %751 = vmatprep.subr.mxu1 %v5507_v0 }
 0x188   :  { %4149 = vmatprep.subr.mxu0 %v7886_v20  ;;  %752 = vmatpush1.msra.mxu1 %v5514_v1 }
 0x189   :  { %4150 = vmatpush3.msra.mxu0 %v5537_v4  ;;  %785 = vmatprep.mubr.f32.mxu1 %v7886_v20 }
 0x18a   :  { %4151 = vmatprep.subr.mxu0 %v7886_v20  ;;  %4169 = vmatprep.mubr.msk.f32.mxu0 %vm5008_vm8, %v7886_v20 }
 0x18b   :  { %4152 = vmatpush3.msra.mxu0 %v5546_v5  ;;  %884 = vmatprep.subr.mxu1 %v5295_v21 }
 0x18c   :  { %4153 = vmatprep.subr.mxu0 %v7886_v20 }
 0x18d   :  { %4154 = vmatpush3.msra.mxu0 %v5555_v6 }
 0x18e   :  { %4155 = vmatprep.subr.mxu0 %v7886_v20 }
 0x18f   :  { %4156 = vmatpush3.msra.mxu0 %v5564_v7 }
 0x190   :  { %4157 = vmatprep.subr.mxu0 %v7886_v20 }
 0x191   :  { %4158 = vmatpush3.msra.mxu0 %v5573_v8 }
 0x192   :  { %4159 = vmatprep.subr.mxu0 %v7886_v20 }
 0x193   :  { %4160 = vmatpush3.msra.mxu0 %v5582_v9 }
 0x194   :  { %4161 = vmatprep.subr.mxu0 %v7886_v20 }
 0x195   :  { %4162 = vmatpush3.msra.mxu0 %v5591_v10 }
 0x196   :  { %4163 = vmatprep.subr.mxu0 %v7886_v20 }
 0x197   :  { %4164 = vmatpush3.msra.mxu0 %v5600_v11 }
 0x198   :  { %4165 = vmatprep.subr.mxu0 %v7886_v20 }
 0x199   :  { %4166 = vmatpush3.msra.mxu0 %v5609_v12 }
 0x19a   :  { %4167 = vmatprep.subr.mxu0 %v7886_v20 }
 0x19b   :  { %4168 = vmatpush3.msra.mxu0 %v5618_v13 }
 0x19c   :  { %4172 = vmatprep.subr.mxu0 %v7886_v20 }
 0x206   :  { %v351_v19 = vpop.f32.mrf.mxu1 }
 0x207   :  { %v4092_v22 = vpop.f32.mrf.mxu0 }
 0x208   :  { %v5691_v28 = vadd.f32 %v4092_v22, %v5686_v17  ;;  %v353_v56 = vpop.f32.mrf.mxu1 }
 0x209   :  { %v5695_v34 = vpop.f32.mrf.mxu0  ;;  %v354_v63 = vadd.f32 %v353_v56, %v277_v40 }
 0x20a   :  { %7946 = vst [vmem:[#allocation9_spill] sm:$0xff] %v5691_v28  ;;  %v357_v37 = vpop.f32.mrf.mxu1 }
 0x20b   :  { %v5699_v43 = vadd.f32 %v357_v37, %v273_v31 }
 0x20c   :  { %v4095_v15 = vpop.f32.mrf.mxu0  ;;  %v359_v20 = vpop.f32.mrf.mxu1 }
 0x20d   :  { %7947 = vst [vmem:[#allocation10_spill] sm:$0xff] %v5699_v43  ;;  %v5702_v21 = vadd.f32 %v4095_v15, %v5686_v17  ;;  %v5704_v13 = vadd.f32 %v359_v20, %v277_v40 }
 0x20e   :  { %v474_v22 = vpop.f32.mrf.mxu0  ;;  %v363_v28 = vpop.f32.mrf.mxu1 }
 0x20f   :  { %7948 = vst [vmem:[#allocation11_spill] sm:$0xff] %v5702_v21  ;;  %7949 = vst [vmem:[#allocation12_spill] sm:$0xff] %v5704_v13  ;;  %v5707_v1 = vadd.f32 %v474_v22, %v5686_v17  ;;  %v5709_v18 = vadd.f32 %v363_v28, %v273_v31 }
 0x210   :  { %v4098_v0 = vpop.f32.mrf.mxu0  ;;  %v365_v12 = vpop.f32.mrf.mxu1 }
 0x211   :  { %7950 = vst [vmem:[#allocation13_spill] sm:$0xff] %v5707_v1  ;;  %7951 = vst [vmem:[#allocation14_spill] sm:$0xff] %v5709_v18  ;;  %v5712_v16 = vadd.f32 %v4098_v0, %v5686_v17  ;;  %v5714_v37 = vadd.f32 %v365_v12, %v277_v40 }
 0x212   :  { %v484_v24 = vpop.f32.mrf.mxu0  ;;  %v369_v14 = vpop.f32.mrf.mxu1 }
 0x213   :  { %7952 = vst [vmem:[#allocation15_spill] sm:$0xff] %v5712_v16  ;;  %7953 = vst [vmem:[#allocation16_spill] sm:$0xff] %v5714_v37  ;;  %v5717_v15 = vadd.f32 %v484_v24, %v5686_v17  ;;  %v5719_v20 = vadd.f32 %v369_v14, %v273_v31 }
 0x214   :  { %v4101_v21 = vpop.f32.mrf.mxu0  ;;  %v371_v13 = vpop.f32.mrf.mxu1 }
 0x215   :  { %7954 = vst [vmem:[#allocation17_spill] sm:$0xff] %v5717_v15  ;;  %7955 = vst [vmem:[#allocation18_spill] sm:$0xff] %v5719_v20  ;;  %v5722_v22 = vadd.f32 %v4101_v21, %v5686_v17  ;;  %v5724_v28 = vadd.f32 %v371_v13, %v277_v40 }
 0x216   :  { %v494_v1 = vpop.f32.mrf.mxu0  ;;  %v375_v18 = vpop.f32.mrf.mxu1 }
 0x217   :  { %7956 = vst [vmem:[#allocation19_spill] sm:$0xff] %v5722_v22  ;;  %7957 = vst [vmem:[#allocation20_spill] sm:$0xff] %v5724_v28  ;;  %v5727_v0 = vadd.f32 %v494_v1, %v5686_v17  ;;  %v5729_v12 = vadd.f32 %v375_v18, %v273_v31 }
 0x218   :  { %v377_v16 = vpop.f32.mrf.mxu1 }
 0x219   :  { %7958 = vst [vmem:[#allocation21_spill] sm:$0xff] %v5727_v0  ;;  %7959 = vst [vmem:[#allocation22_spill] sm:$0xff] %v5729_v12  ;;  %v5731_v37 = vadd.f32 %v377_v16, %v277_v40  ;;  %v352_v0 = vadd.f32 %v351_v19, %v273_v31  ;;  %v5748_v19 = vld [vmem:[%s7877_s5] ss:$0 sm:$0xff] }
 0x21a   :  { %v381_v24 = vpop.f32.mrf.mxu1 }
 0x21b   :  { %7960 = vst [vmem:[#allocation23_spill] sm:$0xff] %v5731_v37  ;;  %v5733_v14 = vadd.f32 %v381_v24, %v273_v31 }
 0x21c   :  { %v383_v15 = vpop.f32.mrf.mxu1 }
 0x21d   :  { %7961 = vst [vmem:[#allocation24_spill] sm:$0xff] %v5733_v14  ;;  %v5735_v20 = vadd.f32 %v383_v15, %v277_v40 }
 0x21e   :  { %v387_v21 = vpop.f32.mrf.mxu1 }
 0x21f   :  { %7962 = vst [vmem:[#allocation25_spill] sm:$0xff] %v5735_v20  ;;  %v5737_v22 = vadd.f32 %v387_v21, %v273_v31 }
 0x220   :  { %v389_v13 = vpop.f32.mrf.mxu1 }
 0x221   :  { %7963 = vst [vmem:[#allocation26_spill] sm:$0xff] %v5737_v22  ;;  %v5739_v28 = vadd.f32 %v389_v13, %v277_v40 }
 0x222   :  { %v393_v43 = vpop.f32.mrf.mxu1 }
 0x223   :  { %7964 = vst [vmem:[#allocation27_spill] sm:$0xff] %v5739_v28  ;;  %v5741_v1 = vadd.f32 %v393_v43, %v273_v31 }
 0x224   :  { %v395_v18 = vpop.f32.mrf.mxu1 }
 0x225   :  { %7965 = vst [vmem:[#allocation28_spill] sm:$0xff] %v5741_v1  ;;  %v5743_v12 = vadd.f32 %v395_v18, %v277_v40 }
 0x226   :  { %v618_v16 = vpop.f32.mrf.mxu1 }
 0x227   :  { %7966 = vst [vmem:[#allocation29_spill] sm:$0xff] %v5743_v12  ;;  %v693_v37 = vadd.f32 %v618_v16, %v352_v0 }
 0x228   :  { %v620_v14 = vpop.f32.mrf.mxu1 }
 0x229   :  { %v3618_v24 = vmul.f32 -1.442695, %v693_v37  ;;  %v700_v15 = vadd.f32 %v620_v14, %v354_v63  ;;  %v465_v63 = vadd.f32 %v5695_v34, %v5686_v17  ;;  %v7968_v17 = vmov 0.0   ;;  %v7969_v34 = vld [vmem:[#allocation3_spill] sm:$0xff] }
 0x22b   :  { %4747 = vpow2.f32 %v3618_v24  ;;  %v3619_v20 = vmul.f32 -1.442695, %v700_v15  ;;  %v7970_v24 = vld [vmem:[#allocation6_spill] sm:$0xff]  ;;  %v7971_v15 = vld [vmem:[#allocation4_spill] sm:$0xff] }
 0x22d   :  { %4749 = vpow2.f32 %v3619_v20 }
 0x238   :  { %v4748_v21 = vpop.eup %4747 }
 0x239   :  { %v697_v22 = vadd.f32 1.0, %v4748_v21  ;;  %v7972_v21 = vld [vmem:[#allocation5_spill] sm:$0xff] }
 0x23a   :  { %v4750_v43 = vpop.eup %4749 }
 0x23b   :  { %4751 = vrcp.f32 %v697_v22  ;;  %v704_v31 = vadd.f32 1.0, %v4750_v43  ;;  %v7974_v43 = vld [vmem:[#allocation2_spill] sm:$0xff] }
 0x23c   :  { %v689_v13 = vpop.f32.mrf.mxu0 }
 0x23d   :  { %v713_v37 = vadd.f32 %v5748_v19, %v689_v13  ;;  %4753 = vrcp.f32 %v704_v31  ;;  %v7973_v13 = vld [vmem:[#allocation7_spill] sm:$0xff] }
 0x23e   :  { %v4136_v28 = vpop.f32.mrf.mxu0 }
 0x248   :  { %v4752_v0 = vpop.eup %4751 }
 0x249   :  { %v714_v56 = vmul.f32 %v4752_v0, %v713_v37  ;;  %v7975_v0 = vld [vmem:[#allocation10_spill] sm:$0xff] }
 0x24a   :  { %v4754_v20 = vpop.eup %4753 }
 0x24b   :  { %v715_v40 = vadd.f32 %v714_v56, %v465_v63  ;;  %v717_v22 = vsub.f32 1.0, %v4754_v20  ;;  %v719_v18 = vmul.f32 0.0, %v4754_v20 }
 0x24d   :  { %4755 = vtanh.f32 %v715_v40 }
 0x25a   :  { %v4756_v28 = vpop.eup %4755 }
 0x25b   :  { %v718_v14 = vmul.f32 %v4756_v28, %v717_v22  ;;  %v7976_v22 = vld [vmem:[#allocation12_spill] sm:$0xff] }
 0x25d   :  { %v5753_v16 = vadd.f32 %v719_v18, %v718_v14 }
 0x25f   :  { %7967 = vst [vmem:[#allocation30_spill] sm:$0xff] %v5753_v16  ;;  %786 = vmatmul.mubr.f32.vlgmr.msra.gmra.mxu1 %v5753_v16  ;;  %4170 = vmatmul.mubr.f32.vlgmr.msra.gmra.mxu0 %v5753_v16 }
 0x260   :  { %885 = vmatpush1.msra.mxu1 %v5302_v23  ;;  %4173 = vmatpush3.msra.mxu0 %v5317_v27 }
 0x261   :  { %886 = vmatprep.subr.mxu1 %v5307_v25  ;;  %4174 = vmatprep.subr.mxu0 %v7968_v17 }
 0x262   :  { %887 = vmatpush1.msra.mxu1 %v5312_v26  ;;  %4175 = vmatpush3.msra.mxu0 %v5423_v50 }
 0x263   :  { %888 = vmatprep.subr.mxu1 %v5323_v29  ;;  %4176 = vmatprep.subr.mxu0 %v7968_v17 }
 0x264   :  { %889 = vmatpush1.msra.mxu1 %v5330_v30  ;;  %4177 = vmatpush3.msra.mxu0 %v5455_v55 }
 0x265   :  { %890 = vmatprep.subr.mxu1 %v5336_v32  ;;  %4178 = vmatprep.subr.mxu0 %v7968_v17 }
 0x266   :  { %891 = vmatpush1.msra.mxu1 %v5343_v33  ;;  %4179 = vmatpush3.msra.mxu0 %v5487_v61 }
 0x267   :  { %892 = vmatprep.subr.mxu1 %v5349_v35  ;;  %4180 = vmatprep.subr.mxu0 %v7968_v17 }
 0x268   :  { %893 = vmatpush1.msra.mxu1 %v5355_v36  ;;  %4181 = vmatpush3.msra.mxu0 %v5519_v2 }
 0x269   :  { %894 = vmatprep.subr.mxu1 %v5362_v38  ;;  %4182 = vmatprep.subr.mxu0 %v7968_v17 }
 0x26a   :  { %895 = vmatpush1.msra.mxu1 %v5368_v39  ;;  %4183 = vmatpush3.msra.mxu0 %v5528_v3 }
 0x26b   :  { %896 = vmatprep.subr.mxu1 %v5374_v41  ;;  %4184 = vmatprep.subr.mxu0 %v7968_v17 }
 0x26c   :  { %897 = vmatpush1.msra.mxu1 %v5380_v42  ;;  %4185 = vmatpush3.msra.mxu0 %v5537_v4 }
 0x26d   :  { %898 = vmatprep.subr.mxu1 %v5387_v44  ;;  %4186 = vmatprep.subr.mxu0 %v7968_v17 }
 0x26e   :  { %899 = vmatpush1.msra.mxu1 %v5393_v45  ;;  %4187 = vmatpush3.msra.mxu0 %v5546_v5 }
 0x26f   :  { %900 = vmatprep.subr.mxu1 %v5399_v46  ;;  %4188 = vmatprep.subr.mxu0 %v7968_v17 }
 0x270   :  { %901 = vmatpush1.msra.mxu1 %v5405_v47  ;;  %4189 = vmatpush3.msra.mxu0 %v5555_v6 }
 0x271   :  { %902 = vmatprep.subr.mxu1 %v5412_v48  ;;  %4190 = vmatprep.subr.mxu0 %v7968_v17 }
 0x272   :  { %903 = vmatpush1.msra.mxu1 %v5418_v49  ;;  %4191 = vmatpush3.msra.mxu0 %v5564_v7 }
 0x273   :  { %904 = vmatprep.subr.mxu1 %v5430_v51  ;;  %4192 = vmatprep.subr.mxu0 %v7968_v17 }
 0x274   :  { %905 = vmatpush1.msra.mxu1 %v5436_v52  ;;  %4193 = vmatpush3.msra.mxu0 %v5573_v8 }
 0x275   :  { %906 = vmatprep.subr.mxu1 %v5443_v53  ;;  %4194 = vmatprep.subr.mxu0 %v7968_v17 }
 0x276   :  { %907 = vmatpush1.msra.mxu1 %v5450_v54  ;;  %4195 = vmatpush3.msra.mxu0 %v5582_v9 }
 0x277   :  { %908 = vmatprep.subr.mxu1 %v5462_v57  ;;  %4196 = vmatprep.subr.mxu0 %v7968_v17 }
 0x278   :  { %909 = vmatpush1.msra.mxu1 %v5468_v58  ;;  %4197 = vmatpush3.msra.mxu0 %v5591_v10 }
 0x279   :  { %910 = vmatprep.subr.mxu1 %v5475_v59  ;;  %4198 = vmatprep.subr.mxu0 %v7968_v17 }
 0x27a   :  { %911 = vmatpush1.msra.mxu1 %v5482_v60  ;;  %4199 = vmatpush3.msra.mxu0 %v5600_v11 }
 0x27b   :  { %912 = vmatprep.subr.mxu1 %v5494_v62  ;;  %4200 = vmatprep.subr.mxu0 %v7968_v17 }
 0x27c   :  { %913 = vmatpush1.msra.mxu1 %v7969_v34  ;;  %4201 = vmatpush3.msra.mxu0 %v7970_v24  ;;  %v7977_v24 = vld [vmem:[#allocation9_spill] sm:$0xff] }
 0x27d   :  { %914 = vmatprep.subr.mxu1 %v7971_v15  ;;  %4202 = vmatprep.subr.mxu0 %v7968_v17 }
 0x27e   :  { %915 = vmatpush1.msra.mxu1 %v7972_v21  ;;  %948 = vmatprep.mubr.f32.mxu1 %v7968_v17 }
 0x27f   :  { %4203 = vmatpush3.msra.mxu0 %v7973_v13  ;;  %4204 = vmatprep.mubr.msk.f32.mxu0 %vm5008_vm8, %v7968_v17 }
 0x280   :  { %1047 = vmatprep.subr.mxu1 %v7974_v43  ;;  %4207 = vmatprep.subr.mxu0 %v7968_v17 }
 0x31f   :  { %v787_v31 = vpop.f32.mrf.mxu1  ;;  %v858_v37 = vpop.f32.mrf.mxu0 }
 0x320   :  { %v862_v63 = vadd.f32 %v787_v31, %v7975_v0  ;;  %v876_v43 = vadd.f32 %v5748_v19, %v858_v37  ;;  %v7984_v37 = vld [vmem:[#allocation14_spill] sm:$0xff] }
 0x321   :  { %v4171_v56 = vpop.f32.mrf.mxu0  ;;  %v789_v20 = vpop.f32.mrf.mxu1 }
 0x322   :  { %v3621_v40 = vmul.f32 -1.442695, %v862_v63  ;;  %v869_v28 = vadd.f32 %v789_v20, %v7976_v22 }
 0x324   :  { %4757 = vpow2.f32 %v3621_v40  ;;  %v3622_v14 = vmul.f32 -1.442695, %v869_v28 }
 0x326   :  { %4759 = vpow2.f32 %v3622_v14 }
 0x331   :  { %v4758_v18 = vpop.eup %4757 }
 0x332   :  { %v866_v12 = vadd.f32 1.0, %v4758_v18 }
 0x333   :  { %v4760_v1 = vpop.eup %4759 }
 0x334   :  { %4761 = vrcp.f32 %v866_v12  ;;  %v873_v13 = vadd.f32 1.0, %v4760_v1  ;;  %v7979_v12 = vld [vmem:[#allocation6_spill] sm:$0xff]  ;;  %v7980_v1 = vld [vmem:[#allocation4_spill] sm:$0xff] }
 0x336   :  { %4763 = vrcp.f32 %v873_v13 }
 0x341   :  { %v4762_v21 = vpop.eup %4761 }
 0x342   :  { %v877_v15 = vmul.f32 %v4762_v21, %v876_v43  ;;  %v7983_v21 = vld [vmem:[#allocation2_spill] sm:$0xff] }
 0x343   :  { %v4764_v0 = vpop.eup %4763 }
 0x344   :  { %v878_v31 = vadd.f32 %v877_v15, %v7977_v24  ;;  %v880_v63 = vsub.f32 1.0, %v4764_v0  ;;  %v882_v20 = vmul.f32 %v4764_v0, %v5753_v16  ;;  %v7981_v24 = vld [vmem:[#allocation5_spill] sm:$0xff]  ;;  %v7982_v15 = vld [vmem:[#allocation7_spill] sm:$0xff]  ;;  %v7985_v0 = vld [vmem:[#allocation16_spill] sm:$0xff] }
 0x346   :  { %4765 = vtanh.f32 %v878_v31 }
 0x353   :  { %v4766_v56 = vpop.eup %4765 }
 0x354   :  { %v881_v40 = vmul.f32 %v4766_v56, %v880_v63 }
 0x356   :  { %v5829_v22 = vadd.f32 %v882_v20, %v881_v40 }
 0x358   :  { %7978 = vst [vmem:[#allocation3_spill] sm:$0xff] %v5829_v22  ;;  %949 = vmatmul.mubr.f32.vlgmr.msra.gmra.mxu1 %v5829_v22  ;;  %4205 = vmatmul.mubr.f32.vlgmr.msra.gmra.mxu0 %v5829_v22 }
 0x359   :  { %1048 = vmatpush1.msra.mxu1 %v5302_v23  ;;  %4208 = vmatpush3.msra.mxu0 %v5317_v27 }
 0x35a   :  { %1049 = vmatprep.subr.mxu1 %v5307_v25  ;;  %4209 = vmatprep.subr.mxu0 %v7968_v17 }
 0x35b   :  { %1050 = vmatpush1.msra.mxu1 %v5312_v26  ;;  %4210 = vmatpush3.msra.mxu0 %v5423_v50 }
 0x35c   :  { %1051 = vmatprep.subr.mxu1 %v5323_v29  ;;  %4211 = vmatprep.subr.mxu0 %v7968_v17 }
 0x35d   :  { %1052 = vmatpush1.msra.mxu1 %v5330_v30  ;;  %4212 = vmatpush3.msra.mxu0 %v5455_v55 }
 0x35e   :  { %1053 = vmatprep.subr.mxu1 %v5336_v32  ;;  %4213 = vmatprep.subr.mxu0 %v7968_v17 }
 0x35f   :  { %1054 = vmatpush1.msra.mxu1 %v5343_v33  ;;  %4214 = vmatpush3.msra.mxu0 %v5487_v61 }
 0x360   :  { %1055 = vmatprep.subr.mxu1 %v5349_v35  ;;  %4215 = vmatprep.subr.mxu0 %v7968_v17 }
 0x361   :  { %1056 = vmatpush1.msra.mxu1 %v5355_v36  ;;  %4216 = vmatpush3.msra.mxu0 %v5519_v2 }
 0x362   :  { %1057 = vmatprep.subr.mxu1 %v5362_v38  ;;  %4217 = vmatprep.subr.mxu0 %v7968_v17 }
 0x363   :  { %1058 = vmatpush1.msra.mxu1 %v5368_v39  ;;  %4218 = vmatpush3.msra.mxu0 %v5528_v3 }
 0x364   :  { %1059 = vmatprep.subr.mxu1 %v5374_v41  ;;  %4219 = vmatprep.subr.mxu0 %v7968_v17 }
 0x365   :  { %1060 = vmatpush1.msra.mxu1 %v5380_v42  ;;  %4220 = vmatpush3.msra.mxu0 %v5537_v4 }
 0x366   :  { %1061 = vmatprep.subr.mxu1 %v5387_v44  ;;  %4221 = vmatprep.subr.mxu0 %v7968_v17 }
 0x367   :  { %1062 = vmatpush1.msra.mxu1 %v5393_v45  ;;  %4222 = vmatpush3.msra.mxu0 %v5546_v5 }
 0x368   :  { %1063 = vmatprep.subr.mxu1 %v5399_v46  ;;  %4223 = vmatprep.subr.mxu0 %v7968_v17 }
 0x369   :  { %1064 = vmatpush1.msra.mxu1 %v5405_v47  ;;  %4224 = vmatpush3.msra.mxu0 %v5555_v6 }
 0x36a   :  { %1065 = vmatprep.subr.mxu1 %v5412_v48  ;;  %4225 = vmatprep.subr.mxu0 %v7968_v17 }
 0x36b   :  { %1066 = vmatpush1.msra.mxu1 %v5418_v49  ;;  %4226 = vmatpush3.msra.mxu0 %v5564_v7 }
 0x36c   :  { %1067 = vmatprep.subr.mxu1 %v5430_v51  ;;  %4227 = vmatprep.subr.mxu0 %v7968_v17 }
 0x36d   :  { %1068 = vmatpush1.msra.mxu1 %v5436_v52  ;;  %4228 = vmatpush3.msra.mxu0 %v5573_v8 }
 0x36e   :  { %1069 = vmatprep.subr.mxu1 %v5443_v53  ;;  %4229 = vmatprep.subr.mxu0 %v7968_v17 }
 0x36f   :  { %1070 = vmatpush1.msra.mxu1 %v5450_v54  ;;  %4230 = vmatpush3.msra.mxu0 %v5582_v9 }
 0x370   :  { %1071 = vmatprep.subr.mxu1 %v5462_v57  ;;  %4231 = vmatprep.subr.mxu0 %v7968_v17 }
 0x371   :  { %1072 = vmatpush1.msra.mxu1 %v5468_v58  ;;  %4232 = vmatpush3.msra.mxu0 %v5591_v10 }
 0x372   :  { %1073 = vmatprep.subr.mxu1 %v5475_v59  ;;  %4233 = vmatprep.subr.mxu0 %v7968_v17 }
 0x373   :  { %1074 = vmatpush1.msra.mxu1 %v5482_v60  ;;  %4234 = vmatpush3.msra.mxu0 %v5600_v11 }
 0x374   :  { %1075 = vmatprep.subr.mxu1 %v5494_v62  ;;  %4235 = vmatprep.subr.mxu0 %v7968_v17 }
 0x375   :  { %1076 = vmatpush1.msra.mxu1 %v7969_v34  ;;  %4236 = vmatpush3.msra.mxu0 %v7979_v12  ;;  %v7986_v12 = vld [vmem:[#allocation13_spill] sm:$0xff] }
 0x376   :  { %1077 = vmatprep.subr.mxu1 %v7980_v1  ;;  %4237 = vmatprep.subr.mxu0 %v7968_v17 }
 0x377   :  { %1078 = vmatpush1.msra.mxu1 %v7981_v24  ;;  %1111 = vmatprep.mubr.f32.mxu1 %v7968_v17 }
 0x378   :  { %4238 = vmatpush3.msra.mxu0 %v7982_v15  ;;  %4239 = vmatprep.mubr.msk.f32.mxu0 %vm5008_vm8, %v7968_v17 }
 0x379   :  { %1210 = vmatprep.subr.mxu1 %v7983_v21  ;;  %4242 = vmatprep.subr.mxu0 %v7968_v17 }
 0x418   :  { %v950_v13 = vpop.f32.mrf.mxu1  ;;  %v1021_v43 = vpop.f32.mrf.mxu0 }
 0x419   :  { %v1025_v28 = vadd.f32 %v950_v13, %v7984_v37  ;;  %v1039_v21 = vadd.f32 %v5748_v19, %v1021_v43  ;;  %v6037_v43 = vld [vmem:[%s7875_s3 + $0x148] sm:$0xff] }
 0x41a   :  { %v4206_v14 = vpop.f32.mrf.mxu0  ;;  %v952_v31 = vpop.f32.mrf.mxu1 }
 0x41b   :  { %v3623_v18 = vmul.f32 -1.442695, %v1025_v28  ;;  %v1032_v63 = vadd.f32 %v952_v31, %v7985_v0 }
 0x41d   :  { %4767 = vpow2.f32 %v3623_v18  ;;  %v3624_v56 = vmul.f32 -1.442695, %v1032_v63  ;;  %v6043_v63 = vld [vmem:[%s7875_s3 + $0x128] sm:$0xff] }
 0x41f   :  { %4769 = vpow2.f32 %v3624_v56  ;;  %v6050_v56 = vld [vmem:[%s7875_s3 + $0x120] sm:$0xff] }
 0x42a   :  { %v4768_v40 = vpop.eup %4767 }
 0x42b   :  { %v1029_v20 = vadd.f32 1.0, %v4768_v40  ;;  %v6057_v40 = vld [vmem:[%s7875_s3 + $0x110] sm:$0xff] }
 0x42c   :  { %v4770_v16 = vpop.eup %4769 }
 0x42d   :  { %4771 = vrcp.f32 %v1029_v20  ;;  %v1036_v15 = vadd.f32 1.0, %v4770_v16  ;;  %v5999_v16 = vld [vmem:[%s7875_s3 + $0x178] sm:$0xff]  ;;  %v6064_v20 = vld [vmem:[%s7875_s3 + $0x108] sm:$0xff] }
 0x42f   :  { %4773 = vrcp.f32 %v1036_v15  ;;  %v6031_v15 = vld [vmem:[%s7875_s3 + $0x138] sm:$0xff] }
 0x43a   :  { %v4772_v24 = vpop.eup %4771 }
 0x43b   :  { %v1040_v1 = vmul.f32 %v4772_v24, %v1039_v21  ;;  %v6024_v24 = vld [vmem:[%s7875_s3 + $0x140] sm:$0xff]  ;;  %v6078_v21 = vld [vmem:[%s7875_s3 + $0xf0] sm:$0xff] }
 0x43c   :  { %v4774_v37 = vpop.eup %4773 }
 0x43d   :  { %v1041_v13 = vadd.f32 %v1040_v1, %v7986_v12  ;;  %v1043_v28 = vsub.f32 1.0, %v4774_v37  ;;  %v1045_v31 = vmul.f32 %v4774_v37, %v5829_v22  ;;  %v6012_v12 = vld [vmem:[%s7875_s3 + $0x150] sm:$0xff]  ;;  %v6018_v1 = vld [vmem:[%s7875_s3 + $0x160] sm:$0xff] }
 0x43e   :  { %v6106_v37 = vld [vmem:[%s7875_s3 + $0xc0] sm:$0xff] }
 0x43f   :  { %4775 = vtanh.f32 %v1041_v13  ;;  %v6092_v13 = vld [vmem:[%s7875_s3 + $0xd8] sm:$0xff] }
 0x44c   :  { %v4776_v14 = vpop.eup %4775 }
 0x44d   :  { %v1044_v18 = vmul.f32 %v4776_v14, %v1043_v28  ;;  %v6120_v28 = vld [vmem:[%s7875_s3 + $0xa8] sm:$0xff]  ;;  %v6134_v14 = vld [vmem:[%s7875_s3 + $0x90] sm:$0xff] }
 0x44f   :  { %v5905_v0 = vadd.f32 %v1045_v31, %v1044_v18  ;;  %v6148_v18 = vld [vmem:[%s7875_s3 + $0x78] sm:$0xff]  ;;  %v6162_v31 = vld [vmem:[%s7875_s3 + $0x60] sm:$0xff] }
 0x451   :  { %7987 = vst [vmem:[#allocation10_spill] sm:$0xff] %v5905_v0  ;;  %1112 = vmatmul.mubr.f32.vlgmr.msra.gmra.mxu1 %v5905_v0  ;;  %4240 = vmatmul.mubr.f32.vlgmr.msra.gmra.mxu0 %v5905_v0 }
 0x452   :  { %1211 = vmatpush1.msra.mxu1 %v5302_v23  ;;  %4243 = vmatpush3.msra.mxu0 %v5317_v27  ;;  %v7988_v23 = vld [vmem:[#allocation6_spill] sm:$0xff]  ;;  %v7991_v27 = vld [vmem:[#allocation7_spill] sm:$0xff] }
 0x453   :  { %1212 = vmatprep.subr.mxu1 %v5307_v25  ;;  %4244 = vmatprep.subr.mxu0 %v7968_v17  ;;  %v7989_v25 = vld [vmem:[#allocation4_spill] sm:$0xff] }
 0x454   :  { %1213 = vmatpush1.msra.mxu1 %v5312_v26  ;;  %4245 = vmatpush3.msra.mxu0 %v5423_v50  ;;  %v7990_v26 = vld [vmem:[#allocation5_spill] sm:$0xff] }
 0x455   :  { %1214 = vmatprep.subr.mxu1 %v5323_v29  ;;  %4246 = vmatprep.subr.mxu0 %v7968_v17  ;;  %v5977_v29 = vld [vmem:[%s7875_s3 + $0x170] sm:$0xff] }
 0x456   :  { %1215 = vmatpush1.msra.mxu1 %v5330_v30  ;;  %4247 = vmatpush3.msra.mxu0 %v5455_v55 }
 0x457   :  { %1216 = vmatprep.subr.mxu1 %v5336_v32  ;;  %4248 = vmatprep.subr.mxu0 %v7968_v17 }
 0x458   :  { %1217 = vmatpush1.msra.mxu1 %v5343_v33  ;;  %4249 = vmatpush3.msra.mxu0 %v5487_v61  ;;  %v7992_v33 = vld [vmem:[#allocation18_spill] sm:$0xff] }
 0x459   :  { %1218 = vmatprep.subr.mxu1 %v5349_v35  ;;  %4250 = vmatprep.subr.mxu0 %v7968_v17 }
 0x45a   :  { %1219 = vmatpush1.msra.mxu1 %v5355_v36  ;;  %4251 = vmatpush3.msra.mxu0 %v5519_v2 }
 0x45b   :  { %1220 = vmatprep.subr.mxu1 %v5362_v38  ;;  %4252 = vmatprep.subr.mxu0 %v7968_v17 }
 0x45c   :  { %1221 = vmatpush1.msra.mxu1 %v5368_v39  ;;  %4253 = vmatpush3.msra.mxu0 %v5528_v3 }
 0x45d   :  { %1222 = vmatprep.subr.mxu1 %v5374_v41  ;;  %4254 = vmatprep.subr.mxu0 %v7968_v17  ;;  %v7993_v41 = vld [vmem:[#allocation20_spill] sm:$0xff] }
 0x45e   :  { %1223 = vmatpush1.msra.mxu1 %v5380_v42  ;;  %4255 = vmatpush3.msra.mxu0 %v5537_v4 }
 0x45f   :  { %1224 = vmatprep.subr.mxu1 %v5387_v44  ;;  %4256 = vmatprep.subr.mxu0 %v7968_v17 }
 0x460   :  { %1225 = vmatpush1.msra.mxu1 %v5393_v45  ;;  %4257 = vmatpush3.msra.mxu0 %v5546_v5 }
 0x461   :  { %1226 = vmatprep.subr.mxu1 %v5399_v46  ;;  %4258 = vmatprep.subr.mxu0 %v7968_v17 }
 0x462   :  { %1227 = vmatpush1.msra.mxu1 %v5405_v47  ;;  %4259 = vmatpush3.msra.mxu0 %v5555_v6 }
 0x463   :  { %1228 = vmatprep.subr.mxu1 %v5412_v48  ;;  %4260 = vmatprep.subr.mxu0 %v7968_v17 }
 0x464   :  { %1229 = vmatpush1.msra.mxu1 %v5418_v49  ;;  %4261 = vmatpush3.msra.mxu0 %v5564_v7 }
 0x465   :  { %1230 = vmatprep.subr.mxu1 %v5430_v51  ;;  %4262 = vmatprep.subr.mxu0 %v7968_v17 }
 0x466   :  { %1231 = vmatpush1.msra.mxu1 %v5436_v52  ;;  %4263 = vmatpush3.msra.mxu0 %v5573_v8  ;;  %v7994_v52 = vld [vmem:[#allocation11_spill] sm:$0xff] }
 0x467   :  { %1232 = vmatprep.subr.mxu1 %v5443_v53  ;;  %4264 = vmatprep.subr.mxu0 %v7968_v17 }
 0x468   :  { %1233 = vmatpush1.msra.mxu1 %v5450_v54  ;;  %4265 = vmatpush3.msra.mxu0 %v5582_v9 }
 0x469   :  { %1234 = vmatprep.subr.mxu1 %v5462_v57  ;;  %4266 = vmatprep.subr.mxu0 %v7968_v17 }
 0x46a   :  { %1235 = vmatpush1.msra.mxu1 %v5468_v58  ;;  %4267 = vmatpush3.msra.mxu0 %v5591_v10 }
 0x46b   :  { %1236 = vmatprep.subr.mxu1 %v5475_v59  ;;  %4268 = vmatprep.subr.mxu0 %v7968_v17 }
 0x46c   :  { %1237 = vmatpush1.msra.mxu1 %v5482_v60  ;;  %4269 = vmatpush3.msra.mxu0 %v5600_v11 }
 0x46d   :  { %1238 = vmatprep.subr.mxu1 %v5494_v62  ;;  %4270 = vmatprep.subr.mxu0 %v7968_v17  ;;  %v5993_v62 = vld [vmem:[%s7875_s3 + $0x168] sm:$0xff] }
 0x46e   :  { %1239 = vmatpush1.msra.mxu1 %v7969_v34  ;;  %4271 = vmatpush3.msra.mxu0 %v7988_v23  ;;  %v6005_v34 = vld [vmem:[%s7875_s3 + $0x158] sm:$0xff] }
 0x46f   :  { %1240 = vmatprep.subr.mxu1 %v7989_v25  ;;  %4272 = vmatprep.subr.mxu0 %v7968_v17  ;;  %v6176_v25 = vld [vmem:[%s7875_s3 + $0x48] sm:$0xff] }
 0x470   :  { %1241 = vmatpush1.msra.mxu1 %v7990_v26  ;;  %1274 = vmatprep.mubr.f32.mxu1 %v7968_v17  ;;  %v6190_v26 = vld [vmem:[%s7875_s3 + $0x30] sm:$0xff] }
 0x471   :  { %4273 = vmatpush3.msra.mxu0 %v7991_v27  ;;  %4274 = vmatprep.mubr.msk.f32.mxu0 %vm5008_vm8, %v7968_v17 }
 0x472   :  { %1373 = vmatprep.subr.mxu1 %v5977_v29  ;;  %4277 = vmatprep.subr.mxu0 %v7968_v17 }
 0x511   :  { %v1113_v30 = vpop.f32.mrf.mxu1  ;;  %v1184_v32 = vpop.f32.mrf.mxu0 }
 0x512   :  { %v1188_v35 = vadd.f32 %v1113_v30, %v7992_v33  ;;  %v1202_v49 = vadd.f32 %v5748_v19, %v1184_v32  ;;  %v6204_v30 = vld [vmem:[%s7875_s3 + $0x18] sm:$0xff]  ;;  %v6218_v32 = vld [vmem:[%s7875_s3] sm:$0xff] }
 0x513   :  { %v4241_v36 = vpop.f32.mrf.mxu0  ;;  %v1115_v39 = vpop.f32.mrf.mxu1  ;;  %7997 = vst [vmem:[#allocation2_spill] sm:$0xff] %v6218_v32 }
 0x514   :  { %v3625_v38 = vmul.f32 -1.442695, %v1188_v35  ;;  %v1195_v42 = vadd.f32 %v1115_v39, %v7993_v41  ;;  %v7998_v35 = vld [vmem:[#allocation22_spill] sm:$0xff] }
 0x516   :  { %4777 = vpow2.f32 %v3625_v38  ;;  %v3626_v44 = vmul.f32 -1.442695, %v1195_v42  ;;  %v7999_v42 = vld [vmem:[#allocation23_spill] sm:$0xff] }
 0x518   :  { %4779 = vpow2.f32 %v3626_v44 }
 0x523   :  { %v4778_v45 = vpop.eup %4777 }
 0x524   :  { %v1192_v46 = vadd.f32 1.0, %v4778_v45 }
 0x525   :  { %v4780_v47 = vpop.eup %4779 }
 0x526   :  { %4781 = vrcp.f32 %v1192_v46  ;;  %v1199_v48 = vadd.f32 1.0, %v4780_v47 }
 0x528   :  { %4783 = vrcp.f32 %v1199_v48 }
 0x533   :  { %v4782_v50 = vpop.eup %4781 }
 0x534   :  { %v1203_v51 = vmul.f32 %v4782_v50, %v1202_v49 }
 0x535   :  { %v4784_v54 = vpop.eup %4783 }
 0x536   :  { %v1204_v53 = vadd.f32 %v1203_v51, %v7994_v52  ;;  %v1206_v55 = vsub.f32 1.0, %v4784_v54  ;;  %v1208_v59 = vmul.f32 %v4784_v54, %v5905_v0  ;;  %v8000_v52 = vld [vmem:[#allocation17_spill] sm:$0xff] }
 0x538   :  { %4785 = vtanh.f32 %v1204_v53 }
 0x545   :  { %v4786_v57 = vpop.eup %4785 }
 0x546   :  { %v1207_v58 = vmul.f32 %v4786_v57, %v1206_v55 }
 0x548   :  { %v5986_v60 = vadd.f32 %v1208_v59, %v1207_v58 }
 0x54a   :  { %7995 = vst [vmem:[#allocation12_spill] sm:$0xff] %v5986_v60  ;;  %1275 = vmatmul.mubr.f32.vlgmr.msra.gmra.mxu1 %v5986_v60  ;;  %4275 = vmatmul.mubr.f32.vlgmr.msra.gmra.mxu0 %v5986_v60 }
 0x54b   :  { %1374 = vmatpush1.msra.mxu1 %v5993_v62  ;;  %4278 = vmatpush3.msra.mxu0 %v5999_v16 }
 0x54c   :  { %1375 = vmatprep.subr.mxu1 %v6005_v34  ;;  %4279 = vmatprep.subr.mxu0 %v7968_v17 }
 0x54d   :  { %1376 = vmatpush1.msra.mxu1 %v6012_v12  ;;  %4280 = vmatpush3.msra.mxu0 %v6018_v1 }
 0x54e   :  { %1377 = vmatprep.subr.mxu1 %v6024_v24  ;;  %4281 = vmatprep.subr.mxu0 %v7968_v17 }
 0x54f   :  { %1378 = vmatpush1.msra.mxu1 %v6031_v15  ;;  %4282 = vmatpush3.msra.mxu0 %v6037_v43 }
 0x550   :  { %1379 = vmatprep.subr.mxu1 %v6043_v63  ;;  %4283 = vmatprep.subr.mxu0 %v7968_v17 }
 0x551   :  { %1380 = vmatpush1.msra.mxu1 %v6050_v56  ;;  %4284 = vmatpush3.msra.mxu0 %v5487_v61  ;;  %v6071_v61 = vld [vmem:[%s7875_s3 + $0xf8] sm:$0xff] }
 0x552   :  { %1381 = vmatprep.subr.mxu1 %v6057_v40  ;;  %4285 = vmatprep.subr.mxu0 %v7968_v17 }
 0x553   :  { %1382 = vmatpush1.msra.mxu1 %v6064_v20  ;;  %4286 = vmatpush3.msra.mxu0 %v5519_v2  ;;  %v6085_v2 = vld [vmem:[%s7875_s3 + $0xe0] sm:$0xff] }
 0x554   :  { %1383 = vmatprep.subr.mxu1 %v6071_v61  ;;  %4287 = vmatprep.subr.mxu0 %v7968_v17 }
 0x555   :  { %1384 = vmatpush1.msra.mxu1 %v6078_v21  ;;  %4288 = vmatpush3.msra.mxu0 %v5528_v3  ;;  %v6099_v3 = vld [vmem:[%s7875_s3 + $0xc8] sm:$0xff] }
 0x556   :  { %1385 = vmatprep.subr.mxu1 %v6085_v2  ;;  %4289 = vmatprep.subr.mxu0 %v7968_v17 }
 0x557   :  { %1386 = vmatpush1.msra.mxu1 %v6092_v13  ;;  %4290 = vmatpush3.msra.mxu0 %v5537_v4  ;;  %v6113_v4 = vld [vmem:[%s7875_s3 + $0xb0] sm:$0xff] }
 0x558   :  { %1387 = vmatprep.subr.mxu1 %v6099_v3  ;;  %4291 = vmatprep.subr.mxu0 %v7968_v17 }
 0x559   :  { %1388 = vmatpush1.msra.mxu1 %v6106_v37  ;;  %4292 = vmatpush3.msra.mxu0 %v5546_v5  ;;  %v6127_v5 = vld [vmem:[%s7875_s3 + $0x98] sm:$0xff] }
 0x55a   :  { %1389 = vmatprep.subr.mxu1 %v6113_v4  ;;  %4293 = vmatprep.subr.mxu0 %v7968_v17 }
 0x55b   :  { %1390 = vmatpush1.msra.mxu1 %v6120_v28  ;;  %4294 = vmatpush3.msra.mxu0 %v5555_v6  ;;  %v6141_v6 = vld [vmem:[%s7875_s3 + $0x80] sm:$0xff] }
 0x55c   :  { %1391 = vmatprep.subr.mxu1 %v6127_v5  ;;  %4295 = vmatprep.subr.mxu0 %v7968_v17 }
 0x55d   :  { %1392 = vmatpush1.msra.mxu1 %v6134_v14  ;;  %4296 = vmatpush3.msra.mxu0 %v5564_v7  ;;  %v6155_v7 = vld [vmem:[%s7875_s3 + $0x68] sm:$0xff] }
 0x55e   :  { %1393 = vmatprep.subr.mxu1 %v6141_v6  ;;  %4297 = vmatprep.subr.mxu0 %v7968_v17 }
 0x55f   :  { %1394 = vmatpush1.msra.mxu1 %v6148_v18  ;;  %4298 = vmatpush3.msra.mxu0 %v5573_v8  ;;  %v6169_v8 = vld [vmem:[%s7875_s3 + $0x50] sm:$0xff] }
 0x560   :  { %1395 = vmatprep.subr.mxu1 %v6155_v7  ;;  %4299 = vmatprep.subr.mxu0 %v7968_v17 }
 0x561   :  { %1396 = vmatpush1.msra.mxu1 %v6162_v31  ;;  %4300 = vmatpush3.msra.mxu0 %v5582_v9  ;;  %v6183_v9 = vld [vmem:[%s7875_s3 + $0x38] sm:$0xff] }
 0x562   :  { %1397 = vmatprep.subr.mxu1 %v6169_v8  ;;  %4301 = vmatprep.subr.mxu0 %v7968_v17 }
 0x563   :  { %1398 = vmatpush1.msra.mxu1 %v6176_v25  ;;  %4302 = vmatpush3.msra.mxu0 %v5591_v10  ;;  %v6197_v10 = vld [vmem:[%s7875_s3 + $0x20] sm:$0xff] }
 0x564   :  { %1399 = vmatprep.subr.mxu1 %v6183_v9  ;;  %4303 = vmatprep.subr.mxu0 %v7968_v17 }
 0x565   :  { %1400 = vmatpush1.msra.mxu1 %v6190_v26  ;;  %4304 = vmatpush3.msra.mxu0 %v5600_v11  ;;  %v6211_v11 = vld [vmem:[%s7875_s3 + $0x8] sm:$0xff] }
 0x566   :  { %1401 = vmatprep.subr.mxu1 %v6197_v10  ;;  %4305 = vmatprep.subr.mxu0 %v7968_v17  ;;  %7996 = vst [vmem:[#allocation9_spill] sm:$0xff] %v6211_v11 }
 0x567   :  { %1402 = vmatpush1.msra.mxu1 %v6204_v30  ;;  %4306 = vmatpush3.msra.mxu0 %v7988_v23 }
 0x568   :  { %1403 = vmatprep.subr.mxu1 %v6211_v11  ;;  %4307 = vmatprep.subr.mxu0 %v7968_v17 }
 0x569   :  { %1404 = vmatpush1.msra.mxu1 %v6218_v32  ;;  %1437 = vmatprep.mubr.f32.mxu1 %v7968_v17 }
 0x56a   :  { %4308 = vmatpush3.msra.mxu0 %v7991_v27  ;;  %4309 = vmatprep.mubr.msk.f32.mxu0 %vm5008_vm8, %v7968_v17 }
 0x56b   :  { %1536 = vmatprep.subr.mxu1 %v5977_v29  ;;  %4312 = vmatprep.subr.mxu0 %v7968_v17 }
 0x60a   :  { %v1276_v23 = vpop.f32.mrf.mxu1  ;;  %v1347_v33 = vpop.f32.mrf.mxu0 }
 0x60b   :  { %v1351_v36 = vadd.f32 %v1276_v23, %v7998_v35  ;;  %v1365_v49 = vadd.f32 %v5748_v19, %v1347_v33  ;;  %v6252_v33 = vld [vmem:[%s7875_s3 + $0x130] sm:$0xff]  ;;  %v6261_v35 = vld [vmem:[%s7875_s3 + $0x118] sm:$0xff] }
 0x60c   :  { %v4276_v38 = vpop.f32.mrf.mxu0  ;;  %v1278_v41 = vpop.f32.mrf.mxu1 }
 0x60d   :  { %v3627_v39 = vmul.f32 -1.442695, %v1351_v36  ;;  %v1358_v44 = vadd.f32 %v1278_v41, %v7999_v42  ;;  %v6270_v36 = vld [vmem:[%s7875_s3 + $0x100] sm:$0xff]  ;;  %v6279_v38 = vld [vmem:[%s7875_s3 + $0xe8] sm:$0xff]  ;;  %v6297_v41 = vld [vmem:[%s7875_s3 + $0xb8] sm:$0xff] }
 0x60e   :  { %v6306_v42 = vld [vmem:[%s7875_s3 + $0xa0] sm:$0xff] }
 0x60f   :  { %4787 = vpow2.f32 %v3627_v39  ;;  %v3628_v45 = vmul.f32 -1.442695, %v1358_v44  ;;  %v6288_v39 = vld [vmem:[%s7875_s3 + $0xd0] sm:$0xff]  ;;  %v6315_v44 = vld [vmem:[%s7875_s3 + $0x88] sm:$0xff] }
 0x611   :  { %4789 = vpow2.f32 %v3628_v45  ;;  %v6324_v45 = vld [vmem:[%s7875_s3 + $0x70] sm:$0xff] }
 0x61c   :  { %v4788_v27 = vpop.eup %4787 }
 0x61d   :  { %v1355_v46 = vadd.f32 1.0, %v4788_v27  ;;  %v6333_v27 = vld [vmem:[%s7875_s3 + $0x58] sm:$0xff] }
 0x61e   :  { %v4790_v47 = vpop.eup %4789 }
 0x61f   :  { %4791 = vrcp.f32 %v1355_v46  ;;  %v1362_v48 = vadd.f32 1.0, %v4790_v47  ;;  %v6342_v46 = vld [vmem:[%s7875_s3 + $0x40] sm:$0xff]  ;;  %v6351_v47 = vld [vmem:[%s7875_s3 + $0x28] sm:$0xff] }
 0x620   :  { %8001 = vst [vmem:[#allocation14_spill] sm:$0xff] %v6351_v47 }
 0x621   :  { %4793 = vrcp.f32 %v1362_v48  ;;  %v6361_v48 = vld [vmem:[%s7875_s3 + $0x10] sm:$0xff] }
 0x622   :  { %8002 = vst [vmem:[#allocation16_spill] sm:$0xff] %v6361_v48 }
 0x62c   :  { %v4792_v50 = vpop.eup %4791 }
 0x62d   :  { %v1366_v51 = vmul.f32 %v4792_v50, %v1365_v49 }
 0x62e   :  { %v4794_v54 = vpop.eup %4793 }
 0x62f   :  { %v1367_v53 = vadd.f32 %v1366_v51, %v8000_v52  ;;  %v1369_v55 = vsub.f32 1.0, %v4794_v54  ;;  %v1371_v59 = vmul.f32 %v4794_v54, %v5986_v60  ;;  %v8003_v51 = vld [vmem:[#allocation24_spill] sm:$0xff] }
 0x631   :  { %4795 = vtanh.f32 %v1367_v53 }
 0x63e   :  { %v4796_v57 = vpop.eup %4795 }
 0x63f   :  { %v1370_v58 = vmul.f32 %v4796_v57, %v1369_v55  ;;  %v8004_v57 = vld [vmem:[#allocation25_spill] sm:$0xff] }
 0x641   :  { %v6232_v23 = vadd.f32 %v1371_v59, %v1370_v58 }
 0x643   :  { %1438 = vmatmul.mubr.f32.vlgmr.msra.gmra.mxu1 %v6232_v23  ;;  %4310 = vmatmul.mubr.f32.vlgmr.msra.gmra.mxu0 %v6232_v23 }
 0x644   :  { %1537 = vmatpush1.msra.mxu1 %v5993_v62  ;;  %4313 = vmatpush3.msra.mxu0 %v5999_v16 }
 0x645   :  { %1538 = vmatprep.subr.mxu1 %v6005_v34  ;;  %4314 = vmatprep.subr.mxu0 %v7968_v17 }
 0x646   :  { %1539 = vmatpush1.msra.mxu1 %v6012_v12  ;;  %4315 = vmatpush3.msra.mxu0 %v6018_v1 }
 0x647   :  { %1540 = vmatprep.subr.mxu1 %v6024_v24  ;;  %4316 = vmatprep.subr.mxu0 %v7968_v17 }
 0x648   :  { %1541 = vmatpush1.msra.mxu1 %v6031_v15  ;;  %4317 = vmatpush3.msra.mxu0 %v6037_v43 }
 0x649   :  { %1542 = vmatprep.subr.mxu1 %v6043_v63  ;;  %4318 = vmatprep.subr.mxu0 %v7968_v17 }
 0x64a   :  { %1543 = vmatpush1.msra.mxu1 %v6050_v56  ;;  %4319 = vmatpush3.msra.mxu0 %v6252_v33 }
 0x64b   :  { %1544 = vmatprep.subr.mxu1 %v6057_v40  ;;  %4320 = vmatprep.subr.mxu0 %v7968_v17 }
 0x64c   :  { %1545 = vmatpush1.msra.mxu1 %v6064_v20  ;;  %4321 = vmatpush3.msra.mxu0 %v6261_v35 }
 0x64d   :  { %1546 = vmatprep.subr.mxu1 %v6071_v61  ;;  %4322 = vmatprep.subr.mxu0 %v7968_v17 }
 0x64e   :  { %1547 = vmatpush1.msra.mxu1 %v6078_v21  ;;  %4323 = vmatpush3.msra.mxu0 %v6270_v36 }
 0x64f   :  { %1548 = vmatprep.subr.mxu1 %v6085_v2  ;;  %4324 = vmatprep.subr.mxu0 %v7968_v17 }
 0x650   :  { %1549 = vmatpush1.msra.mxu1 %v6092_v13  ;;  %4325 = vmatpush3.msra.mxu0 %v6279_v38 }
 0x651   :  { %1550 = vmatprep.subr.mxu1 %v6099_v3  ;;  %4326 = vmatprep.subr.mxu0 %v7968_v17 }
 0x652   :  { %1551 = vmatpush1.msra.mxu1 %v6106_v37  ;;  %4327 = vmatpush3.msra.mxu0 %v6288_v39 }
 0x653   :  { %1552 = vmatprep.subr.mxu1 %v6113_v4  ;;  %4328 = vmatprep.subr.mxu0 %v7968_v17 }
 0x654   :  { %1553 = vmatpush1.msra.mxu1 %v6120_v28  ;;  %4329 = vmatpush3.msra.mxu0 %v6297_v41 }
 0x655   :  { %1554 = vmatprep.subr.mxu1 %v6127_v5  ;;  %4330 = vmatprep.subr.mxu0 %v7968_v17 }
 0x656   :  { %1555 = vmatpush1.msra.mxu1 %v6134_v14  ;;  %4331 = vmatpush3.msra.mxu0 %v6306_v42 }
 0x657   :  { %1556 = vmatprep.subr.mxu1 %v6141_v6  ;;  %4332 = vmatprep.subr.mxu0 %v7968_v17 }
 0x658   :  { %1557 = vmatpush1.msra.mxu1 %v6148_v18  ;;  %4333 = vmatpush3.msra.mxu0 %v6315_v44 }
 0x659   :  { %1558 = vmatprep.subr.mxu1 %v6155_v7  ;;  %4334 = vmatprep.subr.mxu0 %v7968_v17 }
 0x65a   :  { %1559 = vmatpush1.msra.mxu1 %v6162_v31  ;;  %4335 = vmatpush3.msra.mxu0 %v6324_v45 }
 0x65b   :  { %1560 = vmatprep.subr.mxu1 %v6169_v8  ;;  %4336 = vmatprep.subr.mxu0 %v7968_v17 }
 0x65c   :  { %1561 = vmatpush1.msra.mxu1 %v6176_v25  ;;  %4337 = vmatpush3.msra.mxu0 %v6333_v27 }
 0x65d   :  { %1562 = vmatprep.subr.mxu1 %v6183_v9  ;;  %4338 = vmatprep.subr.mxu0 %v7968_v17 }
 0x65e   :  { %1563 = vmatpush1.msra.mxu1 %v6190_v26  ;;  %4339 = vmatpush3.msra.mxu0 %v6342_v46 }
 0x65f   :  { %1564 = vmatprep.subr.mxu1 %v6197_v10  ;;  %4340 = vmatprep.subr.mxu0 %v7968_v17 }
 0x660   :  { %1565 = vmatpush1.msra.mxu1 %v6204_v30  ;;  %4341 = vmatpush3.msra.mxu0 %v6351_v47  ;;  %v8005_v47 = vld [vmem:[#allocation15_spill] sm:$0xff] }
 0x661   :  { %1566 = vmatprep.subr.mxu1 %v6211_v11  ;;  %4342 = vmatprep.subr.mxu0 %v7968_v17 }
 0x662   :  { %1567 = vmatpush1.msra.mxu1 %v6218_v32  ;;  %1600 = vmatprep.mubr.f32.mxu1 %v7968_v17 }
 0x663   :  { %4343 = vmatpush3.msra.mxu0 %v6361_v48  ;;  %4344 = vmatprep.mubr.msk.f32.mxu0 %vm5008_vm8, %v7968_v17 }
 0x664   :  { %1699 = vmatprep.subr.mxu1 %v5977_v29  ;;  %4347 = vmatprep.subr.mxu0 %v7968_v17 }
 0x703   :  { %v1439_v49 = vpop.f32.mrf.mxu1  ;;  %v1510_v50 = vpop.f32.mrf.mxu0 }
 0x704   :  { %v1514_v52 = vadd.f32 %v1439_v49, %v8003_v51  ;;  %v1528_v29 = vadd.f32 %v5748_v19, %v1510_v50  ;;  %v8006_v19 = vld [vmem:[#allocation14_spill] sm:$0xff]  ;;  %v1889_v50 = vld [vmem:[%s7878_s6 + $0xd8] sm:$0xff] }
 0x705   :  { %v4311_v53 = vpop.f32.mrf.mxu0  ;;  %v1441_v55 = vpop.f32.mrf.mxu1 }
 0x706   :  { %v3629_v54 = vmul.f32 -1.442695, %v1514_v52  ;;  %v1521_v58 = vadd.f32 %v1441_v55, %v8004_v57 }
 0x708   :  { %4797 = vpow2.f32 %v3629_v54  ;;  %v3630_v59 = vmul.f32 -1.442695, %v1521_v58  ;;  %v1887_v58 = vld [vmem:[%s7878_s6 + $0xc8] sm:$0xff] }
 0x70a   :  { %4799 = vpow2.f32 %v3630_v59  ;;  %v1888_v59 = vld [vmem:[%s7878_s6 + $0xd0] sm:$0xff] }
 0x715   :  { %v4798_v60 = vpop.eup %4797 }
 0x716   :  { %v1518_v0 = vadd.f32 1.0, %v4798_v60  ;;  %v8009_v60 = vld [vmem:[#allocation16_spill] sm:$0xff] }
 0x717   :  { %v4800_v22 = vpop.eup %4799 }
 0x718   :  { %4801 = vrcp.f32 %v1518_v0  ;;  %v1525_v48 = vadd.f32 1.0, %v4800_v22  ;;  %v8007_v22 = vld [vmem:[#allocation9_spill] sm:$0xff]  ;;  %v8008_v0 = vld [vmem:[#allocation2_spill] sm:$0xff] }
 0x71a   :  { %4803 = vrcp.f32 %v1525_v48  ;;  %v1891_v48 = vld [vmem:[%s7878_s6 + $0xe8] sm:$0xff] }
 0x725   :  { %v4802_v32 = vpop.eup %4801 }
 0x726   :  { %v1529_v11 = vmul.f32 %v4802_v32, %v1528_v29  ;;  %v1903_v32 = vld [vmem:[%s7878_s6 + $0x148] sm:$0xff]  ;;  %v1886_v29 = vld [vmem:[%s7878_s6 + $0xc0] sm:$0xff] }
 0x727   :  { %v4804_v51 = vpop.eup %4803 }
 0x728   :  { %v1530_v49 = vadd.f32 %v1529_v11, %v8005_v47  ;;  %v1532_v52 = vsub.f32 1.0, %v4804_v51  ;;  %v1534_v55 = vmul.f32 %v4804_v51, %v6232_v23  ;;  %v1902_v11 = vld [vmem:[%s7878_s6 + $0x140] sm:$0xff]  ;;  %v1885_v51 = vld [vmem:[%s7878_s6 + $0xb8] sm:$0xff] }
 0x729   :  { %v1890_v47 = vld [vmem:[%s7878_s6 + $0xe0] sm:$0xff] }
 0x72a   :  { %4805 = vtanh.f32 %v1530_v49  ;;  %v1884_v49 = vld [vmem:[%s7878_s6 + $0xb0] sm:$0xff] }
 0x737   :  { %v4806_v53 = vpop.eup %4805 }
 0x738   :  { %v1533_v54 = vmul.f32 %v4806_v53, %v1532_v52  ;;  %v1883_v52 = vld [vmem:[%s7878_s6 + $0xa8] sm:$0xff]  ;;  %v1881_v53 = vld [vmem:[%s7878_s6 + $0x98] sm:$0xff] }
 0x73a   :  { %v6373_v57 = vadd.f32 %v1534_v55, %v1533_v54  ;;  %v1882_v54 = vld [vmem:[%s7878_s6 + $0xa0] sm:$0xff]  ;;  %v1880_v55 = vld [vmem:[%s7878_s6 + $0x90] sm:$0xff] }
 0x73c   :  { %1601 = vmatmul.mubr.f32.vlgmr.msra.gmra.mxu1 %v6373_v57  ;;  %4345 = vmatmul.mubr.f32.vlgmr.msra.gmra.mxu0 %v6373_v57 }
 0x73d   :  { %1700 = vmatpush1.msra.mxu1 %v5993_v62  ;;  %4348 = vmatpush3.msra.mxu0 %v5999_v16  ;;  %v1908_v62 = vld [vmem:[%s7878_s6 + $0x170] sm:$0xff]  ;;  %v1909_v16 = vld [vmem:[%s7878_s6 + $0x178] sm:$0xff] }
 0x73e   :  { %1701 = vmatprep.subr.mxu1 %v6005_v34  ;;  %4349 = vmatprep.subr.mxu0 %v7968_v17 }
 0x73f   :  { %1702 = vmatpush1.msra.mxu1 %v6012_v12  ;;  %4350 = vmatpush3.msra.mxu0 %v6018_v1  ;;  %v8010_v1 = vld [vmem:[#allocation26_spill] sm:$0xff] }
 0x740   :  { %1703 = vmatprep.subr.mxu1 %v6024_v24  ;;  %4351 = vmatprep.subr.mxu0 %v7968_v17 }
 0x741   :  { %1704 = vmatpush1.msra.mxu1 %v6031_v15  ;;  %4352 = vmatpush3.msra.mxu0 %v6037_v43 }
 0x742   :  { %1705 = vmatprep.subr.mxu1 %v6043_v63  ;;  %4353 = vmatprep.subr.mxu0 %v7968_v17 }
 0x743   :  { %1706 = vmatpush1.msra.mxu1 %v6050_v56  ;;  %4354 = vmatpush3.msra.mxu0 %v6252_v33  ;;  %v8011_v56 = vld [vmem:[#allocation27_spill] sm:$0xff]  ;;  %v1901_v33 = vld [vmem:[%s7878_s6 + $0x138] sm:$0xff] }
 0x744   :  { %1707 = vmatprep.subr.mxu1 %v6057_v40  ;;  %4355 = vmatprep.subr.mxu0 %v7968_v17 }
 0x745   :  { %1708 = vmatpush1.msra.mxu1 %v6064_v20  ;;  %4356 = vmatpush3.msra.mxu0 %v6261_v35  ;;  %v8013_v35 = vld [vmem:[#allocation30_spill] sm:$0xff] }
 0x746   :  { %1709 = vmatprep.subr.mxu1 %v6071_v61  ;;  %4357 = vmatprep.subr.mxu0 %v7968_v17 }
 0x747   :  { %1710 = vmatpush1.msra.mxu1 %v6078_v21  ;;  %4358 = vmatpush3.msra.mxu0 %v6270_v36  ;;  %v1899_v36 = vld [vmem:[%s7878_s6 + $0x128] sm:$0xff] }
 0x748   :  { %1711 = vmatprep.subr.mxu1 %v6085_v2  ;;  %4359 = vmatprep.subr.mxu0 %v7968_v17 }
 0x749   :  { %1712 = vmatpush1.msra.mxu1 %v6092_v13  ;;  %4360 = vmatpush3.msra.mxu0 %v6279_v38  ;;  %v1900_v38 = vld [vmem:[%s7878_s6 + $0x130] sm:$0xff] }
 0x74a   :  { %1713 = vmatprep.subr.mxu1 %v6099_v3  ;;  %4361 = vmatprep.subr.mxu0 %v7968_v17  ;;  %v6453_v3 = vld [vmem:[%s7877_s5] ss:$0 sm:$0xff] }
 0x74b   :  { %1714 = vmatpush1.msra.mxu1 %v6106_v37  ;;  %4362 = vmatpush3.msra.mxu0 %v6288_v39  ;;  %v1898_v39 = vld [vmem:[%s7878_s6 + $0x120] sm:$0xff] }
 0x74c   :  { %1715 = vmatprep.subr.mxu1 %v6113_v4  ;;  %4363 = vmatprep.subr.mxu0 %v7968_v17 }
 0x74d   :  { %1716 = vmatpush1.msra.mxu1 %v6120_v28  ;;  %4364 = vmatpush3.msra.mxu0 %v6297_v41  ;;  %v1896_v41 = vld [vmem:[%s7878_s6 + $0x110] sm:$0xff] }
 0x74e   :  { %1717 = vmatprep.subr.mxu1 %v6127_v5  ;;  %4365 = vmatprep.subr.mxu0 %v7968_v17  ;;  %v8012_v5 = vld [vmem:[#allocation21_spill] sm:$0xff] }
 0x74f   :  { %1718 = vmatpush1.msra.mxu1 %v6134_v14  ;;  %4366 = vmatpush3.msra.mxu0 %v6306_v42  ;;  %v1897_v42 = vld [vmem:[%s7878_s6 + $0x118] sm:$0xff] }
 0x750   :  { %1719 = vmatprep.subr.mxu1 %v6141_v6  ;;  %4367 = vmatprep.subr.mxu0 %v7968_v17 }
 0x751   :  { %1720 = vmatpush1.msra.mxu1 %v6148_v18  ;;  %4368 = vmatpush3.msra.mxu0 %v6315_v44  ;;  %v1895_v44 = vld [vmem:[%s7878_s6 + $0x108] sm:$0xff] }
 0x752   :  { %1721 = vmatprep.subr.mxu1 %v6155_v7  ;;  %4369 = vmatprep.subr.mxu0 %v7968_v17 }
 0x753   :  { %1722 = vmatpush1.msra.mxu1 %v6162_v31  ;;  %4370 = vmatpush3.msra.mxu0 %v6324_v45  ;;  %v1893_v45 = vld [vmem:[%s7878_s6 + $0xf8] sm:$0xff] }
 0x754   :  { %1723 = vmatprep.subr.mxu1 %v6169_v8  ;;  %4371 = vmatprep.subr.mxu0 %v7968_v17 }
 0x755   :  { %1724 = vmatpush1.msra.mxu1 %v6176_v25  ;;  %4372 = vmatpush3.msra.mxu0 %v6333_v27  ;;  %v1894_v27 = vld [vmem:[%s7878_s6 + $0x100] sm:$0xff] }
 0x756   :  { %1725 = vmatprep.subr.mxu1 %v6183_v9  ;;  %4373 = vmatprep.subr.mxu0 %v7968_v17  ;;  %v1907_v9 = vld [vmem:[%s7878_s6 + $0x168] sm:$0xff] }
 0x757   :  { %1726 = vmatpush1.msra.mxu1 %v6190_v26  ;;  %4374 = vmatpush3.msra.mxu0 %v6342_v46  ;;  %v1905_v26 = vld [vmem:[%s7878_s6 + $0x158] sm:$0xff]  ;;  %v1892_v46 = vld [vmem:[%s7878_s6 + $0xf0] sm:$0xff] }
 0x758   :  { %1727 = vmatprep.subr.mxu1 %v6197_v10  ;;  %4375 = vmatprep.subr.mxu0 %v7968_v17  ;;  %v1906_v10 = vld [vmem:[%s7878_s6 + $0x160] sm:$0xff] }
 0x759   :  { %1728 = vmatpush1.msra.mxu1 %v6204_v30  ;;  %4376 = vmatpush3.msra.mxu0 %v8006_v19  ;;  %v1904_v30 = vld [vmem:[%s7878_s6 + $0x150] sm:$0xff]  ;;  %v1878_v19 = vld [vmem:[%s7878_s6 + $0x80] sm:$0xff] }
 0x75a   :  { %1729 = vmatprep.subr.mxu1 %v8007_v22  ;;  %4377 = vmatprep.subr.mxu0 %v7968_v17  ;;  %v1879_v22 = vld [vmem:[%s7878_s6 + $0x88] sm:$0xff] }
 0x75b   :  { %1730 = vmatpush1.msra.mxu1 %v8008_v0  ;;  %4378 = vmatpush3.msra.mxu0 %v8009_v60  ;;  %v1877_v0 = vld [vmem:[%s7878_s6 + $0x78] sm:$0xff]  ;;  %v1875_v60 = vld [vmem:[%s7878_s6 + $0x68] sm:$0xff] }
 0x75c   :  { %1763 = vmatprep.mubr.f32.mxu1 %v7968_v17  ;;  %4379 = vmatprep.mubr.msk.f32.mxu0 %vm5008_vm8, %v7968_v17 }
 0x75d   :  { %1927 = vmatprep.subr.mxu1 %v1908_v62  ;;  %4382 = vmatprep.subr.mxu0 %v1909_v16  ;;  %v1876_v62 = vld [vmem:[%s7878_s6 + $0x70] sm:$0xff] }
 0x7fc   :  { %v1602_v34 = vpop.f32.mrf.mxu1  ;;  %v1673_v12 = vpop.f32.mrf.mxu0 }
 0x7fd   :  { %v1677_v24 = vadd.f32 %v1602_v34, %v8010_v1  ;;  %v1691_v37 = vadd.f32 %v6453_v3, %v1673_v12  ;;  %v1872_v34 = vld [vmem:[%s7878_s6 + $0x50] sm:$0xff]  ;;  %v1873_v12 = vld [vmem:[%s7878_s6 + $0x58] sm:$0xff]  ;;  %v1871_v1 = vld [vmem:[%s7878_s6 + $0x48] sm:$0xff] }
 0x7fe   :  { %v4346_v15 = vpop.f32.mrf.mxu0  ;;  %v1604_v63 = vpop.f32.mrf.mxu1 }
 0x7ff   :  { %v3631_v43 = vmul.f32 -1.442695, %v1677_v24  ;;  %v1684_v40 = vadd.f32 %v1604_v63, %v8011_v56  ;;  %v1869_v24 = vld [vmem:[%s7878_s6 + $0x38] sm:$0xff]  ;;  %v1870_v15 = vld [vmem:[%s7878_s6 + $0x40] sm:$0xff]  ;;  %v1867_v56 = vld [vmem:[%s7878_s6 + $0x28] sm:$0xff] }
 0x800   :  { %v1866_v63 = vld [vmem:[%s7878_s6 + $0x20] sm:$0xff] }
 0x801   :  { %4807 = vpow2.f32 %v3631_v43  ;;  %v3632_v20 = vmul.f32 -1.442695, %v1684_v40  ;;  %v1868_v43 = vld [vmem:[%s7878_s6 + $0x30] sm:$0xff]  ;;  %v1865_v40 = vld [vmem:[%s7878_s6 + $0x18] sm:$0xff] }
 0x803   :  { %4809 = vpow2.f32 %v3632_v20  ;;  %v1863_v20 = vld [vmem:[%s7878_s6 + $0x8] sm:$0xff] }
 0x80e   :  { %v4808_v61 = vpop.eup %4807 }
 0x80f   :  { %v1681_v21 = vadd.f32 1.0, %v4808_v61  ;;  %v1864_v61 = vld [vmem:[%s7878_s6 + $0x10] sm:$0xff] }
 0x810   :  { %v4810_v2 = vpop.eup %4809 }
 0x811   :  { %4811 = vrcp.f32 %v1681_v21  ;;  %v1688_v13 = vadd.f32 1.0, %v4810_v2  ;;  %v1862_v21 = vld [vmem:[%s7878_s6] sm:$0xff]  ;;  %v8014_v2 = vld [vmem:[#allocation3_spill] sm:$0xff] }
 0x813   :  { %4813 = vrcp.f32 %v1688_v13  ;;  %v8015_v13 = vld [vmem:[#allocation10_spill] sm:$0xff] }
 0x81e   :  { %v4812_v4 = vpop.eup %4811 }
 0x81f   :  { %v1692_v28 = vmul.f32 %v4812_v4, %v1691_v37  ;;  %v8016_v37 = vld [vmem:[#allocation12_spill] sm:$0xff] }
 0x820   :  { %v4814_v6 = vpop.eup %4813  ;;  %v6626_v4 = vld [vmem:[%s7879_s7 + $0x170] sm:$0xff] }
 0x821   :  { %v1693_v14 = vadd.f32 %v1692_v28, %v8012_v5  ;;  %v1695_v18 = vsub.f32 1.0, %v4814_v6  ;;  %v1697_v8 = vmul.f32 %v4814_v6, %v6373_v57  ;;  %8017 = vst [vmem:[#allocation13_spill] sm:$0xff] %v6626_v4  ;;  %v6644_v28 = vld [vmem:[%s7879_s7 + $0x150] sm:$0xff]  ;;  %v6650_v5 = vld [vmem:[%s7879_s7 + $0x140] sm:$0xff]  ;;  %v6662_v6 = vld [vmem:[%s7879_s7 + $0x128] sm:$0xff] }
 0x823   :  { %4815 = vtanh.f32 %v1693_v14  ;;  %v6656_v14 = vld [vmem:[%s7879_s7 + $0x138] sm:$0xff] }
 0x830   :  { %v4816_v7 = vpop.eup %4815 }
 0x831   :  { %v1696_v31 = vmul.f32 %v4816_v7, %v1695_v18  ;;  %v6668_v18 = vld [vmem:[%s7879_s7 + $0x120] sm:$0xff]  ;;  %v6674_v7 = vld [vmem:[%s7879_s7 + $0x110] sm:$0xff] }
 0x833   :  { %v6458_v25 = vadd.f32 %v1697_v8, %v1696_v31  ;;  %v6680_v31 = vld [vmem:[%s7879_s7 + $0x108] sm:$0xff]  ;;  %v6686_v8 = vld [vmem:[%s7879_s7 + $0xf8] sm:$0xff] }
 0x835   :  { %1764 = vmatmul.mubr.f32.vlgmr.msra.gmra.mxu1 %v6458_v25  ;;  %4380 = vmatmul.mubr.f32.vlgmr.msra.gmra.mxu0 %v6458_v25 }
 0x836   :  { %1928 = vmatpush1.msra.mxu1 %v1907_v9  ;;  %4383 = vmatpush3.msra.mxu0 %v1909_v16  ;;  %v1874_v16 = vld [vmem:[%s7878_s6 + $0x60] sm:$0xff]  ;;  %v6692_v9 = vld [vmem:[%s7879_s7 + $0xf0] sm:$0xff] }
 0x837   :  { %1929 = vmatprep.subr.mxu1 %v1905_v26  ;;  %4384 = vmatprep.subr.mxu0 %v1906_v10  ;;  %v6698_v26 = vld [vmem:[%s7879_s7 + $0xe0] sm:$0xff] }
 0x838   :  { %4414 = vmatprep.mubr.f32.mxu0 %v8013_v35  ;;  %1930 = vmatpush1.msra.mxu1 %v1904_v30  ;;  %v6710_v30 = vld [vmem:[%s7879_s7 + $0xc8] sm:$0xff] }
 0x839   :  { %4385 = vmatpush3.msra.mxu0 %v1906_v10  ;;  %1931 = vmatprep.subr.mxu1 %v1902_v11  ;;  %v6704_v10 = vld [vmem:[%s7879_s7 + $0xd8] sm:$0xff]  ;;  %v6716_v11 = vld [vmem:[%s7879_s7 + $0xc0] sm:$0xff] }
 0x83a   :  { %4386 = vmatprep.subr.mxu0 %v1903_v32  ;;  %1932 = vmatpush1.msra.mxu1 %v1901_v33  ;;  %v6728_v33 = vld [vmem:[%s7879_s7 + $0xa8] sm:$0xff] }
 0x83b   :  { %4387 = vmatpush3.msra.mxu0 %v1903_v32  ;;  %1933 = vmatprep.subr.mxu1 %v1899_v36  ;;  %v6722_v32 = vld [vmem:[%s7879_s7 + $0xb0] sm:$0xff] }
 0x83c   :  { %4388 = vmatprep.subr.mxu0 %v1900_v38  ;;  %1934 = vmatpush1.msra.mxu1 %v1898_v39  ;;  %v6740_v36 = vld [vmem:[%s7879_s7 + $0x90] sm:$0xff]  ;;  %v6752_v39 = vld [vmem:[%s7879_s7 + $0x78] sm:$0xff] }
 0x83d   :  { %4389 = vmatpush3.msra.mxu0 %v1900_v38  ;;  %1935 = vmatprep.subr.mxu1 %v1896_v41  ;;  %v6746_v38 = vld [vmem:[%s7879_s7 + $0x80] sm:$0xff]  ;;  %v6758_v41 = vld [vmem:[%s7879_s7 + $0x68] sm:$0xff] }
 0x83e   :  { %4390 = vmatprep.subr.mxu0 %v1897_v42  ;;  %1936 = vmatpush1.msra.mxu1 %v1895_v44  ;;  %v6770_v44 = vld [vmem:[%s7879_s7 + $0x50] sm:$0xff] }
 0x83f   :  { %4391 = vmatpush3.msra.mxu0 %v1897_v42  ;;  %1937 = vmatprep.subr.mxu1 %v1893_v45  ;;  %v6764_v42 = vld [vmem:[%s7879_s7 + $0x60] sm:$0xff]  ;;  %v6776_v45 = vld [vmem:[%s7879_s7 + $0x48] sm:$0xff] }
 0x840   :  { %4392 = vmatprep.subr.mxu0 %v1894_v27  ;;  %1938 = vmatpush1.msra.mxu1 %v1892_v46  ;;  %v6788_v46 = vld [vmem:[%s7879_s7 + $0x30] sm:$0xff] }
 0x841   :  { %4393 = vmatpush3.msra.mxu0 %v1894_v27  ;;  %1939 = vmatprep.subr.mxu1 %v1890_v47  ;;  %v6782_v27 = vld [vmem:[%s7879_s7 + $0x38] sm:$0xff]  ;;  %v6794_v47 = vld [vmem:[%s7879_s7 + $0x20] sm:$0xff] }
 0x842   :  { %4394 = vmatprep.subr.mxu0 %v1891_v48  ;;  %1940 = vmatpush1.msra.mxu1 %v1889_v50  ;;  %v6806_v50 = vld [vmem:[%s7879_s7 + $0x8] sm:$0xff] }
 0x843   :  { %4395 = vmatpush3.msra.mxu0 %v1891_v48  ;;  %1941 = vmatprep.subr.mxu1 %v1887_v58  ;;  %v6800_v48 = vld [vmem:[%s7879_s7 + $0x18] sm:$0xff]  ;;  %8019 = vst [vmem:[#allocation4_spill] sm:$0xff] %v6806_v50  ;;  %v6811_v58 = vld [vmem:[%s7879_s7] sm:$0xff] }
 0x844   :  { %4396 = vmatprep.subr.mxu0 %v1888_v59  ;;  %1942 = vmatpush1.msra.mxu1 %v1886_v29  ;;  %8018 = vst [vmem:[#allocation6_spill] sm:$0xff] %v6800_v48  ;;  %8020 = vst [vmem:[#allocation5_spill] sm:$0xff] %v6811_v58  ;;  %v6823_v29 = vld [vmem:[%s7879_s7 + $0x160] sm:$0xff] }
 0x845   :  { %4397 = vmatpush3.msra.mxu0 %v1888_v59  ;;  %1943 = vmatprep.subr.mxu1 %v1884_v49  ;;  %v6816_v59 = vld [vmem:[%s7879_s7 + $0x178] sm:$0xff]  ;;  %v6830_v49 = vld [vmem:[%s7879_s7 + $0x148] sm:$0xff] }
 0x846   :  { %4398 = vmatprep.subr.mxu0 %v1885_v51  ;;  %1944 = vmatpush1.msra.mxu1 %v1883_v52  ;;  %v6845_v52 = vld [vmem:[%s7879_s7 + $0x118] sm:$0xff] }
 0x847   :  { %4399 = vmatpush3.msra.mxu0 %v1885_v51  ;;  %1945 = vmatprep.subr.mxu1 %v1881_v53  ;;  %v6838_v51 = vld [vmem:[%s7879_s7 + $0x130] sm:$0xff]  ;;  %v6852_v53 = vld [vmem:[%s7879_s7 + $0x100] sm:$0xff] }
 0x848   :  { %4400 = vmatprep.subr.mxu0 %v1882_v54  ;;  %1946 = vmatpush1.msra.mxu1 %v1880_v55  ;;  %v6866_v55 = vld [vmem:[%s7879_s7 + $0xd0] sm:$0xff] }
 0x849   :  { %4401 = vmatpush3.msra.mxu0 %v1882_v54  ;;  %1947 = vmatprep.subr.mxu1 %v1878_v19  ;;  %v6859_v54 = vld [vmem:[%s7879_s7 + $0xe8] sm:$0xff]  ;;  %v6873_v19 = vld [vmem:[%s7879_s7 + $0xb8] sm:$0xff] }
 0x84a   :  { %4402 = vmatprep.subr.mxu0 %v1879_v22  ;;  %1948 = vmatpush1.msra.mxu1 %v1877_v0  ;;  %v6887_v0 = vld [vmem:[%s7879_s7 + $0x88] sm:$0xff] }
 0x84b   :  { %4403 = vmatpush3.msra.mxu0 %v1879_v22  ;;  %1949 = vmatprep.subr.mxu1 %v1875_v60  ;;  %v6880_v22 = vld [vmem:[%s7879_s7 + $0xa0] sm:$0xff]  ;;  %v6894_v60 = vld [vmem:[%s7879_s7 + $0x70] sm:$0xff] }
 0x84c   :  { %4404 = vmatprep.subr.mxu0 %v1876_v62  ;;  %1950 = vmatpush1.msra.mxu1 %v1874_v16  ;;  %v6908_v16 = vld [vmem:[%s7879_s7 + $0x40] sm:$0xff] }
 0x84d   :  { %4405 = vmatpush3.msra.mxu0 %v1876_v62  ;;  %1951 = vmatprep.subr.mxu1 %v1872_v34  ;;  %v6901_v62 = vld [vmem:[%s7879_s7 + $0x58] sm:$0xff]  ;;  %v6915_v34 = vld [vmem:[%s7879_s7 + $0x28] sm:$0xff] }
 0x84e   :  { %4406 = vmatprep.subr.mxu0 %v1873_v12  ;;  %1952 = vmatpush1.msra.mxu1 %v1871_v1  ;;  %8021 = vst [vmem:[#allocation7_spill] sm:$0xff] %v6915_v34 }
 0x84f   :  { %4407 = vmatpush3.msra.mxu0 %v1873_v12  ;;  %1953 = vmatprep.subr.mxu1 %v1869_v24  ;;  %v6922_v12 = vld [vmem:[%s7879_s7 + $0x10] sm:$0xff] }
 0x850   :  { %4408 = vmatprep.subr.mxu0 %v1870_v15  ;;  %1954 = vmatpush1.msra.mxu1 %v1868_v43  ;;  %8022 = vst [vmem:[#allocation18_spill] sm:$0xff] %v6922_v12 }
 0x851   :  { %4409 = vmatpush3.msra.mxu0 %v1870_v15  ;;  %1955 = vmatprep.subr.mxu1 %v1866_v63  ;;  %v8023_v15 = vld [vmem:[#allocation28_spill] sm:$0xff] }
 0x852   :  { %4410 = vmatprep.subr.mxu0 %v1867_v56  ;;  %1956 = vmatpush1.msra.mxu1 %v1865_v40 }
 0x853   :  { %4411 = vmatpush3.msra.mxu0 %v1867_v56  ;;  %1957 = vmatprep.subr.mxu1 %v1863_v20  ;;  %v8024_v20 = vld [vmem:[#allocation29_spill] sm:$0xff] }
 0x854   :  { %4412 = vmatprep.subr.mxu0 %v1864_v61  ;;  %1958 = vmatpush1.msra.mxu1 %v1862_v21 }
 0x855   :  { %1991 = vmatprep.mubr.f32.mxu1 %v7968_v17  ;;  %4413 = vmatpush3.msra.mxu0 %v1864_v61 }
 0x856   :  { %1992 = vmatmul.mubr.f32.vlgmr.msra.gmra.mxu1 %v8013_v35  ;;  %4415 = vmatmul.mubr.f32.vlgmr.msra.gmra.mxu0 %v8014_v2  ;;  %v6734_v35 = vld [vmem:[%s7879_s7 + $0x98] sm:$0xff] }
 0x857   :  { %4417 = vmatprep.mubr.f32.mxu0 %v8015_v13  ;;  %1997 = vmatprep.mubr.f32.mxu1 %v7968_v17 }
 0x858   :  { %4426 = vmatprep.subr.mxu0 %v7968_v17  ;;  %2194 = vmatprep.subr.mxu1 %v6626_v4 }
 0x859   :  { %4427 = vmatpush3.msra.mxu0 %v6816_v59 }
 0x85a   :  { %1998 = vmatmul.mubr.f32.gmra.mxu1 %v8014_v2  ;;  %4418 = vmatmul.mubr.f32.gmra.mxu0 %v8016_v37 }
 0x85b   :  { %4420 = vmatprep.mubr.f32.mxu0 %v6232_v23  ;;  %2003 = vmatprep.mubr.f32.mxu1 %v7968_v17 }
 0x85c   :  { %4428 = vmatprep.subr.mxu0 %v7968_v17 }
 0x85d   :  { %4429 = vmatpush3.msra.mxu0 %v6823_v29 }
 0x85e   :  { %2004 = vmatmul.mubr.f32.gmra.mxu1 %v8015_v13  ;;  %4421 = vmatmul.mubr.f32.gmra.mxu0 %v6373_v57 }
 0x85f   :  { %4423 = vmatprep.mubr.f32.mxu0 %v6458_v25  ;;  %2009 = vmatprep.mubr.f32.mxu1 %v7968_v17 }
 0x860   :  { %4430 = vmatprep.subr.mxu0 %v7968_v17 }
 0x861   :  { %4431 = vmatpush3.msra.mxu0 %v6830_v49 }
 0x862   :  { %2010 = vmatmul.mubr.f32.gmra.mxu1 %v8016_v37  ;;  %4432 = vmatprep.subr.mxu0 %v7968_v17 }
 0x863   :  { %2015 = vmatprep.mubr.f32.mxu1 %v7968_v17  ;;  %4433 = vmatpush3.msra.mxu0 %v6838_v51 }
 0x864   :  { %4434 = vmatprep.subr.mxu0 %v7968_v17 }
 0x865   :  { %4435 = vmatpush3.msra.mxu0 %v6845_v52 }
 0x866   :  { %2016 = vmatmul.mubr.f32.gmra.mxu1 %v6232_v23  ;;  %v6632_v23 = vld [vmem:[%s7879_s7 + $0x168] sm:$0xff]  ;;  %4436 = vmatprep.subr.mxu0 %v7968_v17 }
 0x867   :  { %2021 = vmatprep.mubr.f32.mxu1 %v7968_v17  ;;  %2195 = vmatpush1.msra.mxu1 %v6632_v23 }
 0x868   :  { %4437 = vmatpush3.msra.mxu0 %v6852_v53 }
 0x869   :  { %4438 = vmatprep.subr.mxu0 %v7968_v17 }
 0x86a   :  { %2022 = vmatmul.mubr.f32.gmra.mxu1 %v6373_v57  ;;  %v6638_v57 = vld [vmem:[%s7879_s7 + $0x158] sm:$0xff]  ;;  %4439 = vmatpush3.msra.mxu0 %v6859_v54 }
 0x86b   :  { %2027 = vmatprep.mubr.f32.mxu1 %v7968_v17  ;;  %2196 = vmatprep.subr.mxu1 %v6638_v57 }
 0x86c   :  { %2197 = vmatpush1.msra.mxu1 %v6644_v28  ;;  %4440 = vmatprep.subr.mxu0 %v7968_v17 }
 0x86d   :  { %2198 = vmatprep.subr.mxu1 %v6650_v5  ;;  %4441 = vmatpush3.msra.mxu0 %v6866_v55 }
 0x86e   :  { %2028 = vmatmul.mubr.f32.gmra.mxu1 %v6458_v25  ;;  %4442 = vmatprep.subr.mxu0 %v7968_v17 }
 0x86f   :  { %2033 = vmatprep.mubr.f32.mxu1 %v7968_v17  ;;  %2199 = vmatpush1.msra.mxu1 %v6656_v14 }
 0x870   :  { %2200 = vmatprep.subr.mxu1 %v6662_v6  ;;  %4443 = vmatpush3.msra.mxu0 %v6873_v19 }
 0x871   :  { %2201 = vmatpush1.msra.mxu1 %v6668_v18  ;;  %4444 = vmatprep.subr.mxu0 %v7968_v17 }
 0x872   :  { %2202 = vmatprep.subr.mxu1 %v6674_v7  ;;  %4445 = vmatpush3.msra.mxu0 %v6880_v22 }
 0x873   :  { %2203 = vmatpush1.msra.mxu1 %v6680_v31  ;;  %4446 = vmatprep.subr.mxu0 %v7968_v17 }
 0x874   :  { %2204 = vmatprep.subr.mxu1 %v6686_v8  ;;  %4447 = vmatpush3.msra.mxu0 %v6887_v0 }
 0x875   :  { %2205 = vmatpush1.msra.mxu1 %v6692_v9  ;;  %4448 = vmatprep.subr.mxu0 %v7968_v17 }
 0x876   :  { %2206 = vmatprep.subr.mxu1 %v6698_v26  ;;  %4449 = vmatpush3.msra.mxu0 %v6894_v60 }
 0x877   :  { %2207 = vmatpush1.msra.mxu1 %v6704_v10  ;;  %4450 = vmatprep.subr.mxu0 %v7968_v17 }
 0x878   :  { %2208 = vmatprep.subr.mxu1 %v6710_v30  ;;  %4451 = vmatpush3.msra.mxu0 %v6901_v62 }
 0x879   :  { %2209 = vmatpush1.msra.mxu1 %v6716_v11  ;;  %4452 = vmatprep.subr.mxu0 %v7968_v17 }
 0x87a   :  { %2210 = vmatprep.subr.mxu1 %v6722_v32  ;;  %4453 = vmatpush3.msra.mxu0 %v6908_v16 }
 0x87b   :  { %2211 = vmatpush1.msra.mxu1 %v6728_v33  ;;  %4454 = vmatprep.subr.mxu0 %v7968_v17 }
 0x87c   :  { %2212 = vmatprep.subr.mxu1 %v6734_v35  ;;  %4455 = vmatpush3.msra.mxu0 %v6915_v34  ;;  %v8025_v34 = vld [vmem:[#allocation19_spill] sm:$0xff] }
 0x87d   :  { %2213 = vmatpush1.msra.mxu1 %v6740_v36  ;;  %4456 = vmatprep.subr.mxu0 %v7968_v17 }
 0x87e   :  { %2214 = vmatprep.subr.mxu1 %v6746_v38  ;;  %4457 = vmatpush3.msra.mxu0 %v6922_v12 }
 0x87f   :  { %2215 = vmatpush1.msra.mxu1 %v6752_v39  ;;  %4461 = vmatprep.subr.mxu0 %v7968_v17 }
 0x880   :  { %2216 = vmatprep.subr.mxu1 %v6758_v41 }
 0x881   :  { %2217 = vmatpush1.msra.mxu1 %v6764_v42 }
 0x882   :  { %2218 = vmatprep.subr.mxu1 %v6770_v44 }
 0x883   :  { %2219 = vmatpush1.msra.mxu1 %v6776_v45 }
 0x884   :  { %2220 = vmatprep.subr.mxu1 %v6782_v27 }
 0x885   :  { %2221 = vmatpush1.msra.mxu1 %v6788_v46 }
 0x886   :  { %2222 = vmatprep.subr.mxu1 %v6794_v47 }
 0x887   :  { %2223 = vmatpush1.msra.mxu1 %v6800_v48 }
 0x888   :  { %2224 = vmatprep.subr.mxu1 %v6806_v50 }
 0x889   :  { %2225 = vmatpush1.msra.mxu1 %v6811_v58 }
 0x88a   :  { %2363 = vmatprep.subr.mxu1 %v6626_v4 }
 0x8f5   :  { %v1765_v1 = vpop.f32.mrf.mxu1  ;;  %v1836_v24 = vpop.f32.mrf.mxu0 }
 0x8f6   :  { %v1840_v43 = vadd.f32 %v1765_v1, %v8023_v15  ;;  %v1854_v12 = vadd.f32 %v6453_v3, %v1836_v24  ;;  %v8026_v3 = vld [vmem:[#allocation7_spill] sm:$0xff] }
 0x8f7   :  { %v4381_v63 = vpop.f32.mrf.mxu0  ;;  %v1767_v40 = vpop.f32.mrf.mxu1 }
 0x8f8   :  { %v3633_v56 = vmul.f32 -1.442695, %v1840_v43  ;;  %v1847_v61 = vadd.f32 %v1767_v40, %v8024_v20 }
 0x8fa   :  { %4817 = vpow2.f32 %v3633_v56  ;;  %v3634_v21 = vmul.f32 -1.442695, %v1847_v61 }
 0x8fc   :  { %4819 = vpow2.f32 %v3634_v21 }
 0x907   :  { %v4818_v2 = vpop.eup %4817 }
 0x908   :  { %v1844_v13 = vadd.f32 1.0, %v4818_v2 }
 0x909   :  { %v4820_v37 = vpop.eup %4819 }
 0x90a   :  { %4821 = vrcp.f32 %v1844_v13  ;;  %v1851_v4 = vadd.f32 1.0, %v4820_v37 }
 0x90c   :  { %4823 = vrcp.f32 %v1851_v4  ;;  %v8028_v4 = vld [vmem:[#allocation5_spill] sm:$0xff] }
 0x917   :  { %v4822_v58 = vpop.eup %4821 }
 0x918   :  { %v1855_v50 = vmul.f32 %v4822_v58, %v1854_v12  ;;  %v8030_v58 = vld [vmem:[#allocation13_spill] sm:$0xff] }
 0x919   :  { %v4824_v15 = vpop.eup %4823 }
 0x91a   :  { %v1856_v1 = vadd.f32 %v1855_v50, %v8025_v34  ;;  %v1858_v43 = vsub.f32 1.0, %v4824_v15  ;;  %v1860_v40 = vmul.f32 %v4824_v15, %v6458_v25  ;;  %v8027_v25 = vld [vmem:[#allocation4_spill] sm:$0xff]  ;;  %v8029_v50 = vld [vmem:[#allocation18_spill] sm:$0xff]  ;;  %v1993_v34 = vpop.f32.mrf.mxu1 }
 0x91c   :  { %4825 = vtanh.f32 %v1856_v1  ;;  %v1995_v12 = vpop.f32.mrf.mxu1  ;;  %v7017_v1 = vpop.f32.mrf.mxu0 }
 0x91d   :  { %8037 = vst [vmem:[#allocation25_spill] sm:$0xff] %v7017_v1 }
 0x91e   :  { %v7005_v24 = vpop.f32.mrf.mxu1 }
 0x91f   :  { %8031 = vst [vmem:[#allocation20_spill] sm:$0xff] %v7005_v24 }
 0x920   :  { %v7007_v61 = vpop.f32.mrf.mxu1 }
 0x921   :  { %8032 = vst [vmem:[#allocation11_spill] sm:$0xff] %v7007_v61 }
 0x922   :  { %v7009_v21 = vpop.f32.mrf.mxu1 }
 0x923   :  { %8033 = vst [vmem:[#allocation22_spill] sm:$0xff] %v7009_v21 }
 0x924   :  { %v7011_v2 = vpop.f32.mrf.mxu1 }
 0x925   :  { %8034 = vst [vmem:[#allocation23_spill] sm:$0xff] %v7011_v2 }
 0x926   :  { %v7013_v13 = vpop.f32.mrf.mxu1 }
 0x927   :  { %8035 = vst [vmem:[#allocation17_spill] sm:$0xff] %v7013_v13 }
 0x928   :  { %v7015_v37 = vpop.f32.mrf.mxu1 }
 0x929   :  { %v4826_v63 = vpop.eup %4825  ;;  %8036 = vst [vmem:[#allocation24_spill] sm:$0xff] %v7015_v37  ;;  %v1910_v37 = vld [vmem:[%s7880_s8] sm:$0x7] }
 0x92a   :  { %v1859_v56 = vmul.f32 %v4826_v63, %v1858_v43  ;;  %v7019_v15 = vpop.f32.mrf.mxu1  ;;  %v2106_v43 = vpop.f32.mrf.mxu0 }
 0x92b   :  { %8038 = vst [vmem:[#allocation15_spill] sm:$0xff] %v7019_v15 }
 0x92c   :  { %v1861_v20 = vadd.f32 %v1860_v40, %v1859_v56  ;;  %v7021_v63 = vpop.f32.mrf.mxu1  ;;  %v7023_v56 = vpop.f32.mrf.mxu0 }
 0x92d   :  { %8039 = vst [vmem:[#allocation14_spill] sm:$0xff] %v7021_v63  ;;  %8040 = vst [vmem:[#allocation9_spill] sm:$0xff] %v7023_v56  ;;  %v8048_v63 = vld [vmem:[#allocation8_spill] sm:$0xff] }
 0x92e   :  { %2034 = vmatmul.mubr.f32.gmra.mxu1 %v1861_v20  ;;  %4424 = vmatmul.mubr.f32.gmra.mxu0 %v1861_v20  ;;  %v7025_v40 = vpop.f32.mrf.mxu1  ;;  %v7027_v20 = vpop.f32.mrf.mxu0  ;;  %v8049_v56 = vsub.s32 0, %v8048_v63 }
 0x92f   :  { %2258 = vmatprep.mubr.f32.mxu1 %v7968_v17  ;;  %4458 = vmatprep.mubr.msk.f32.mxu0 %vm5008_vm8, %v7968_v17  ;;  %8041 = vst [vmem:[#allocation2_spill] sm:$0xff] %v7025_v40  ;;  %8042 = vst [vmem:[#allocation16_spill] sm:$0xff] %v7027_v20 }
 0x930   :  { %v7029_v21 = vpop.f32.mrf.mxu1  ;;  %v7031_v2 = vpop.f32.mrf.mxu0  ;;  %v7044_v61 = vrot.slane %v1910_v37, %v8049_v56 }
 0x931   :  { %8043 = vst [vmem:[#allocation26_spill] sm:$0xff] %v7029_v21  ;;  %8044 = vst [vmem:[#allocation27_spill] sm:$0xff] %v7031_v2 }
 0x932   :  { %2259 = vmatmul.mubr.f32.vlgmr.msra.gmra.mxu1 %v7968_v17  ;;  %4459 = vmatmul.mubr.f32.vlgmr.msra.gmra.mxu0 %v7968_v17  ;;  %v7033_v13 = vpop.f32.mrf.mxu1  ;;  %v7038_v15 = vpop.f32.mrf.mxu0  ;;  %8050 = vst [vmem:[#allocation10_spill] sm:$0xff] %v7044_v61 }
 0x933   :  { %2364 = vmatpush1.msra.mxu1 %v6632_v23  ;;  %4462 = vmatpush3.msra.mxu0 %v6816_v59  ;;  %8045 = vst [vmem:[#allocation21_spill] sm:$0xff] %v7033_v13  ;;  %8046 = vst [vmem:[#allocation30_spill] sm:$0xff] %v7038_v15  ;;  %v1994_v13 = vadd.f32 %v1993_v34, %v7044_v61  ;;  %v8055_v15 = vsub.s32 1, %v8048_v63  ;;  %v7063_v61 = vld [vmem:[%s7881_s9] ss:$0 sm:$0xff] }
 0x934   :  { %2365 = vmatprep.subr.mxu1 %v6638_v57  ;;  %4463 = vmatprep.subr.mxu0 %v7968_v17  ;;  %v7040_v1 = vpop.f32.mrf.mxu1 }
 0x935   :  { %2366 = vmatpush1.msra.mxu1 %v6644_v28  ;;  %4464 = vmatpush3.msra.mxu0 %v6823_v29  ;;  %8047 = vst [vmem:[#allocation3_spill] sm:$0xff] %v7040_v1 }
 0x936   :  { %2367 = vmatprep.subr.mxu1 %v6650_v5  ;;  %4465 = vmatprep.subr.mxu0 %v7968_v17 }
 0x937   :  { %2368 = vmatpush1.msra.mxu1 %v6656_v14  ;;  %4466 = vmatpush3.msra.mxu0 %v6830_v49 }
 0x938   :  { %2369 = vmatprep.subr.mxu1 %v6662_v6  ;;  %4467 = vmatprep.subr.mxu0 %v7968_v17 }
 0x939   :  { %2370 = vmatpush1.msra.mxu1 %v6668_v18  ;;  %4468 = vmatpush3.msra.mxu0 %v6838_v51 }
 0x93a   :  { %2371 = vmatprep.subr.mxu1 %v6674_v7  ;;  %4469 = vmatprep.subr.mxu0 %v7968_v17 }
 0x93b   :  { %2372 = vmatpush1.msra.mxu1 %v6680_v31  ;;  %4470 = vmatpush3.msra.mxu0 %v6845_v52 }
 0x93c   :  { %2373 = vmatprep.subr.mxu1 %v6686_v8  ;;  %4471 = vmatprep.subr.mxu0 %v7968_v17 }
 0x93d   :  { %2374 = vmatpush1.msra.mxu1 %v6692_v9  ;;  %4472 = vmatpush3.msra.mxu0 %v6852_v53 }
 0x93e   :  { %2375 = vmatprep.subr.mxu1 %v6698_v26  ;;  %4473 = vmatprep.subr.mxu0 %v7968_v17 }
 0x93f   :  { %2376 = vmatpush1.msra.mxu1 %v6704_v10  ;;  %4474 = vmatpush3.msra.mxu0 %v6859_v54 }
 0x940   :  { %2377 = vmatprep.subr.mxu1 %v6710_v30  ;;  %4475 = vmatprep.subr.mxu0 %v7968_v17 }
 0x941   :  { %2378 = vmatpush1.msra.mxu1 %v6716_v11  ;;  %4476 = vmatpush3.msra.mxu0 %v6866_v55 }
 0x942   :  { %2379 = vmatprep.subr.mxu1 %v6722_v32  ;;  %4477 = vmatprep.subr.mxu0 %v7968_v17 }
 0x943   :  { %2380 = vmatpush1.msra.mxu1 %v6728_v33  ;;  %4478 = vmatpush3.msra.mxu0 %v6873_v19 }
 0x944   :  { %2381 = vmatprep.subr.mxu1 %v6734_v35  ;;  %4479 = vmatprep.subr.mxu0 %v7968_v17 }
 0x945   :  { %2382 = vmatpush1.msra.mxu1 %v6740_v36  ;;  %4480 = vmatpush3.msra.mxu0 %v6880_v22 }
 0x946   :  { %2383 = vmatprep.subr.mxu1 %v6746_v38  ;;  %4481 = vmatprep.subr.mxu0 %v7968_v17 }
 0x947   :  { %2384 = vmatpush1.msra.mxu1 %v6752_v39  ;;  %4482 = vmatpush3.msra.mxu0 %v6887_v0 }
 0x948   :  { %2385 = vmatprep.subr.mxu1 %v6758_v41  ;;  %4483 = vmatprep.subr.mxu0 %v7968_v17 }
 0x949   :  { %2386 = vmatpush1.msra.mxu1 %v6764_v42  ;;  %4484 = vmatpush3.msra.mxu0 %v6894_v60 }
 0x94a   :  { %2387 = vmatprep.subr.mxu1 %v6770_v44  ;;  %4485 = vmatprep.subr.mxu0 %v7968_v17 }
 0x94b   :  { %2388 = vmatpush1.msra.mxu1 %v6776_v45  ;;  %4486 = vmatpush3.msra.mxu0 %v6901_v62 }
 0x94c   :  { %2389 = vmatprep.subr.mxu1 %v6782_v27  ;;  %4487 = vmatprep.subr.mxu0 %v7968_v17 }
 0x94d   :  { %2390 = vmatpush1.msra.mxu1 %v6788_v46  ;;  %4488 = vmatpush3.msra.mxu0 %v6908_v16 }
 0x94e   :  { %2391 = vmatprep.subr.mxu1 %v6794_v47  ;;  %4489 = vmatprep.subr.mxu0 %v7968_v17 }
 0x94f   :  { %2392 = vmatpush1.msra.mxu1 %v6800_v48  ;;  %4490 = vmatpush3.msra.mxu0 %v8026_v3 }
 0x950   :  { %2393 = vmatprep.subr.mxu1 %v8027_v25  ;;  %4491 = vmatprep.subr.mxu0 %v7968_v17 }
 0x951   :  { %2394 = vmatpush1.msra.mxu1 %v8028_v4  ;;  %2427 = vmatprep.mubr.f32.mxu1 %v7968_v17 }
 0x952   :  { %4492 = vmatpush3.msra.mxu0 %v8029_v50  ;;  %4493 = vmatprep.mubr.msk.f32.mxu0 %vm5008_vm8, %v7968_v17  ;;  %v7057_v50 = vrot.slane %v1910_v37, %v8055_v15 }
 0x953   :  { %2526 = vmatprep.subr.mxu1 %v8030_v58  ;;  %4496 = vmatprep.subr.mxu0 %v7968_v17 }
 0x954   :  { %8056 = vst [vmem:[#allocation8_spill] sm:$0xff] %v7057_v50 }
 0x9ee   :  { %v7046_v40 = vpop.f32.mrf.mxu1  ;;  %v7048_v20 = vpop.f32.mrf.mxu0 }
 0x9ef   :  { %8051 = vst [vmem:[#allocation12_spill] sm:$0xff] %v7046_v40  ;;  %8052 = vst [vmem:[#allocation28_spill] sm:$0xff] %v7048_v20  ;;  %v1996_v40 = vadd.f32 %v1995_v12, %v7057_v50 }
 0x9f0   :  { %v7050_v21 = vpop.f32.mrf.mxu1  ;;  %v7052_v2 = vpop.f32.mrf.mxu0 }
 0x9f1   :  { %8053 = vst [vmem:[#allocation29_spill] sm:$0xff] %v7050_v21  ;;  %8054 = vst [vmem:[#allocation19_spill] sm:$0xff] %v7052_v2 }
 0x9f2   :  { %v2260_v24 = vpop.f32.mrf.mxu1  ;;  %v2331_v58 = vpop.f32.mrf.mxu0 }
 0x9f3   :  { %v2335_v1 = vadd.f32 %v2260_v24, %v1994_v13  ;;  %v8057_v24 = vsub.s32 2, %v8048_v63  ;;  %v8061_v63 = vld [vmem:[#allocation18_spill] sm:$0xff] }
 0x9f4   :  { %v4460_v4 = vpop.f32.mrf.mxu0  ;;  %v2262_v25 = vpop.f32.mrf.mxu1 }
 0x9f5   :  { %v3635_v56 = vmul.f32 -1.442695, %v2335_v1  ;;  %v2342_v20 = vadd.f32 %v2262_v25, %v1996_v40  ;;  %v2355_v4 = vadd.f32 %v7063_v61, %v2331_v58  ;;  %v7068_v13 = vrot.slane %v1910_v37, %v8057_v24  ;;  %v8058_v58 = vld [vmem:[#allocation7_spill] sm:$0xff]  ;;  %v8059_v37 = vld [vmem:[#allocation4_spill] sm:$0xff] }
 0x9f7   :  { %4827 = vpow2.f32 %v3635_v56  ;;  %v3636_v3 = vmul.f32 -1.442695, %v2342_v20  ;;  %v2107_v25 = vadd.f32 %v2106_v43, %v7068_v13  ;;  %v8060_v43 = vld [vmem:[#allocation5_spill] sm:$0xff] }
 0x9f9   :  { %4829 = vpow2.f32 %v3636_v3 }
 0xa04   :  { %v4828_v21 = vpop.eup %4827 }
 0xa05   :  { %v2339_v2 = vadd.f32 1.0, %v4828_v21 }
 0xa06   :  { %v4830_v34 = vpop.eup %4829 }
 0xa07   :  { %4831 = vrcp.f32 %v2339_v2  ;;  %v2346_v15 = vadd.f32 1.0, %v4830_v34  ;;  %v8062_v34 = vld [vmem:[#allocation13_spill] sm:$0xff] }
 0xa09   :  { %4833 = vrcp.f32 %v2346_v15  ;;  %v8063_v15 = vld [vmem:[#allocation10_spill] sm:$0xff] }
 0xa14   :  { %v4832_v12 = vpop.eup %4831 }
 0xa15   :  { %v2356_v3 = vmul.f32 %v4832_v12, %v2355_v4  ;;  %v8064_v4 = vld [vmem:[#allocation20_spill] sm:$0xff] }
 0xa16   :  { %v4834_v2 = vpop.eup %4833  ;;  %v2000_v24 = vadd.f32 %v8064_v4, %v8063_v15 }
 0xa17   :  { %v2357_v21 = vadd.f32 %v2356_v3, %v2107_v25  ;;  %v2359_v1 = vsub.f32 1.0, %v4834_v2  ;;  %v2361_v56 = vmul.f32 0.0, %v4834_v2 }
 0xa19   :  { %4835 = vtanh.f32 %v2357_v21 }
 0xa26   :  { %v4836_v40 = vpop.eup %4835 }
 0xa27   :  { %v2360_v20 = vmul.f32 %v4836_v40, %v2359_v1  ;;  %v8065_v40 = vld [vmem:[#allocation8_spill] sm:$0xff] }
 0xa29   :  { %v7071_v50 = vadd.f32 %v2361_v56, %v2360_v20  ;;  %v8066_v20 = vld [vmem:[#allocation11_spill] sm:$0xff] }
 0xa2a   :  { %v2002_v56 = vadd.f32 %v8066_v20, %v8065_v40 }
 0xa2b   :  { %2428 = vmatmul.mubr.f32.vlgmr.msra.gmra.mxu1 %v7071_v50  ;;  %4494 = vmatmul.mubr.f32.vlgmr.msra.gmra.mxu0 %v7071_v50 }
 0xa2c   :  { %2527 = vmatpush1.msra.mxu1 %v6632_v23  ;;  %4497 = vmatpush3.msra.mxu0 %v6816_v59 }
 0xa2d   :  { %2528 = vmatprep.subr.mxu1 %v6638_v57  ;;  %4498 = vmatprep.subr.mxu0 %v7968_v17 }
 0xa2e   :  { %2529 = vmatpush1.msra.mxu1 %v6644_v28  ;;  %4499 = vmatpush3.msra.mxu0 %v6823_v29 }
 0xa2f   :  { %2530 = vmatprep.subr.mxu1 %v6650_v5  ;;  %4500 = vmatprep.subr.mxu0 %v7968_v17 }
 0xa30   :  { %2531 = vmatpush1.msra.mxu1 %v6656_v14  ;;  %4501 = vmatpush3.msra.mxu0 %v6830_v49 }
 0xa31   :  { %2532 = vmatprep.subr.mxu1 %v6662_v6  ;;  %4502 = vmatprep.subr.mxu0 %v7968_v17 }
 0xa32   :  { %2533 = vmatpush1.msra.mxu1 %v6668_v18  ;;  %4503 = vmatpush3.msra.mxu0 %v6838_v51 }
 0xa33   :  { %2534 = vmatprep.subr.mxu1 %v6674_v7  ;;  %4504 = vmatprep.subr.mxu0 %v7968_v17 }
 0xa34   :  { %2535 = vmatpush1.msra.mxu1 %v6680_v31  ;;  %4505 = vmatpush3.msra.mxu0 %v6845_v52 }
 0xa35   :  { %2536 = vmatprep.subr.mxu1 %v6686_v8  ;;  %4506 = vmatprep.subr.mxu0 %v7968_v17 }
 0xa36   :  { %2537 = vmatpush1.msra.mxu1 %v6692_v9  ;;  %4507 = vmatpush3.msra.mxu0 %v6852_v53 }
 0xa37   :  { %2538 = vmatprep.subr.mxu1 %v6698_v26  ;;  %4508 = vmatprep.subr.mxu0 %v7968_v17 }
 0xa38   :  { %2539 = vmatpush1.msra.mxu1 %v6704_v10  ;;  %4509 = vmatpush3.msra.mxu0 %v6859_v54 }
 0xa39   :  { %2540 = vmatprep.subr.mxu1 %v6710_v30  ;;  %4510 = vmatprep.subr.mxu0 %v7968_v17 }
 0xa3a   :  { %2541 = vmatpush1.msra.mxu1 %v6716_v11  ;;  %4511 = vmatpush3.msra.mxu0 %v6866_v55 }
 0xa3b   :  { %2542 = vmatprep.subr.mxu1 %v6722_v32  ;;  %4512 = vmatprep.subr.mxu0 %v7968_v17 }
 0xa3c   :  { %2543 = vmatpush1.msra.mxu1 %v6728_v33  ;;  %4513 = vmatpush3.msra.mxu0 %v6873_v19 }
 0xa3d   :  { %2544 = vmatprep.subr.mxu1 %v6734_v35  ;;  %4514 = vmatprep.subr.mxu0 %v7968_v17 }
 0xa3e   :  { %2545 = vmatpush1.msra.mxu1 %v6740_v36  ;;  %4515 = vmatpush3.msra.mxu0 %v6880_v22 }
 0xa3f   :  { %2546 = vmatprep.subr.mxu1 %v6746_v38  ;;  %4516 = vmatprep.subr.mxu0 %v7968_v17 }
 0xa40   :  { %2547 = vmatpush1.msra.mxu1 %v6752_v39  ;;  %4517 = vmatpush3.msra.mxu0 %v6887_v0 }
 0xa41   :  { %2548 = vmatprep.subr.mxu1 %v6758_v41  ;;  %4518 = vmatprep.subr.mxu0 %v7968_v17 }
 0xa42   :  { %2549 = vmatpush1.msra.mxu1 %v6764_v42  ;;  %4519 = vmatpush3.msra.mxu0 %v6894_v60 }
 0xa43   :  { %2550 = vmatprep.subr.mxu1 %v6770_v44  ;;  %4520 = vmatprep.subr.mxu0 %v7968_v17 }
 0xa44   :  { %2551 = vmatpush1.msra.mxu1 %v6776_v45  ;;  %4521 = vmatpush3.msra.mxu0 %v6901_v62 }
 0xa45   :  { %2552 = vmatprep.subr.mxu1 %v6782_v27  ;;  %4522 = vmatprep.subr.mxu0 %v7968_v17 }
 0xa46   :  { %2553 = vmatpush1.msra.mxu1 %v6788_v46  ;;  %4523 = vmatpush3.msra.mxu0 %v6908_v16 }
 0xa47   :  { %2554 = vmatprep.subr.mxu1 %v6794_v47  ;;  %4524 = vmatprep.subr.mxu0 %v7968_v17 }
 0xa48   :  { %2555 = vmatpush1.msra.mxu1 %v6800_v48  ;;  %4525 = vmatpush3.msra.mxu0 %v8058_v58 }
 0xa49   :  { %2556 = vmatprep.subr.mxu1 %v8059_v37  ;;  %4526 = vmatprep.subr.mxu0 %v7968_v17 }
 0xa4a   :  { %2557 = vmatpush1.msra.mxu1 %v8060_v43  ;;  %2590 = vmatprep.mubr.f32.mxu1 %v7968_v17 }
 0xa4b   :  { %4527 = vmatpush3.msra.mxu0 %v8061_v63  ;;  %4528 = vmatprep.mubr.msk.f32.mxu0 %vm5008_vm8, %v7968_v17 }
 0xa4c   :  { %2689 = vmatprep.subr.mxu1 %v8062_v34  ;;  %4531 = vmatprep.subr.mxu0 %v7968_v17 }
 0xaeb   :  { %v2429_v12 = vpop.f32.mrf.mxu1  ;;  %v2500_v25 = vpop.f32.mrf.mxu0 }
 0xaec   :  { %v2504_v3 = vadd.f32 %v2429_v12, %v2000_v24  ;;  %v2518_v4 = vadd.f32 %v7063_v61, %v2500_v25  ;;  %v8067_v24 = vld [vmem:[#allocation25_spill] sm:$0xff] }
 0xaed   :  { %v4495_v21 = vpop.f32.mrf.mxu0  ;;  %v2431_v1 = vpop.f32.mrf.mxu1  ;;  %v2112_v12 = vadd.f32 %v8067_v24, %v7068_v13  ;;  %v8073_v25 = vld [vmem:[#allocation13_spill] sm:$0xff] }
 0xaee   :  { %v3638_v2 = vmul.f32 -1.442695, %v2504_v3  ;;  %v2511_v63 = vadd.f32 %v2431_v1, %v2002_v56  ;;  %v8074_v56 = vld [vmem:[#allocation10_spill] sm:$0xff] }
 0xaf0   :  { %4837 = vpow2.f32 %v3638_v2  ;;  %v3639_v43 = vmul.f32 -1.442695, %v2511_v63 }
 0xaf2   :  { %4839 = vpow2.f32 %v3639_v43 }
 0xafd   :  { %v4838_v37 = vpop.eup %4837 }
 0xafe   :  { %v2508_v34 = vadd.f32 1.0, %v4838_v37 }
 0xaff   :  { %v4840_v58 = vpop.eup %4839 }
 0xb00   :  { %4841 = vrcp.f32 %v2508_v34  ;;  %v2515_v48 = vadd.f32 1.0, %v4840_v58  ;;  %v8070_v58 = vld [vmem:[#allocation4_spill] sm:$0xff]  ;;  %v8071_v34 = vld [vmem:[#allocation5_spill] sm:$0xff] }
 0xb02   :  { %4843 = vrcp.f32 %v2515_v48  ;;  %v8068_v48 = vld [vmem:[#allocation6_spill] sm:$0xff] }
 0xb0d   :  { %v4842_v15 = vpop.eup %4841 }
 0xb0e   :  { %v2519_v3 = vmul.f32 %v4842_v15, %v2518_v4  ;;  %v8072_v15 = vld [vmem:[#allocation18_spill] sm:$0xff] }
 0xb0f   :  { %v4844_v20 = vpop.eup %4843  ;;  %v8075_v4 = vld [vmem:[#allocation22_spill] sm:$0xff] }
 0xb10   :  { %v2520_v21 = vadd.f32 %v2519_v3, %v2112_v12  ;;  %v2522_v2 = vsub.f32 1.0, %v4844_v20  ;;  %v2524_v43 = vmul.f32 %v4844_v20, %v7071_v50  ;;  %v8069_v50 = vld [vmem:[#allocation7_spill] sm:$0xff]  ;;  %v2006_v24 = vadd.f32 %v8075_v4, %v8074_v56 }
 0xb12   :  { %4845 = vtanh.f32 %v2520_v21 }
 0xb1f   :  { %v4846_v1 = vpop.eup %4845 }
 0xb20   :  { %v2523_v63 = vmul.f32 %v4846_v1, %v2522_v2 }
 0xb22   :  { %v7150_v37 = vadd.f32 %v2524_v43, %v2523_v63  ;;  %v8076_v63 = vld [vmem:[#allocation23_spill] sm:$0xff] }
 0xb23   :  { %v2008_v43 = vadd.f32 %v8076_v63, %v8065_v40 }
 0xb24   :  { %2591 = vmatmul.mubr.f32.vlgmr.msra.gmra.mxu1 %v7150_v37  ;;  %4529 = vmatmul.mubr.f32.vlgmr.msra.gmra.mxu0 %v7150_v37 }
 0xb25   :  { %2690 = vmatpush1.msra.mxu1 %v6632_v23  ;;  %4532 = vmatpush3.msra.mxu0 %v6816_v59 }
 0xb26   :  { %2691 = vmatprep.subr.mxu1 %v6638_v57  ;;  %4533 = vmatprep.subr.mxu0 %v7968_v17 }
 0xb27   :  { %2692 = vmatpush1.msra.mxu1 %v6644_v28  ;;  %4534 = vmatpush3.msra.mxu0 %v6823_v29 }
 0xb28   :  { %2693 = vmatprep.subr.mxu1 %v6650_v5  ;;  %4535 = vmatprep.subr.mxu0 %v7968_v17 }
 0xb29   :  { %2694 = vmatpush1.msra.mxu1 %v6656_v14  ;;  %4536 = vmatpush3.msra.mxu0 %v6830_v49 }
 0xb2a   :  { %2695 = vmatprep.subr.mxu1 %v6662_v6  ;;  %4537 = vmatprep.subr.mxu0 %v7968_v17 }
 0xb2b   :  { %2696 = vmatpush1.msra.mxu1 %v6668_v18  ;;  %4538 = vmatpush3.msra.mxu0 %v6838_v51 }
 0xb2c   :  { %2697 = vmatprep.subr.mxu1 %v6674_v7  ;;  %4539 = vmatprep.subr.mxu0 %v7968_v17 }
 0xb2d   :  { %2698 = vmatpush1.msra.mxu1 %v6680_v31  ;;  %4540 = vmatpush3.msra.mxu0 %v6845_v52 }
 0xb2e   :  { %2699 = vmatprep.subr.mxu1 %v6686_v8  ;;  %4541 = vmatprep.subr.mxu0 %v7968_v17 }
 0xb2f   :  { %2700 = vmatpush1.msra.mxu1 %v6692_v9  ;;  %4542 = vmatpush3.msra.mxu0 %v6852_v53 }
 0xb30   :  { %2701 = vmatprep.subr.mxu1 %v6698_v26  ;;  %4543 = vmatprep.subr.mxu0 %v7968_v17 }
 0xb31   :  { %2702 = vmatpush1.msra.mxu1 %v6704_v10  ;;  %4544 = vmatpush3.msra.mxu0 %v6859_v54 }
 0xb32   :  { %2703 = vmatprep.subr.mxu1 %v6710_v30  ;;  %4545 = vmatprep.subr.mxu0 %v7968_v17 }
 0xb33   :  { %2704 = vmatpush1.msra.mxu1 %v6716_v11  ;;  %4546 = vmatpush3.msra.mxu0 %v6866_v55 }
 0xb34   :  { %2705 = vmatprep.subr.mxu1 %v6722_v32  ;;  %4547 = vmatprep.subr.mxu0 %v7968_v17 }
 0xb35   :  { %2706 = vmatpush1.msra.mxu1 %v6728_v33  ;;  %4548 = vmatpush3.msra.mxu0 %v6873_v19 }
 0xb36   :  { %2707 = vmatprep.subr.mxu1 %v6734_v35  ;;  %4549 = vmatprep.subr.mxu0 %v7968_v17 }
 0xb37   :  { %2708 = vmatpush1.msra.mxu1 %v6740_v36  ;;  %4550 = vmatpush3.msra.mxu0 %v6880_v22 }
 0xb38   :  { %2709 = vmatprep.subr.mxu1 %v6746_v38  ;;  %4551 = vmatprep.subr.mxu0 %v7968_v17 }
 0xb39   :  { %2710 = vmatpush1.msra.mxu1 %v6752_v39  ;;  %4552 = vmatpush3.msra.mxu0 %v6887_v0 }
 0xb3a   :  { %2711 = vmatprep.subr.mxu1 %v6758_v41  ;;  %4553 = vmatprep.subr.mxu0 %v7968_v17 }
 0xb3b   :  { %2712 = vmatpush1.msra.mxu1 %v6764_v42  ;;  %4554 = vmatpush3.msra.mxu0 %v6894_v60 }
 0xb3c   :  { %2713 = vmatprep.subr.mxu1 %v6770_v44  ;;  %4555 = vmatprep.subr.mxu0 %v7968_v17 }
 0xb3d   :  { %2714 = vmatpush1.msra.mxu1 %v6776_v45  ;;  %4556 = vmatpush3.msra.mxu0 %v6901_v62 }
 0xb3e   :  { %2715 = vmatprep.subr.mxu1 %v6782_v27  ;;  %4557 = vmatprep.subr.mxu0 %v7968_v17 }
 0xb3f   :  { %2716 = vmatpush1.msra.mxu1 %v6788_v46  ;;  %4558 = vmatpush3.msra.mxu0 %v6908_v16 }
 0xb40   :  { %2717 = vmatprep.subr.mxu1 %v6794_v47  ;;  %4559 = vmatprep.subr.mxu0 %v7968_v17 }
 0xb41   :  { %2718 = vmatpush1.msra.mxu1 %v8068_v48  ;;  %4560 = vmatpush3.msra.mxu0 %v8069_v50 }
 0xb42   :  { %2719 = vmatprep.subr.mxu1 %v8070_v58  ;;  %4561 = vmatprep.subr.mxu0 %v7968_v17 }
 0xb43   :  { %2720 = vmatpush1.msra.mxu1 %v8071_v34  ;;  %2753 = vmatprep.mubr.f32.mxu1 %v7968_v17 }
 0xb44   :  { %4562 = vmatpush3.msra.mxu0 %v8072_v15  ;;  %4563 = vmatprep.mubr.msk.f32.mxu0 %vm5008_vm8, %v7968_v17 }
 0xb45   :  { %2852 = vmatprep.subr.mxu1 %v8073_v25  ;;  %4566 = vmatprep.subr.mxu0 %v7968_v17 }
 0xbe4   :  { %v2592_v12 = vpop.f32.mrf.mxu1  ;;  %v2663_v3 = vpop.f32.mrf.mxu0 }
 0xbe5   :  { %v2667_v21 = vadd.f32 %v2592_v12, %v2006_v24  ;;  %v2681_v4 = vadd.f32 %v7063_v61, %v2663_v3  ;;  %v8077_v24 = vld [vmem:[#allocation16_spill] sm:$0xff] }
 0xbe6   :  { %v4530_v20 = vpop.f32.mrf.mxu0  ;;  %v2594_v1 = vpop.f32.mrf.mxu1  ;;  %v2117_v12 = vadd.f32 %v8077_v24, %v7068_v13  ;;  %v7390_v3 = vld [vmem:[%s7879_s7 + $0xf0] sm:$0xff]  ;;  %v7421_v24 = vld [vmem:[%s7879_s7 + $0xc8] sm:$0xff] }
 0xbe7   :  { %v3640_v2 = vmul.f32 -1.442695, %v2667_v21  ;;  %v2674_v15 = vadd.f32 %v2594_v1, %v2008_v43  ;;  %v7402_v43 = vld [vmem:[%s7879_s7 + $0xe0] sm:$0xff] }
 0xbe9   :  { %4847 = vpow2.f32 %v3640_v2  ;;  %v3641_v34 = vmul.f32 -1.442695, %v2674_v15 }
 0xbeb   :  { %4849 = vpow2.f32 %v3641_v34 }
 0xbf6   :  { %v4848_v58 = vpop.eup %4847 }
 0xbf7   :  { %v2671_v25 = vadd.f32 1.0, %v4848_v58 }
 0xbf8   :  { %v4850_v50 = vpop.eup %4849 }
 0xbf9   :  { %4851 = vrcp.f32 %v2671_v25  ;;  %v2678_v48 = vadd.f32 1.0, %v4850_v50  ;;  %v7362_v50 = vld [vmem:[%s7879_s7 + $0x120] sm:$0xff]  ;;  %v7409_v25 = vld [vmem:[%s7879_s7 + $0xd8] sm:$0xff] }
 0xbfb   :  { %4853 = vrcp.f32 %v2678_v48  ;;  %v7348_v48 = vld [vmem:[%s7879_s7 + $0x138] sm:$0xff] }
 0xc06   :  { %v4852_v56 = vpop.eup %4851 }
 0xc07   :  { %v2682_v21 = vmul.f32 %v4852_v56, %v2681_v4  ;;  %v7376_v56 = vld [vmem:[%s7879_s7 + $0x108] sm:$0xff] }
 0xc08   :  { %v4854_v63 = vpop.eup %4853  ;;  %v7415_v4 = vld [vmem:[%s7879_s7 + $0xe8] sm:$0xff] }
 0xc09   :  { %v2683_v20 = vadd.f32 %v2682_v21, %v2117_v12  ;;  %v2685_v2 = vsub.f32 1.0, %v4854_v63  ;;  %v2687_v34 = vmul.f32 %v4854_v63, %v7150_v37  ;;  %v7334_v37 = vld [vmem:[%s7879_s7 + $0x150] sm:$0xff]  ;;  %v7428_v12 = vld [vmem:[%s7879_s7 + $0xc0] sm:$0xff]  ;;  %v7447_v63 = vld [vmem:[%s7879_s7 + $0xa8] sm:$0xff] }
 0xc0a   :  { %v7434_v21 = vld [vmem:[%s7879_s7 + $0xd0] sm:$0xff] }
 0xc0b   :  { %4855 = vtanh.f32 %v2683_v20  ;;  %v7440_v20 = vld [vmem:[%s7879_s7 + $0xb0] sm:$0xff] }
 0xc18   :  { %v4856_v1 = vpop.eup %4855 }
 0xc19   :  { %v2686_v15 = vmul.f32 %v4856_v1, %v2685_v2  ;;  %v7453_v2 = vld [vmem:[%s7879_s7 + $0xb8] sm:$0xff] }
 0xc1a   :  { %v7459_v1 = vld [vmem:[%s7879_s7 + $0x98] sm:$0xff] }
 0xc1b   :  { %v7229_v58 = vadd.f32 %v2687_v34, %v2686_v15  ;;  %v7466_v15 = vld [vmem:[%s7879_s7 + $0x90] sm:$0xff]  ;;  %v7472_v34 = vld [vmem:[%s7879_s7 + $0xa0] sm:$0xff] }
 0xc1d   :  { %2754 = vmatmul.mubr.f32.vlgmr.msra.gmra.mxu1 %v7229_v58  ;;  %4564 = vmatmul.mubr.f32.vlgmr.msra.gmra.mxu0 %v7229_v58 }
 0xc1e   :  { %2853 = vmatpush1.msra.mxu1 %v6632_v23  ;;  %4567 = vmatpush3.msra.mxu0 %v6816_v59  ;;  %v8078_v23 = vld [vmem:[#allocation6_spill] sm:$0xff] }
 0xc1f   :  { %2854 = vmatprep.subr.mxu1 %v6638_v57  ;;  %4568 = vmatprep.subr.mxu0 %v7968_v17  ;;  %v8079_v57 = vld [vmem:[#allocation7_spill] sm:$0xff] }
 0xc20   :  { %2855 = vmatpush1.msra.mxu1 %v6644_v28  ;;  %4569 = vmatpush3.msra.mxu0 %v6823_v29  ;;  %v8080_v28 = vld [vmem:[#allocation4_spill] sm:$0xff] }
 0xc21   :  { %2856 = vmatprep.subr.mxu1 %v6650_v5  ;;  %4570 = vmatprep.subr.mxu0 %v7968_v17  ;;  %v8081_v5 = vld [vmem:[#allocation5_spill] sm:$0xff] }
 0xc22   :  { %2857 = vmatpush1.msra.mxu1 %v6656_v14  ;;  %4571 = vmatpush3.msra.mxu0 %v6830_v49  ;;  %v8082_v14 = vld [vmem:[#allocation18_spill] sm:$0xff] }
 0xc23   :  { %2858 = vmatprep.subr.mxu1 %v6662_v6  ;;  %4572 = vmatprep.subr.mxu0 %v7968_v17  ;;  %v7301_v6 = vld [vmem:[%s7879_s7 + $0x170] sm:$0xff] }
 0xc24   :  { %2859 = vmatpush1.msra.mxu1 %v6668_v18  ;;  %4573 = vmatpush3.msra.mxu0 %v6838_v51  ;;  %8083 = vst [vmem:[#allocation20_spill] sm:$0xff] %v7301_v6  ;;  %v8084_v18 = vld [vmem:[#allocation10_spill] sm:$0xff] }
 0xc25   :  { %2860 = vmatprep.subr.mxu1 %v6674_v7  ;;  %4574 = vmatprep.subr.mxu0 %v7968_v17  ;;  %v8085_v7 = vld [vmem:[#allocation17_spill] sm:$0xff] }
 0xc26   :  { %2861 = vmatpush1.msra.mxu1 %v6680_v31  ;;  %4575 = vmatpush3.msra.mxu0 %v6845_v52  ;;  %v2012_v31 = vadd.f32 %v8085_v7, %v8084_v18  ;;  %v7516_v7 = vld [vmem:[%s7879_s7 + $0x50] sm:$0xff] }
 0xc27   :  { %2862 = vmatprep.subr.mxu1 %v6686_v8  ;;  %4576 = vmatprep.subr.mxu0 %v7968_v17 }
 0xc28   :  { %2863 = vmatpush1.msra.mxu1 %v6692_v9  ;;  %4577 = vmatpush3.msra.mxu0 %v6852_v53 }
 0xc29   :  { %2864 = vmatprep.subr.mxu1 %v6698_v26  ;;  %4578 = vmatprep.subr.mxu0 %v7968_v17 }
 0xc2a   :  { %2865 = vmatpush1.msra.mxu1 %v6704_v10  ;;  %4579 = vmatpush3.msra.mxu0 %v6859_v54 }
 0xc2b   :  { %2866 = vmatprep.subr.mxu1 %v6710_v30  ;;  %4580 = vmatprep.subr.mxu0 %v7968_v17 }
 0xc2c   :  { %2867 = vmatpush1.msra.mxu1 %v6716_v11  ;;  %4581 = vmatpush3.msra.mxu0 %v6866_v55 }
 0xc2d   :  { %2868 = vmatprep.subr.mxu1 %v6722_v32  ;;  %4582 = vmatprep.subr.mxu0 %v7968_v17  ;;  %v8086_v32 = vld [vmem:[#allocation24_spill] sm:$0xff] }
 0xc2e   :  { %2869 = vmatpush1.msra.mxu1 %v6728_v33  ;;  %4583 = vmatpush3.msra.mxu0 %v6873_v19  ;;  %v2014_v33 = vadd.f32 %v8086_v32, %v8065_v40  ;;  %v7567_v32 = vld [vmem:[%s7879_s7 + $0x28] sm:$0xff] }
 0xc2f   :  { %2870 = vmatprep.subr.mxu1 %v6734_v35  ;;  %4584 = vmatprep.subr.mxu0 %v7968_v17  ;;  %8089 = vst [vmem:[#allocation11_spill] sm:$0xff] %v7567_v32 }
 0xc30   :  { %2871 = vmatpush1.msra.mxu1 %v6740_v36  ;;  %4585 = vmatpush3.msra.mxu0 %v6880_v22 }
 0xc31   :  { %2872 = vmatprep.subr.mxu1 %v6746_v38  ;;  %4586 = vmatprep.subr.mxu0 %v7968_v17 }
 0xc32   :  { %2873 = vmatpush1.msra.mxu1 %v6752_v39  ;;  %4587 = vmatpush3.msra.mxu0 %v6887_v0 }
 0xc33   :  { %2874 = vmatprep.subr.mxu1 %v6758_v41  ;;  %4588 = vmatprep.subr.mxu0 %v7968_v17 }
 0xc34   :  { %2875 = vmatpush1.msra.mxu1 %v6764_v42  ;;  %4589 = vmatpush3.msra.mxu0 %v6894_v60 }
 0xc35   :  { %2876 = vmatprep.subr.mxu1 %v6770_v44  ;;  %4590 = vmatprep.subr.mxu0 %v7968_v17 }
 0xc36   :  { %2877 = vmatpush1.msra.mxu1 %v6776_v45  ;;  %4591 = vmatpush3.msra.mxu0 %v6901_v62  ;;  %v7320_v62 = vld [vmem:[%s7879_s7 + $0x168] sm:$0xff] }
 0xc37   :  { %2878 = vmatprep.subr.mxu1 %v6782_v27  ;;  %4592 = vmatprep.subr.mxu0 %v7968_v17  ;;  %v8087_v27 = vld [vmem:[#allocation9_spill] sm:$0xff] }
 0xc38   :  { %2879 = vmatpush1.msra.mxu1 %v6788_v46  ;;  %4593 = vmatpush3.msra.mxu0 %v6908_v16  ;;  %v2122_v46 = vadd.f32 %v8087_v27, %v7068_v13  ;;  %v7327_v16 = vld [vmem:[%s7879_s7 + $0x158] sm:$0xff] }
 0xc39   :  { %2880 = vmatprep.subr.mxu1 %v6794_v47  ;;  %4594 = vmatprep.subr.mxu0 %v7968_v17 }
 0xc3a   :  { %2881 = vmatpush1.msra.mxu1 %v8078_v23  ;;  %4595 = vmatpush3.msra.mxu0 %v8079_v57  ;;  %v7485_v23 = vld [vmem:[%s7879_s7 + $0x78] sm:$0xff]  ;;  %v7491_v57 = vld [vmem:[%s7879_s7 + $0x88] sm:$0xff] }
 0xc3b   :  { %2882 = vmatprep.subr.mxu1 %v8080_v28  ;;  %4596 = vmatprep.subr.mxu0 %v7968_v17  ;;  %v7497_v28 = vld [vmem:[%s7879_s7 + $0x68] sm:$0xff] }
 0xc3c   :  { %2883 = vmatpush1.msra.mxu1 %v8081_v5  ;;  %2916 = vmatprep.mubr.f32.mxu1 %v7968_v17  ;;  %v7504_v5 = vld [vmem:[%s7879_s7 + $0x60] sm:$0xff] }
 0xc3d   :  { %4597 = vmatpush3.msra.mxu0 %v8082_v14  ;;  %4598 = vmatprep.mubr.msk.f32.mxu0 %vm5008_vm8, %v7968_v17  ;;  %v7510_v14 = vld [vmem:[%s7879_s7 + $0x70] sm:$0xff] }
 0xc3e   :  { %3015 = vmatprep.subr.mxu1 %v7301_v6  ;;  %4601 = vmatprep.subr.mxu0 %v7968_v17 }
 0xcdd   :  { %v2755_v8 = vpop.f32.mrf.mxu1  ;;  %v2826_v9 = vpop.f32.mrf.mxu0 }
 0xcde   :  { %v2830_v26 = vadd.f32 %v2755_v8, %v2012_v31  ;;  %v2844_v44 = vadd.f32 %v7063_v61, %v2826_v9  ;;  %v7523_v31 = vld [vmem:[%s7879_s7 + $0x48] sm:$0xff]  ;;  %v7529_v8 = vld [vmem:[%s7879_s7 + $0x58] sm:$0xff] }
 0xcdf   :  { %v4565_v10 = vpop.f32.mrf.mxu0  ;;  %v2757_v11 = vpop.f32.mrf.mxu1  ;;  %v7535_v9 = vld [vmem:[%s7879_s7 + $0x38] sm:$0xff] }
 0xce0   :  { %v3642_v30 = vmul.f32 -1.442695, %v2830_v26  ;;  %v2837_v35 = vadd.f32 %v2757_v11, %v2014_v33  ;;  %v7542_v26 = vld [vmem:[%s7879_s7 + $0x30] sm:$0xff]  ;;  %v7548_v10 = vld [vmem:[%s7879_s7 + $0x40] sm:$0xff]  ;;  %v7561_v11 = vld [vmem:[%s7879_s7 + $0x18] sm:$0xff] }
 0xce1   :  { %8088 = vst [vmem:[#allocation8_spill] sm:$0xff] %v7561_v11  ;;  %v7573_v33 = vld [vmem:[%s7879_s7 + $0x8] sm:$0xff] }
 0xce2   :  { %4857 = vpow2.f32 %v3642_v30  ;;  %v3643_v36 = vmul.f32 -1.442695, %v2837_v35  ;;  %v7554_v30 = vld [vmem:[%s7879_s7 + $0x20] sm:$0xff]  ;;  %8090 = vst [vmem:[#allocation25_spill] sm:$0xff] %v7573_v33 }
 0xce3   :  { %v7580_v35 = vld [vmem:[%s7879_s7] sm:$0xff] }
 0xce4   :  { %4859 = vpow2.f32 %v3643_v36  ;;  %8091 = vst [vmem:[#allocation13_spill] sm:$0xff] %v7580_v35  ;;  %v7587_v36 = vld [vmem:[%s7879_s7 + $0x10] sm:$0xff] }
 0xce5   :  { %8092 = vst [vmem:[#allocation22_spill] sm:$0xff] %v7587_v36 }
 0xcef   :  { %v4858_v38 = vpop.eup %4857 }
 0xcf0   :  { %v2834_v39 = vadd.f32 1.0, %v4858_v38  ;;  %v8093_v38 = vld [vmem:[#allocation15_spill] sm:$0xff] }
 0xcf1   :  { %v4860_v41 = vpop.eup %4859 }
 0xcf2   :  { %4861 = vrcp.f32 %v2834_v39  ;;  %v2841_v42 = vadd.f32 1.0, %v4860_v41  ;;  %v2018_v39 = vadd.f32 %v8093_v38, %v8084_v18 }
 0xcf4   :  { %4863 = vrcp.f32 %v2841_v42 }
 0xcff   :  { %v4862_v45 = vpop.eup %4861 }
 0xd00   :  { %v2845_v47 = vmul.f32 %v4862_v45, %v2844_v44 }
 0xd01   :  { %v4864_v54 = vpop.eup %4863 }
 0xd02   :  { %v2846_v53 = vadd.f32 %v2845_v47, %v2122_v46  ;;  %v2848_v55 = vsub.f32 1.0, %v4864_v54  ;;  %v2850_v0 = vmul.f32 %v4864_v54, %v7229_v58  ;;  %v7478_v58 = vld [vmem:[%s7879_s7 + $0x80] sm:$0xff] }
 0xd03   :  { %v8094_v47 = vld [vmem:[#allocation14_spill] sm:$0xff] }
 0xd04   :  { %4865 = vtanh.f32 %v2846_v53  ;;  %v2020_v53 = vadd.f32 %v8094_v47, %v8065_v40 }
 0xd11   :  { %v4866_v19 = vpop.eup %4865 }
 0xd12   :  { %v2849_v22 = vmul.f32 %v4866_v19, %v2848_v55 }
 0xd14   :  { %v7313_v60 = vadd.f32 %v2850_v0, %v2849_v22 }
 0xd16   :  { %2917 = vmatmul.mubr.f32.vlgmr.msra.gmra.mxu1 %v7313_v60  ;;  %4599 = vmatmul.mubr.f32.vlgmr.msra.gmra.mxu0 %v7313_v60 }
 0xd17   :  { %3016 = vmatpush1.msra.mxu1 %v7320_v62  ;;  %4602 = vmatpush3.msra.mxu0 %v6816_v59  ;;  %v7341_v59 = vld [vmem:[%s7879_s7 + $0x140] sm:$0xff] }
 0xd18   :  { %3017 = vmatprep.subr.mxu1 %v7327_v16  ;;  %4603 = vmatprep.subr.mxu0 %v7968_v17 }
 0xd19   :  { %3018 = vmatpush1.msra.mxu1 %v7334_v37  ;;  %4604 = vmatpush3.msra.mxu0 %v6823_v29  ;;  %v7355_v29 = vld [vmem:[%s7879_s7 + $0x128] sm:$0xff] }
 0xd1a   :  { %3019 = vmatprep.subr.mxu1 %v7341_v59  ;;  %4605 = vmatprep.subr.mxu0 %v7968_v17 }
 0xd1b   :  { %3020 = vmatpush1.msra.mxu1 %v7348_v48  ;;  %4606 = vmatpush3.msra.mxu0 %v6830_v49  ;;  %v7369_v49 = vld [vmem:[%s7879_s7 + $0x110] sm:$0xff] }
 0xd1c   :  { %3021 = vmatprep.subr.mxu1 %v7355_v29  ;;  %4607 = vmatprep.subr.mxu0 %v7968_v17 }
 0xd1d   :  { %3022 = vmatpush1.msra.mxu1 %v7362_v50  ;;  %4608 = vmatpush3.msra.mxu0 %v6838_v51  ;;  %v7383_v51 = vld [vmem:[%s7879_s7 + $0xf8] sm:$0xff] }
 0xd1e   :  { %3023 = vmatprep.subr.mxu1 %v7369_v49  ;;  %4609 = vmatprep.subr.mxu0 %v7968_v17 }
 0xd1f   :  { %3024 = vmatpush1.msra.mxu1 %v7376_v56  ;;  %4610 = vmatpush3.msra.mxu0 %v6845_v52  ;;  %v7396_v52 = vld [vmem:[%s7879_s7 + $0x100] sm:$0xff] }
 0xd20   :  { %3025 = vmatprep.subr.mxu1 %v7383_v51  ;;  %4611 = vmatprep.subr.mxu0 %v7968_v17 }
 0xd21   :  { %3026 = vmatpush1.msra.mxu1 %v7390_v3  ;;  %4612 = vmatpush3.msra.mxu0 %v7396_v52 }
 0xd22   :  { %3027 = vmatprep.subr.mxu1 %v7402_v43  ;;  %4613 = vmatprep.subr.mxu0 %v7968_v17 }
 0xd23   :  { %3028 = vmatpush1.msra.mxu1 %v7409_v25  ;;  %4614 = vmatpush3.msra.mxu0 %v7415_v4 }
 0xd24   :  { %3029 = vmatprep.subr.mxu1 %v7421_v24  ;;  %4615 = vmatprep.subr.mxu0 %v7968_v17 }
 0xd25   :  { %3030 = vmatpush1.msra.mxu1 %v7428_v12  ;;  %4616 = vmatpush3.msra.mxu0 %v7434_v21 }
 0xd26   :  { %3031 = vmatprep.subr.mxu1 %v7440_v20  ;;  %4617 = vmatprep.subr.mxu0 %v7968_v17 }
 0xd27   :  { %3032 = vmatpush1.msra.mxu1 %v7447_v63  ;;  %4618 = vmatpush3.msra.mxu0 %v7453_v2 }
 0xd28   :  { %3033 = vmatprep.subr.mxu1 %v7459_v1  ;;  %4619 = vmatprep.subr.mxu0 %v7968_v17 }
 0xd29   :  { %3034 = vmatpush1.msra.mxu1 %v7466_v15  ;;  %4620 = vmatpush3.msra.mxu0 %v7472_v34 }
 0xd2a   :  { %3035 = vmatprep.subr.mxu1 %v7478_v58  ;;  %4621 = vmatprep.subr.mxu0 %v7968_v17 }
 0xd2b   :  { %3036 = vmatpush1.msra.mxu1 %v7485_v23  ;;  %4622 = vmatpush3.msra.mxu0 %v7491_v57 }
 0xd2c   :  { %3037 = vmatprep.subr.mxu1 %v7497_v28  ;;  %4623 = vmatprep.subr.mxu0 %v7968_v17 }
 0xd2d   :  { %3038 = vmatpush1.msra.mxu1 %v7504_v5  ;;  %4624 = vmatpush3.msra.mxu0 %v7510_v14 }
 0xd2e   :  { %3039 = vmatprep.subr.mxu1 %v7516_v7  ;;  %4625 = vmatprep.subr.mxu0 %v7968_v17 }
 0xd2f   :  { %3040 = vmatpush1.msra.mxu1 %v7523_v31  ;;  %4626 = vmatpush3.msra.mxu0 %v7529_v8 }
 0xd30   :  { %3041 = vmatprep.subr.mxu1 %v7535_v9  ;;  %4627 = vmatprep.subr.mxu0 %v7968_v17 }
 0xd31   :  { %3042 = vmatpush1.msra.mxu1 %v7542_v26  ;;  %4628 = vmatpush3.msra.mxu0 %v7548_v10 }
 0xd32   :  { %3043 = vmatprep.subr.mxu1 %v7554_v30  ;;  %4629 = vmatprep.subr.mxu0 %v7968_v17 }
 0xd33   :  { %3044 = vmatpush1.msra.mxu1 %v7561_v11  ;;  %4630 = vmatpush3.msra.mxu0 %v7567_v32 }
 0xd34   :  { %3045 = vmatprep.subr.mxu1 %v7573_v33  ;;  %4631 = vmatprep.subr.mxu0 %v7968_v17 }
 0xd35   :  { %3046 = vmatpush1.msra.mxu1 %v7580_v35  ;;  %3079 = vmatprep.mubr.f32.mxu1 %v7968_v17 }
 0xd36   :  { %4632 = vmatpush3.msra.mxu0 %v7587_v36  ;;  %4633 = vmatprep.mubr.msk.f32.mxu0 %vm5008_vm8, %v7968_v17 }
 0xd37   :  { %3178 = vmatprep.subr.mxu1 %v7301_v6  ;;  %4636 = vmatprep.subr.mxu0 %v7968_v17 }
 0xdd6   :  { %v2918_v41 = vpop.f32.mrf.mxu1  ;;  %v2989_v42 = vpop.f32.mrf.mxu0 }
 0xdd7   :  { %v2993_v44 = vadd.f32 %v2918_v41, %v2018_v39  ;;  %v3007_v38 = vadd.f32 %v7063_v61, %v2989_v42  ;;  %v8095_v39 = vld [vmem:[#allocation30_spill] sm:$0xff]  ;;  %v7637_v42 = vld [vmem:[%s7879_s7 + $0x130] sm:$0xff] }
 0xdd8   :  { %v4600_v45 = vpop.f32.mrf.mxu0  ;;  %v2920_v46 = vpop.f32.mrf.mxu1  ;;  %v2127_v41 = vadd.f32 %v8095_v39, %v7068_v13 }
 0xdd9   :  { %v3644_v27 = vmul.f32 -1.442695, %v2993_v44  ;;  %v3000_v54 = vadd.f32 %v2920_v46, %v2020_v53 }
 0xddb   :  { %4867 = vpow2.f32 %v3644_v27  ;;  %v3645_v55 = vmul.f32 -1.442695, %v3000_v54 }
 0xddd   :  { %4869 = vpow2.f32 %v3645_v55 }
 0xde8   :  { %v4868_v19 = vpop.eup %4867 }
 0xde9   :  { %v2997_v22 = vadd.f32 1.0, %v4868_v19  ;;  %v7646_v19 = vld [vmem:[%s7879_s7 + $0x118] sm:$0xff] }
 0xdea   :  { %v4870_v0 = vpop.eup %4869 }
 0xdeb   :  { %4871 = vrcp.f32 %v2997_v22  ;;  %v3004_v6 = vadd.f32 1.0, %v4870_v0  ;;  %v8096_v22 = vld [vmem:[#allocation20_spill] sm:$0xff]  ;;  %v8097_v0 = vld [vmem:[#allocation10_spill] sm:$0xff] }
 0xded   :  { %4873 = vrcp.f32 %v3004_v6  ;;  %v7610_v6 = vld [vmem:[%s7879_s7 + $0x178] sm:$0xff] }
 0xdf8   :  { %v4872_v18 = vpop.eup %4871 }
 0xdf9   :  { %v3008_v44 = vmul.f32 %v4872_v18, %v3007_v38  ;;  %v7619_v18 = vld [vmem:[%s7879_s7 + $0x160] sm:$0xff] }
 0xdfa   :  { %v4874_v47 = vpop.eup %4873  ;;  %v8098_v38 = vld [vmem:[#allocation2_spill] sm:$0xff] }
 0xdfb   :  { %v3009_v45 = vadd.f32 %v3008_v44, %v2127_v41  ;;  %v3011_v27 = vsub.f32 1.0, %v4874_v47  ;;  %v3013_v54 = vmul.f32 %v4874_v47, %v7313_v60  ;;  %v7628_v60 = vld [vmem:[%s7879_s7 + $0x148] sm:$0xff]  ;;  %v2024_v39 = vadd.f32 %v8098_v38, %v8097_v0 }
 0xdfd   :  { %4875 = vtanh.f32 %v3009_v45 }
 0xe0a   :  { %v4876_v46 = vpop.eup %4875 }
 0xe0b   :  { %v3012_v53 = vmul.f32 %v4876_v46, %v3011_v27 }
 0xe0d   :  { %v7602_v55 = vadd.f32 %v3013_v54, %v3012_v53  ;;  %v8099_v53 = vld [vmem:[#allocation26_spill] sm:$0xff] }
 0xe0e   :  { %v2026_v54 = vadd.f32 %v8099_v53, %v8065_v40 }
 0xe0f   :  { %3080 = vmatmul.mubr.f32.vlgmr.msra.gmra.mxu1 %v7602_v55  ;;  %4634 = vmatmul.mubr.f32.vlgmr.msra.gmra.mxu0 %v7602_v55 }
 0xe10   :  { %3179 = vmatpush1.msra.mxu1 %v7320_v62  ;;  %4637 = vmatpush3.msra.mxu0 %v7610_v6 }
 0xe11   :  { %3180 = vmatprep.subr.mxu1 %v7327_v16  ;;  %4638 = vmatprep.subr.mxu0 %v7968_v17 }
 0xe12   :  { %3181 = vmatpush1.msra.mxu1 %v7334_v37  ;;  %4639 = vmatpush3.msra.mxu0 %v7619_v18 }
 0xe13   :  { %3182 = vmatprep.subr.mxu1 %v7341_v59  ;;  %4640 = vmatprep.subr.mxu0 %v7968_v17 }
 0xe14   :  { %3183 = vmatpush1.msra.mxu1 %v7348_v48  ;;  %4641 = vmatpush3.msra.mxu0 %v7628_v60 }
 0xe15   :  { %3184 = vmatprep.subr.mxu1 %v7355_v29  ;;  %4642 = vmatprep.subr.mxu0 %v7968_v17 }
 0xe16   :  { %3185 = vmatpush1.msra.mxu1 %v7362_v50  ;;  %4643 = vmatpush3.msra.mxu0 %v7637_v42 }
 0xe17   :  { %3186 = vmatprep.subr.mxu1 %v7369_v49  ;;  %4644 = vmatprep.subr.mxu0 %v7968_v17 }
 0xe18   :  { %3187 = vmatpush1.msra.mxu1 %v7376_v56  ;;  %4645 = vmatpush3.msra.mxu0 %v7646_v19 }
 0xe19   :  { %3188 = vmatprep.subr.mxu1 %v7383_v51  ;;  %4646 = vmatprep.subr.mxu0 %v7968_v17 }
 0xe1a   :  { %3189 = vmatpush1.msra.mxu1 %v7390_v3  ;;  %4647 = vmatpush3.msra.mxu0 %v7396_v52 }
 0xe1b   :  { %3190 = vmatprep.subr.mxu1 %v7402_v43  ;;  %4648 = vmatprep.subr.mxu0 %v7968_v17 }
 0xe1c   :  { %3191 = vmatpush1.msra.mxu1 %v7409_v25  ;;  %4649 = vmatpush3.msra.mxu0 %v7415_v4 }
 0xe1d   :  { %3192 = vmatprep.subr.mxu1 %v7421_v24  ;;  %4650 = vmatprep.subr.mxu0 %v7968_v17 }
 0xe1e   :  { %3193 = vmatpush1.msra.mxu1 %v7428_v12  ;;  %4651 = vmatpush3.msra.mxu0 %v7434_v21 }
 0xe1f   :  { %3194 = vmatprep.subr.mxu1 %v7440_v20  ;;  %4652 = vmatprep.subr.mxu0 %v7968_v17 }
 0xe20   :  { %3195 = vmatpush1.msra.mxu1 %v7447_v63  ;;  %4653 = vmatpush3.msra.mxu0 %v7453_v2 }
 0xe21   :  { %3196 = vmatprep.subr.mxu1 %v7459_v1  ;;  %4654 = vmatprep.subr.mxu0 %v7968_v17 }
 0xe22   :  { %3197 = vmatpush1.msra.mxu1 %v7466_v15  ;;  %4655 = vmatpush3.msra.mxu0 %v7472_v34 }
 0xe23   :  { %3198 = vmatprep.subr.mxu1 %v7478_v58  ;;  %4656 = vmatprep.subr.mxu0 %v7968_v17 }
 0xe24   :  { %3199 = vmatpush1.msra.mxu1 %v7485_v23  ;;  %4657 = vmatpush3.msra.mxu0 %v7491_v57 }
 0xe25   :  { %3200 = vmatprep.subr.mxu1 %v7497_v28  ;;  %4658 = vmatprep.subr.mxu0 %v7968_v17 }
 0xe26   :  { %3201 = vmatpush1.msra.mxu1 %v7504_v5  ;;  %4659 = vmatpush3.msra.mxu0 %v7510_v14 }
 0xe27   :  { %3202 = vmatprep.subr.mxu1 %v7516_v7  ;;  %4660 = vmatprep.subr.mxu0 %v7968_v17 }
 0xe28   :  { %3203 = vmatpush1.msra.mxu1 %v7523_v31  ;;  %4661 = vmatpush3.msra.mxu0 %v7529_v8 }
 0xe29   :  { %3204 = vmatprep.subr.mxu1 %v7535_v9  ;;  %4662 = vmatprep.subr.mxu0 %v7968_v17 }
 0xe2a   :  { %3205 = vmatpush1.msra.mxu1 %v7542_v26  ;;  %4663 = vmatpush3.msra.mxu0 %v7548_v10 }
 0xe2b   :  { %3206 = vmatprep.subr.mxu1 %v7554_v30  ;;  %4664 = vmatprep.subr.mxu0 %v7968_v17 }
 0xe2c   :  { %3207 = vmatpush1.msra.mxu1 %v7561_v11  ;;  %4665 = vmatpush3.msra.mxu0 %v7567_v32 }
 0xe2d   :  { %3208 = vmatprep.subr.mxu1 %v7573_v33  ;;  %4666 = vmatprep.subr.mxu0 %v7968_v17 }
 0xe2e   :  { %3209 = vmatpush1.msra.mxu1 %v7580_v35  ;;  %3242 = vmatprep.mubr.f32.mxu1 %v7968_v17 }
 0xe2f   :  { %4667 = vmatpush3.msra.mxu0 %v7587_v36  ;;  %4668 = vmatprep.mubr.msk.f32.mxu0 %vm5008_vm8, %v7968_v17 }
 0xe30   :  { %3341 = vmatprep.subr.mxu1 %v8096_v22  ;;  %4671 = vmatprep.subr.mxu0 %v7968_v17 }
 0xecf   :  { %v3081_v41 = vpop.f32.mrf.mxu1  ;;  %v3152_v44 = vpop.f32.mrf.mxu0 }
 0xed0   :  { %v3156_v45 = vadd.f32 %v3081_v41, %v2024_v39  ;;  %v3170_v38 = vadd.f32 %v7063_v61, %v3152_v44  ;;  %v8100_v39 = vld [vmem:[#allocation27_spill] sm:$0xff]  ;;  %v8101_v61 = vld [vmem:[#allocation8_spill] sm:$0xff]  ;;  %v3507_v44 = vld [vmem:[%s7882_s10 + $0x18] sm:$0xff] }
 0xed1   :  { %v4635_v47 = vpop.f32.mrf.mxu0  ;;  %v3083_v46 = vpop.f32.mrf.mxu1  ;;  %v2132_v41 = vadd.f32 %v8100_v39, %v7068_v13  ;;  %v8110_v39 = vld [vmem:[#allocation12_spill] sm:$0xff] }
 0xed2   :  { %v3646_v27 = vmul.f32 -1.442695, %v3156_v45  ;;  %v3163_v36 = vadd.f32 %v3083_v46, %v2026_v54  ;;  %v3506_v54 = vld [vmem:[%s7882_s10 + $0x10] sm:$0xff] }
 0xed4   :  { %4877 = vpow2.f32 %v3646_v27  ;;  %v3647_v35 = vmul.f32 -1.442695, %v3163_v36 }
 0xed6   :  { %4879 = vpow2.f32 %v3647_v35 }
 0xee1   :  { %v4878_v33 = vpop.eup %4877 }
 0xee2   :  { %v3160_v22 = vadd.f32 1.0, %v4878_v33 }
 0xee3   :  { %v4880_v32 = vpop.eup %4879 }
 0xee4   :  { %4881 = vrcp.f32 %v3160_v22  ;;  %v3167_v11 = vadd.f32 1.0, %v4880_v32  ;;  %v3515_v32 = vld [vmem:[%s7882_s10 + $0x58] sm:$0xff]  ;;  %v3505_v22 = vld [vmem:[%s7882_s10 + $0x8] sm:$0xff] }
 0xee6   :  { %4883 = vrcp.f32 %v3167_v11  ;;  %v3516_v11 = vld [vmem:[%s7882_s10 + $0x60] sm:$0xff] }
 0xef1   :  { %v4882_v0 = vpop.eup %4881 }
 0xef2   :  { %v3171_v45 = vmul.f32 %v4882_v0, %v3170_v38  ;;  %v3508_v0 = vld [vmem:[%s7882_s10 + $0x20] sm:$0xff] }
 0xef3   :  { %v4884_v53 = vpop.eup %4883  ;;  %v3504_v38 = vld [vmem:[%s7882_s10] sm:$0xff] }
 0xef4   :  { %v3172_v47 = vadd.f32 %v3171_v45, %v2132_v41  ;;  %v3174_v27 = vsub.f32 1.0, %v4884_v53  ;;  %v3176_v35 = vmul.f32 %v4884_v53, %v7602_v55  ;;  %v3514_v55 = vld [vmem:[%s7882_s10 + $0x50] sm:$0xff] }
 0xef6   :  { %4885 = vtanh.f32 %v3172_v47 }
 0xf03   :  { %v4886_v46 = vpop.eup %4885 }
 0xf04   :  { %v3175_v36 = vmul.f32 %v4886_v46, %v3174_v27 }
 0xf06   :  { %v7706_v33 = vadd.f32 %v3176_v35, %v3175_v36  ;;  %v8111_v35 = vld [vmem:[#allocation29_spill] sm:$0xff] }
 0xf08   :  { %3243 = vmatmul.mubr.f32.vlgmr.msra.gmra.mxu1 %v7706_v33  ;;  %4669 = vmatmul.mubr.f32.vlgmr.msra.gmra.mxu0 %v7706_v33 }
 0xf09   :  { %3342 = vmatpush1.msra.mxu1 %v7320_v62  ;;  %4672 = vmatpush3.msra.mxu0 %v7610_v6  ;;  %v8102_v62 = vld [vmem:[#allocation11_spill] sm:$0xff] }
 0xf0a   :  { %3343 = vmatprep.subr.mxu1 %v7327_v16  ;;  %4673 = vmatprep.subr.mxu0 %v7968_v17  ;;  %v8103_v16 = vld [vmem:[#allocation25_spill] sm:$0xff]  ;;  %v3513_v6 = vld [vmem:[%s7882_s10 + $0x48] sm:$0xff] }
 0xf0b   :  { %3344 = vmatpush1.msra.mxu1 %v7334_v37  ;;  %4674 = vmatpush3.msra.mxu0 %v7619_v18  ;;  %v8104_v37 = vld [vmem:[#allocation13_spill] sm:$0xff]  ;;  %v3512_v18 = vld [vmem:[%s7882_s10 + $0x40] sm:$0xff] }
 0xf0c   :  { %3345 = vmatprep.subr.mxu1 %v7341_v59  ;;  %4675 = vmatprep.subr.mxu0 %v7968_v17  ;;  %v8105_v59 = vld [vmem:[#allocation22_spill] sm:$0xff] }
 0xf0d   :  { %3346 = vmatpush1.msra.mxu1 %v7348_v48  ;;  %4676 = vmatpush3.msra.mxu0 %v7628_v60  ;;  %v8106_v48 = vld [vmem:[#allocation10_spill] sm:$0xff]  ;;  %v3511_v60 = vld [vmem:[%s7882_s10 + $0x38] sm:$0xff] }
 0xf0e   :  { %3347 = vmatprep.subr.mxu1 %v7355_v29  ;;  %4677 = vmatprep.subr.mxu0 %v7968_v17  ;;  %v8107_v29 = vld [vmem:[#allocation21_spill] sm:$0xff]  ;;  %v2036_v41 = vadd.f32 %v8110_v39, %v8106_v48 }
 0xf0f   :  { %3348 = vmatpush1.msra.mxu1 %v7362_v50  ;;  %4678 = vmatpush3.msra.mxu0 %v7637_v42  ;;  %v2030_v50 = vadd.f32 %v8107_v29, %v8106_v48  ;;  %v3510_v42 = vld [vmem:[%s7882_s10 + $0x30] sm:$0xff] }
 0xf10   :  { %3349 = vmatprep.subr.mxu1 %v7369_v49  ;;  %4679 = vmatprep.subr.mxu0 %v7968_v17 }
 0xf11   :  { %3350 = vmatpush1.msra.mxu1 %v7376_v56  ;;  %4680 = vmatpush3.msra.mxu0 %v7646_v19  ;;  %v3509_v19 = vld [vmem:[%s7882_s10 + $0x28] sm:$0xff] }
 0xf12   :  { %3351 = vmatprep.subr.mxu1 %v7383_v51  ;;  %4681 = vmatprep.subr.mxu0 %v7968_v17 }
 0xf13   :  { %3352 = vmatpush1.msra.mxu1 %v7390_v3  ;;  %4682 = vmatpush3.msra.mxu0 %v7396_v52 }
 0xf14   :  { %3353 = vmatprep.subr.mxu1 %v7402_v43  ;;  %4683 = vmatprep.subr.mxu0 %v7968_v17 }
 0xf15   :  { %3354 = vmatpush1.msra.mxu1 %v7409_v25  ;;  %4684 = vmatpush3.msra.mxu0 %v7415_v4  ;;  %v8108_v25 = vld [vmem:[#allocation3_spill] sm:$0xff] }
 0xf16   :  { %3355 = vmatprep.subr.mxu1 %v7421_v24  ;;  %4685 = vmatprep.subr.mxu0 %v7968_v17  ;;  %v2032_v4 = vadd.f32 %v8108_v25, %v8065_v40 }
 0xf17   :  { %3356 = vmatpush1.msra.mxu1 %v7428_v12  ;;  %4686 = vmatpush3.msra.mxu0 %v7434_v21 }
 0xf18   :  { %3357 = vmatprep.subr.mxu1 %v7440_v20  ;;  %4687 = vmatprep.subr.mxu0 %v7968_v17 }
 0xf19   :  { %3358 = vmatpush1.msra.mxu1 %v7447_v63  ;;  %4688 = vmatpush3.msra.mxu0 %v7453_v2 }
 0xf1a   :  { %3359 = vmatprep.subr.mxu1 %v7459_v1  ;;  %4689 = vmatprep.subr.mxu0 %v7968_v17  ;;  %v7783_v1 = vld [vmem:[%s7881_s9] ss:$0 sm:$0xff] }
 0xf1b   :  { %3360 = vmatpush1.msra.mxu1 %v7466_v15  ;;  %4690 = vmatpush3.msra.mxu0 %v7472_v34 }
 0xf1c   :  { %3361 = vmatprep.subr.mxu1 %v7478_v58  ;;  %4691 = vmatprep.subr.mxu0 %v7968_v17  ;;  %v8109_v58 = vld [vmem:[#allocation19_spill] sm:$0xff] }
 0xf1d   :  { %3362 = vmatpush1.msra.mxu1 %v7485_v23  ;;  %4692 = vmatpush3.msra.mxu0 %v7491_v57  ;;  %v2137_v23 = vadd.f32 %v8109_v58, %v7068_v13 }
 0xf1e   :  { %3363 = vmatprep.subr.mxu1 %v7497_v28  ;;  %4693 = vmatprep.subr.mxu0 %v7968_v17 }
 0xf1f   :  { %3364 = vmatpush1.msra.mxu1 %v7504_v5  ;;  %4694 = vmatpush3.msra.mxu0 %v7510_v14 }
 0xf20   :  { %3365 = vmatprep.subr.mxu1 %v7516_v7  ;;  %4695 = vmatprep.subr.mxu0 %v7968_v17 }
 0xf21   :  { %3366 = vmatpush1.msra.mxu1 %v7523_v31  ;;  %4696 = vmatpush3.msra.mxu0 %v7529_v8 }
 0xf22   :  { %3367 = vmatprep.subr.mxu1 %v7535_v9  ;;  %4697 = vmatprep.subr.mxu0 %v7968_v17 }
 0xf23   :  { %3368 = vmatpush1.msra.mxu1 %v7542_v26  ;;  %4698 = vmatpush3.msra.mxu0 %v7548_v10  ;;  %v3519_v26 = vld [vmem:[%s7882_s10 + $0x78] sm:$0xff]  ;;  %v3518_v10 = vld [vmem:[%s7882_s10 + $0x70] sm:$0xff] }
 0xf24   :  { %3369 = vmatprep.subr.mxu1 %v7554_v30  ;;  %4699 = vmatprep.subr.mxu0 %v7968_v17  ;;  %v3517_v30 = vld [vmem:[%s7882_s10 + $0x68] sm:$0xff] }
 0xf25   :  { %3370 = vmatpush1.msra.mxu1 %v8101_v61  ;;  %4700 = vmatpush3.msra.mxu0 %v8102_v62 }
 0xf26   :  { %3371 = vmatprep.subr.mxu1 %v8103_v16  ;;  %4701 = vmatprep.subr.mxu0 %v7968_v17 }
 0xf27   :  { %3372 = vmatpush1.msra.mxu1 %v8104_v37  ;;  %3405 = vmatprep.mubr.f32.mxu1 %v7968_v17 }
 0xf28   :  { %4702 = vmatpush3.msra.mxu0 %v8105_v59  ;;  %4703 = vmatprep.mubr.msk.f32.mxu0 %vm5008_vm8, %v7968_v17 }
 0xf29   :  { %4706 = vmatprep.subr.mxu1 %v7968_v17 }
 0xfc8   :  { %v3244_v49 = vpop.f32.mrf.mxu1  ;;  %v3315_v56 = vpop.f32.mrf.mxu0 }
 0xfc9   :  { %v3319_v51 = vadd.f32 %v3244_v49, %v2030_v50  ;;  %v3333_v15 = vadd.f32 %v7783_v1, %v3315_v56  ;;  %v8112_v50 = vld [vmem:[#allocation28_spill] sm:$0xff] }
 0xfca   :  { %v4670_v3 = vpop.f32.mrf.mxu0  ;;  %v3246_v43 = vpop.f32.mrf.mxu1  ;;  %v2142_v49 = vadd.f32 %v8112_v50, %v7068_v13 }
 0xfcb   :  { %v3648_v52 = vmul.f32 -1.442695, %v3319_v51  ;;  %v3326_v24 = vadd.f32 %v3246_v43, %v2032_v4 }
 0xfcd   :  { %4887 = vpow2.f32 %v3648_v52  ;;  %v3649_v12 = vmul.f32 -1.442695, %v3326_v24  ;;  %v3652_v24 = vld [vmem:[%s7883_s11] ss:$0 sm:$0xff] }
 0xfcf   :  { %4889 = vpow2.f32 %v3649_v12 }
 0xfda   :  { %v4888_v21 = vpop.eup %4887 }
 0xfdb   :  { %v3323_v20 = vadd.f32 1.0, %v4888_v21 }
 0xfdc   :  { %v4890_v63 = vpop.eup %4889 }
 0xfdd   :  { %4891 = vrcp.f32 %v3323_v20  ;;  %v3330_v2 = vadd.f32 1.0, %v4890_v63 }
 0xfdf   :  { %4893 = vrcp.f32 %v3330_v2 }
 0xfea   :  { %v4892_v34 = vpop.eup %4891 }
 0xfeb   :  { %v3334_v57 = vmul.f32 %v4892_v34, %v3333_v15 }
 0xfec   :  { %v4894_v5 = vpop.eup %4893 }
 0xfed   :  { %v3335_v28 = vadd.f32 %v3334_v57, %v2137_v23  ;;  %v3337_v14 = vsub.f32 1.0, %v4894_v5  ;;  %v3339_v8 = vmul.f32 %v4894_v5, %v7706_v33  ;;  %v2038_v33 = vadd.f32 %v8111_v35, %v8065_v40 }
 0xfef   :  { %4895 = vtanh.f32 %v3335_v28 }
 0xffc   :  { %v4896_v7 = vpop.eup %4895 }
 0xffd   :  { %v3338_v31 = vmul.f32 %v4896_v7, %v3337_v14 }
 0xfff   :  { %v7789_v9 = vadd.f32 %v3339_v8, %v3338_v31 }
0x1001   :  { %3406 = vmatmul.mubr.f32.vlgmr.msra.gmra.mxu1 %v7789_v9  ;;  %4704 = vmatmul.mubr.f32.vlgmr.msra.gmra.mxu0 %v7789_v9 }
0x1002   :  { %4738 = vmatprep.mubr.msk.f32.mxu1 %vm5008_vm8, %v7968_v17  ;;  %4707 = vmatpush3.msra.mxu1 %v3519_v26 }
0x1003   :  { %4708 = vmatprep.subr.mxu1 %v7968_v17 }
0x1004   :  { %4709 = vmatpush3.msra.mxu1 %v3518_v10 }
0x1005   :  { %4710 = vmatprep.subr.mxu1 %v7968_v17 }
0x1006   :  { %4711 = vmatpush3.msra.mxu1 %v3517_v30 }
0x1007   :  { %4712 = vmatprep.subr.mxu1 %v7968_v17 }
0x1008   :  { %4713 = vmatpush3.msra.mxu1 %v3516_v11 }
0x1009   :  { %4714 = vmatprep.subr.mxu1 %v7968_v17 }
0x100a   :  { %4715 = vmatpush3.msra.mxu1 %v3515_v32 }
0x100b   :  { %4716 = vmatprep.subr.mxu1 %v7968_v17 }
0x100c   :  { %4717 = vmatpush3.msra.mxu1 %v3514_v55 }
0x100d   :  { %4718 = vmatprep.subr.mxu1 %v7968_v17 }
0x100e   :  { %4719 = vmatpush3.msra.mxu1 %v3513_v6 }
0x100f   :  { %4720 = vmatprep.subr.mxu1 %v7968_v17 }
0x1010   :  { %4721 = vmatpush3.msra.mxu1 %v3512_v18 }
0x1011   :  { %4722 = vmatprep.subr.mxu1 %v7968_v17 }
0x1012   :  { %4723 = vmatpush3.msra.mxu1 %v3511_v60 }
0x1013   :  { %4724 = vmatprep.subr.mxu1 %v7968_v17 }
0x1014   :  { %4725 = vmatpush3.msra.mxu1 %v3510_v42 }
0x1015   :  { %4726 = vmatprep.subr.mxu1 %v7968_v17 }
0x1016   :  { %4727 = vmatpush3.msra.mxu1 %v3509_v19 }
0x1017   :  { %4728 = vmatprep.subr.mxu1 %v7968_v17 }
0x1018   :  { %4729 = vmatpush3.msra.mxu1 %v3508_v0 }
0x1019   :  { %4730 = vmatprep.subr.mxu1 %v7968_v17 }
0x101a   :  { %4731 = vmatpush3.msra.mxu1 %v3507_v44 }
0x101b   :  { %4732 = vmatprep.subr.mxu1 %v7968_v17 }
0x101c   :  { %4733 = vmatpush3.msra.mxu1 %v3506_v54 }
0x101d   :  { %4734 = vmatprep.subr.mxu1 %v7968_v17 }
0x101e   :  { %4735 = vmatpush3.msra.mxu1 %v3505_v22 }
0x101f   :  { %4736 = vmatprep.subr.mxu1 %v7968_v17 }
0x1020   :  { %4737 = vmatpush3.msra.mxu1 %v3504_v38 }
0x10c1   :  { %v3407_v45 = vpop.f32.mrf.mxu1  ;;  %v3478_v47 = vpop.f32.mrf.mxu0 }
0x10c2   :  { %v3482_v53 = vadd.f32 %v3407_v45, %v2036_v41  ;;  %v3496_v48 = vadd.f32 %v7783_v1, %v3478_v47 }
0x10c3   :  { %v4705_v27 = vpop.f32.mrf.mxu0  ;;  %v3409_v36 = vpop.f32.mrf.mxu1 }
0x10c4   :  { %v3650_v46 = vmul.f32 -1.442695, %v3482_v53  ;;  %v3489_v61 = vadd.f32 %v3409_v36, %v2038_v33 }
0x10c6   :  { %4897 = vpow2.f32 %v3650_v46  ;;  %v3651_v62 = vmul.f32 -1.442695, %v3489_v61 }
0x10c8   :  { %4899 = vpow2.f32 %v3651_v62 }
0x10d3   :  { %v4898_v16 = vpop.eup %4897 }
0x10d4   :  { %v3486_v37 = vadd.f32 1.0, %v4898_v16 }
0x10d5   :  { %v4900_v17 = vpop.eup %4899 }
0x10d6   :  { %4901 = vrcp.f32 %v3486_v37  ;;  %v3493_v59 = vadd.f32 1.0, %v4900_v17 }
0x10d8   :  { %4903 = vrcp.f32 %v3493_v59 }
0x10e3   :  { %v4902_v29 = vpop.eup %4901 }
0x10e4   :  { %v3497_v56 = vmul.f32 %v4902_v29, %v3496_v48 }
0x10e5   :  { %v4904_v40 = vpop.eup %4903 }
0x10e6   :  { %v3498_v51 = vadd.f32 %v3497_v56, %v2142_v49  ;;  %v3500_v3 = vsub.f32 1.0, %v4904_v40  ;;  %v3502_v25 = vmul.f32 %v4904_v40, %v7789_v9 }
0x10e8   :  { %4905 = vtanh.f32 %v3498_v51 }
0x10f5   :  { %v4906_v52 = vpop.eup %4905 }
0x10f6   :  { %v3501_v43 = vmul.f32 %v4906_v52, %v3500_v3 }
0x10f8   :  { %v3503_v4 = vadd.f32 %v3502_v25, %v3501_v43 }
0x10fa   :  { %4739 = vmatmul.mubr.f32.vlgmr.msra.gmra.mxu1 %v3503_v4 }
0x11ba   :  { %v3593_v12 = vpop.f32.mrf.mxu1 }
0x11bb   :  { %v3594_v21 = vadd.f32 %v3652_v24, %v3593_v12 }
0x11bc   :  { %v4740_v20 = vpop.f32.mrf.mxu1 }
0x11bd   :  { %3597 = vst [vmem:[%s7884_s12] sm:$0xff] %v3594_v21 }

</bundles_post_ra>
